<compile_context>
chip_gen: v7x
topology: tpu7x:2x2x1
jax: 0.10.0
libtpu: 0.0.40
codegen_flags: <defaults>
</compile_context>

<pallas_src>
import jax
import jax.numpy as jnp
from jax.experimental import pallas as pl
from jax.experimental.pallas import tpu as pltpu

# ---------------- small, module-consistent configuration --------------------
B            = 2
IN_CH        = 3
IMG_H, IMG_W = 56, 32            # patch grid 7 x 4 = 28 patches (stand-in for 14x14=196)
PATCH        = 8
GRID_H, GRID_W = IMG_H // PATCH, IMG_W // PATCH
NUM_PATCH    = GRID_H * GRID_W   # 28
SEQ          = NUM_PATCH + 1     # 29 valid tokens (+cls)
SEQ_PAD      = 32                # padded sequence length (sublane friendly)
EMBED        = 32                # stand-in for 768
HEADS        = 4
HEAD_DIM     = EMBED // HEADS
MLP_HID      = 4 * EMBED
DEPTH        = 12                # num_blocks
PART         = 14                # part
LMBD         = 8.0               # lmbd
LINEAR_NUM   = 32                # stand-in for 256
CLASS_NUM    = 16                # stand-in for 751
CLS_PAD      = 128               # lane-dense classifier output width
PATCH_DIM    = IN_CH * PATCH * PATCH   # 192
ATT_W        = HEADS * SEQ_PAD         # 128 (lane-dense all-heads key axis)
LN_EPS       = 1e-6
BN_EPS       = 1e-5
NEG_BIG      = -1e30
BF16         = jnp.bfloat16
F32          = jnp.float32


# ---------------------------- in-kernel helpers ------------------------------
def _ln(x, g, b, eps=LN_EPS):
    mu = jnp.mean(x, axis=-1, keepdims=True)
    var = jnp.mean(jnp.square(x - mu), axis=-1, keepdims=True)
    return (x - mu) * jax.lax.rsqrt(var + eps) * g + b


def _gelu(x):
    # TODO(synk): timm ViT uses exact erf-GELU; tanh approximation used since
    # erf has no guaranteed Mosaic lowering (numerically ~1e-3 close).
    c = jnp.float32(0.7978845608028654)  # sqrt(2/pi)
    return 0.5 * x * (1.0 + jnp.tanh(c * (x + 0.044715 * x * x * x)))


# ------------------------------ fused kernel ---------------------------------
def _fused_kernel(ppad_ref, pw_ref, tb_ref,
                  g1_ref, b1_ref, wqkv_ref, bqkv_ref, wproj_ref, bproj_ref,
                  g2_ref, b2_ref, wfc1_ref, bfc1_ref, wfc2_ref, bfc2_ref,
                  ng_ref, nb_ref,
                  hm_ref, bias_ref, seg_ref, pmat_ref,
                  cw1_ref, cb1_ref, cs_ref, ct_ref, cw2_ref, cb2_ref,
                  o_ref):
    # ---- prologue: patch embed + cls/pos token assembly (runs once) --------
    x = (jnp.dot(ppad_ref[...], pw_ref[...], preferred_element_type=F32)
         + tb_ref[...])                                       # (B*S, D) f32

    # loop-invariant constants hoisted out of the depth loop
    hm = jnp.broadcast_to(hm_ref[...], (B, ATT_W, EMBED))     # bf16 block head mask
    bias = bias_ref[...]                                      # (1, ATT_W) f32 pad bias
    seg = seg_ref[...]                                        # (ATT_W, ATT_W) f32

    def block(d, x):
        # -- attention (pre-norm); 1/sqrt(head_dim) folded into Wq/bq --------
        h = _ln(x, g1_ref[d], b1_ref[d])
        qkv = (jnp.dot(h.astype(BF16), wqkv_ref[d], preferred_element_type=F32)
               + bqkv_ref[d])                                 # (B*S, 3D) f32
        q = qkv[:, :EMBED].astype(BF16).reshape(B, SEQ_PAD, EMBED)
        k = qkv[:, EMBED:2 * EMBED].astype(BF16).reshape(B, SEQ_PAD, EMBED)
        v = qkv[:, 2 * EMBED:].astype(BF16).reshape(B, SEQ_PAD, EMBED)
        # lane-dense all-heads layout: replicate K/V along sublanes, mask heads
        k4 = jnp.concatenate([k] * HEADS, axis=1) * hm        # (B, H*S, D) bf16
        v4 = jnp.concatenate([v] * HEADS, axis=1) * hm        # (B, H*S, D) bf16
        s = jnp.einsum('bqe,bje->bqj', q, k4,
                       preferred_element_type=F32)            # (B, S, H*S)
        s = s.reshape(B * SEQ_PAD, ATT_W) + bias              # additive pad mask
        m = jnp.max(s, axis=-1, keepdims=True)                # row max (valid per segment)
        e = jnp.exp(s - m)
        den = jnp.dot(e, seg, preferred_element_type=F32)     # per-head-block sums
        den = jnp.maximum(den, 1e-30)
        p = (e * pl.reciprocal(den, approx=True)).astype(BF16)
        ctx = jnp.einsum('bqj,bje->bqe', p.reshape(B, SEQ_PAD, ATT_W), v4,
                         preferred_element_type=F32)          # concat-of-heads order
        ctx = ctx.reshape(B * SEQ_PAD, EMBED)
        x = x + jnp.dot(ctx.astype(BF16), wproj_ref[d],
                        preferred_element_type=F32) + bproj_ref[d]
        # -- MLP --------------------------------------------------------------
        h2 = _ln(x, g2_ref[d], b2_ref[d])
        h2 = jnp.dot(h2.astype(BF16), wfc1_ref[d],
                     preferred_element_type=F32) + bfc1_ref[d]
        h2 = _gelu(h2)
        h2 = jnp.dot(h2.astype(BF16), wfc2_ref[d],
                     preferred_element_type=F32) + bfc2_ref[d]
        return x + h2

    x = jax.lax.fori_loop(0, DEPTH, block, x)

    # ---- epilogue: final LN + local aggregation + 14 ClassBlocks -----------
    xn = _ln(x, ng_ref[...], nb_ref[...])                     # (B*S, D)
    # block-diagonal pooling matrix folds cls blending + avg-pool and drops
    # padded rows; output rows are (part-major, batch-minor).
    parts = jnp.dot(pmat_ref[...], xn.astype(BF16),
                    preferred_element_type=F32)               # (PART*B, D)
    parts = parts.reshape(PART, B, EMBED)
    # ClassBlock (eval): Linear -> folded BatchNorm1d -> [Dropout=id] -> Linear
    hcls = jnp.einsum('pbd,pdl->pbl', parts.astype(BF16), cw1_ref[...],
                      preferred_element_type=F32) + cb1_ref[...]
    hcls = hcls * cs_ref[...] + ct_ref[...]
    logits = jnp.einsum('pbl,plc->pbc', hcls.astype(BF16), cw2_ref[...],
                        preferred_element_type=F32) + cb2_ref[...]
    o_ref[...] = logits.reshape(PART * B, CLS_PAD)            # lane-dense slab


# ------------------------------- wrapper -------------------------------------
def la_transformer_forward(x, params):
    # -------- wrapper-side layout / parameter folding (no activation math) --
    p = x.reshape(B, IN_CH, GRID_H, PATCH, GRID_W, PATCH)
    p = p.transpose(0, 2, 4, 1, 3, 5).reshape(B, NUM_PATCH, PATCH_DIM)
    ppad = jnp.zeros((B, SEQ_PAD, PATCH_DIM), F32)
    ppad = ppad.at[:, 1:1 + NUM_PATCH, :].set(p)
    ppad = ppad.reshape(B * SEQ_PAD, PATCH_DIM).astype(BF16)

    # token bias: cls+pos at row 0, pos+patch_bias at patch rows, 0 at pad rows
    tb = jnp.zeros((SEQ_PAD, EMBED), F32)
    tb = tb.at[0].set(params["cls_token"][0, 0] + params["pos_embed"][0, 0])
    tb = tb.at[1:SEQ].set(params["pos_embed"][0, 1:SEQ] + params["patch_b"][0])
    tb = jnp.tile(tb, (B, 1))                                 # (B*SEQ_PAD, D)

    # per-depth weights: fold attention scale into Q columns, cast matmul
    # operands to bf16 (biases/LN params stay f32).
    blk = params["blocks"]
    qscale = jnp.concatenate([jnp.full((EMBED,), HEAD_DIM ** -0.5, F32),
                              jnp.ones((2 * EMBED,), F32)])
    wqkv = (blk["wqkv"] * qscale).astype(BF16)
    bqkv = blk["bqkv"] * qscale

    # constant attention tables (head block mask, key-pad bias, segment sums)
    j = jnp.arange(ATT_W)
    e_idx = jnp.arange(EMBED)
    head_mask = (j[:, None] // SEQ_PAD == e_idx[None, :] // HEAD_DIM).astype(BF16)
    attn_bias = jnp.where((j % SEQ_PAD) < SEQ, 0.0, NEG_BIG).astype(F32)
    attn_bias = attn_bias.reshape(1, ATT_W)
    seg_ones = (j[:, None] // SEQ_PAD == j[None, :] // SEQ_PAD).astype(F32)

    # pooling matrix: L = (avg(group) + lmbd*cls) / (1+lmbd), block-diag over B
    g = NUM_PATCH // PART
    pm = jnp.zeros((PART, SEQ_PAD), F32)
    pm = pm.at[:, 0].set(LMBD / (1.0 + LMBD))
    onehot = jax.nn.one_hot(jnp.arange(NUM_PATCH) // g, PART, dtype=F32).T
    pm = pm.at[:, 1:1 + NUM_PATCH].set(onehot / (g * (1.0 + LMBD)))
    pmat = jnp.zeros((PART * B, B * SEQ_PAD), F32)
    for b in range(B):                                        # row p*B+b <- batch b
        pmat = pmat.at[b::B, b * SEQ_PAD:(b + 1) * SEQ_PAD].set(pm)
    pmat = pmat.astype(BF16)

    cp = params["cls"]
    w2p = jnp.zeros((PART, LINEAR_NUM, CLS_PAD), F32)
    w2p = w2p.at[:, :, :CLASS_NUM].set(cp["w2"])
    b2p = jnp.zeros((PART, 1, CLS_PAD), F32)
    b2p = b2p.at[:, :, :CLASS_NUM].set(cp["b2"])

    args = (ppad, params["patch_w"].astype(BF16), tb,
            blk["g1"], blk["b1"], wqkv, bqkv,
            blk["wproj"].astype(BF16), blk["bproj"],
            blk["g2"], blk["b2"],
            blk["wfc1"].astype(BF16), blk["bfc1"],
            blk["wfc2"].astype(BF16), blk["bfc2"],
            params["norm_g"], params["norm_b"],
            head_mask, attn_bias, seg_ones, pmat,
            cp["w1"].astype(BF16), cp["b1"], cp["bn_scale"], cp["bn_shift"],
            w2p.astype(BF16), b2p)

    # single grid-less invocation: everything VMEM-resident (<1 MiB total),
    # no per-depth grid steps / streaming DMA bookkeeping.
    vmem = pl.BlockSpec(memory_space=pltpu.MemorySpace.VMEM)
    out = pl.pallas_call(
        _fused_kernel,
        out_shape=jax.ShapeDtypeStruct((PART * B, CLS_PAD), F32),
        in_specs=[vmem] * len(args),
        out_specs=vmem,
    )(*args)

    out = out.reshape(PART, B, CLS_PAD)[:, :, :CLASS_NUM]
    return [out[i] for i in range(PART)]                      # 14 x (B, CLASS_NUM)


# --------------------------- parameter init -----------------------------------
def init_params(key):
    keys = iter(jax.random.split(key, 64))
    nrm = lambda shape, std: std * jax.random.normal(next(keys), shape, F32)
    zeros = lambda s: jnp.zeros(s, F32)
    ones = lambda s: jnp.ones(s, F32)

    p = {}
    p["patch_w"] = nrm((PATCH_DIM, EMBED), 0.02)
    p["patch_b"] = zeros((1, EMBED))
    p["cls_token"] = nrm((1, 1, EMBED), 0.02)
    p["pos_embed"] = nrm((1, SEQ, EMBED), 0.02)

    # per-depth weights stacked along the leading axis (VMEM-resident, indexed in-kernel)
    p["blocks"] = dict(
        g1=ones((DEPTH, 1, EMBED)), b1=zeros((DEPTH, 1, EMBED)),
        wqkv=nrm((DEPTH, EMBED, 3 * EMBED), 0.02), bqkv=zeros((DEPTH, 1, 3 * EMBED)),
        wproj=nrm((DEPTH, EMBED, EMBED), 0.02), bproj=zeros((DEPTH, 1, EMBED)),
        g2=ones((DEPTH, 1, EMBED)), b2=zeros((DEPTH, 1, EMBED)),
        wfc1=nrm((DEPTH, EMBED, MLP_HID), 0.02), bfc1=zeros((DEPTH, 1, MLP_HID)),
        wfc2=nrm((DEPTH, MLP_HID, EMBED), 0.02), bfc2=zeros((DEPTH, 1, EMBED)),
    )
    p["norm_g"] = ones((1, EMBED))
    p["norm_b"] = zeros((1, EMBED))

    # 14 ClassBlocks: Linear(D->L)[kaiming] + BN1d(L)(eval) + Dropout(eval) + Linear(L->C)[std=0.001]
    w1 = nrm((PART, EMBED, LINEAR_NUM), (2.0 / EMBED) ** 0.5)
    b1 = zeros((PART, 1, LINEAR_NUM))
    bn_gamma = 1.0 + nrm((PART, 1, LINEAR_NUM), 0.02)
    bn_beta = zeros((PART, 1, LINEAR_NUM))
    run_mean = zeros((PART, 1, LINEAR_NUM))
    run_var = ones((PART, 1, LINEAR_NUM))
    bn_scale = bn_gamma * jax.lax.rsqrt(run_var + BN_EPS)
    bn_shift = bn_beta - run_mean * bn_scale
    w2 = nrm((PART, LINEAR_NUM, CLASS_NUM), 0.001)
    b2 = zeros((PART, 1, CLASS_NUM))
    p["cls"] = dict(w1=w1, b1=b1, bn_scale=bn_scale, bn_shift=bn_shift, w2=w2, b2=b2)
    return p


# --------------------------------- main ----------------------------------------
if __name__ == "__main__":
    key = jax.random.PRNGKey(0)
    k_params, k_x = jax.random.split(key)
    params = init_params(k_params)
    x = jax.random.normal(k_x, (B, IN_CH, IMG_H, IMG_W), F32)

    fwd = jax.jit(la_transformer_forward)
    y = fwd(x, params)
    y = jax.block_until_ready(y)

    assert len(y) == PART
    assert all(t.shape == (B, CLASS_NUM) for t in y)
    assert all(bool(jnp.all(jnp.isfinite(t))) for t in y)
    print("KERNEL_OK")
</pallas_src>

<mosaic_0001>
module attributes {stable_mosaic.version = 11 : i64} {
  func.func @_fused_kernel(%arg0: memref<64x192xbf16, #tpu.memory_space<vmem>>, %arg1: memref<192x32xbf16, #tpu.memory_space<vmem>>, %arg2: memref<64x32xf32, #tpu.memory_space<vmem>>, %arg3: memref<12x1x32xf32, #tpu.memory_space<vmem>>, %arg4: memref<12x1x32xf32, #tpu.memory_space<vmem>>, %arg5: memref<12x32x96xbf16, #tpu.memory_space<vmem>>, %arg6: memref<12x1x96xf32, #tpu.memory_space<vmem>>, %arg7: memref<12x32x32xbf16, #tpu.memory_space<vmem>>, %arg8: memref<12x1x32xf32, #tpu.memory_space<vmem>>, %arg9: memref<12x1x32xf32, #tpu.memory_space<vmem>>, %arg10: memref<12x1x32xf32, #tpu.memory_space<vmem>>, %arg11: memref<12x32x128xbf16, #tpu.memory_space<vmem>>, %arg12: memref<12x1x128xf32, #tpu.memory_space<vmem>>, %arg13: memref<12x128x32xbf16, #tpu.memory_space<vmem>>, %arg14: memref<12x1x32xf32, #tpu.memory_space<vmem>>, %arg15: memref<1x32xf32, #tpu.memory_space<vmem>>, %arg16: memref<1x32xf32, #tpu.memory_space<vmem>>, %arg17: memref<128x32xbf16, #tpu.memory_space<vmem>>, %arg18: memref<1x128xf32, #tpu.memory_space<vmem>>, %arg19: memref<128x128xf32, #tpu.memory_space<vmem>>, %arg20: memref<28x64xbf16, #tpu.memory_space<vmem>>, %arg21: memref<14x32x32xbf16, #tpu.memory_space<vmem>>, %arg22: memref<14x1x32xf32, #tpu.memory_space<vmem>>, %arg23: memref<14x1x32xf32, #tpu.memory_space<vmem>>, %arg24: memref<14x1x32xf32, #tpu.memory_space<vmem>>, %arg25: memref<14x32x128xbf16, #tpu.memory_space<vmem>>, %arg26: memref<14x1x128xf32, #tpu.memory_space<vmem>>, %arg27: memref<28x128xf32, #tpu.memory_space<vmem>>) attributes {dimension_semantics = [], scalar_prefetch = 0 : i64, scratch_operands = 0 : i64, tpu.core_type = #tpu.core_type<tc>} {
    %c0 = arith.constant 0 : index
    %c0_0 = arith.constant 0 : index
    %0 = vector.load %arg0[%c0, %c0_0] : memref<64x192xbf16, #tpu.memory_space<vmem>>, vector<64x192xbf16>
    %c0_1 = arith.constant 0 : index
    %c0_2 = arith.constant 0 : index
    %1 = vector.load %arg1[%c0_1, %c0_2] : memref<192x32xbf16, #tpu.memory_space<vmem>>, vector<192x32xbf16>
    %cst = arith.constant dense<0.000000e+00> : vector<64x32xf32>
    %2 = tpu.matmul %0, %1, %cst {dimension_numbers = #tpu.dot_dimension_numbers<[1], [0], [0], [1], [0, 0, 1, 1], [], []>} : vector<64x192xbf16>, vector<192x32xbf16>, vector<64x32xf32> -> vector<64x32xf32>
    %c0_3 = arith.constant 0 : index
    %c0_4 = arith.constant 0 : index
    %3 = vector.load %arg2[%c0_3, %c0_4] : memref<64x32xf32, #tpu.memory_space<vmem>>, vector<64x32xf32>
    %4 = arith.addf %2, %3 : vector<64x32xf32>
    %c0_5 = arith.constant 0 : index
    %c0_6 = arith.constant 0 : index
    %5 = vector.load %arg17[%c0_5, %c0_6] : memref<128x32xbf16, #tpu.memory_space<vmem>>, vector<128x32xbf16>
    %6 = vector.shape_cast %5 : vector<128x32xbf16> to vector<1x128x32xbf16>
    %7 = vector.broadcast %6 : vector<1x128x32xbf16> to vector<2x128x32xbf16>
    %c0_7 = arith.constant 0 : index
    %c0_8 = arith.constant 0 : index
    %8 = vector.load %arg18[%c0_7, %c0_8] : memref<1x128xf32, #tpu.memory_space<vmem>>, vector<1x128xf32>
    %c0_9 = arith.constant 0 : index
    %c0_10 = arith.constant 0 : index
    %9 = vector.load %arg19[%c0_9, %c0_10] : memref<128x128xf32, #tpu.memory_space<vmem>>, vector<128x128xf32>
    %c0_i32 = arith.constant 0 : i32
    %c12_i32 = arith.constant 12 : i32
    %10 = arith.addi %c0_i32, %c12_i32 : i32
    %c1_i32 = arith.constant 1 : i32
    %11 = scf.for %arg28 = %c0_i32 to %10 step %c1_i32 iter_args(%arg29 = %4) -> (vector<64x32xf32>)  : i32 {
      %60 = arith.index_cast %arg28 : i32 to index
      %c0_46 = arith.constant 0 : index
      %c0_47 = arith.constant 0 : index
      %61 = vector.load %arg3[%60, %c0_46, %c0_47] : memref<12x1x32xf32, #tpu.memory_space<vmem>>, vector<1x1x32xf32>
      %62 = vector.shape_cast %61 : vector<1x1x32xf32> to vector<1x32xf32>
      %63 = arith.index_cast %arg28 : i32 to index
      %c0_48 = arith.constant 0 : index
      %c0_49 = arith.constant 0 : index
      %64 = vector.load %arg4[%63, %c0_48, %c0_49] : memref<12x1x32xf32, #tpu.memory_space<vmem>>, vector<1x1x32xf32>
      %65 = vector.shape_cast %64 : vector<1x1x32xf32> to vector<1x32xf32>
      %cst_50 = arith.constant dense<0.000000e+00> : vector<64xf32>
      %66 = vector.multi_reduction <add>, %arg29, %cst_50 [1] : vector<64x32xf32> to vector<64xf32>
      %67 = vector.shape_cast %66 : vector<64xf32> to vector<64x1xf32>
      %cst_51 = arith.constant 3.200000e+01 : f32
      %68 = vector.broadcast %cst_51 : f32 to vector<64x1xf32>
      %69 = arith.divf %67, %68 : vector<64x1xf32>
      %70 = vector.broadcast %69 : vector<64x1xf32> to vector<64x32xf32>
      %71 = arith.subf %arg29, %70 : vector<64x32xf32>
      %72 = arith.mulf %71, %71 : vector<64x32xf32>
      %cst_52 = arith.constant dense<0.000000e+00> : vector<64xf32>
      %73 = vector.multi_reduction <add>, %72, %cst_52 [1] : vector<64x32xf32> to vector<64xf32>
      %74 = vector.shape_cast %73 : vector<64xf32> to vector<64x1xf32>
      %cst_53 = arith.constant 3.200000e+01 : f32
      %75 = vector.broadcast %cst_53 : f32 to vector<64x1xf32>
      %76 = arith.divf %74, %75 : vector<64x1xf32>
      %77 = vector.broadcast %69 : vector<64x1xf32> to vector<64x32xf32>
      %78 = arith.subf %arg29, %77 : vector<64x32xf32>
      %cst_54 = arith.constant 9.99999997E-7 : f32
      %79 = vector.broadcast %cst_54 : f32 to vector<64x1xf32>
      %80 = arith.addf %76, %79 : vector<64x1xf32>
      %81 = math.rsqrt %80 : vector<64x1xf32>
      %82 = vector.broadcast %81 : vector<64x1xf32> to vector<64x32xf32>
      %83 = arith.mulf %78, %82 : vector<64x32xf32>
      %84 = vector.broadcast %62 : vector<1x32xf32> to vector<64x32xf32>
      %85 = arith.mulf %83, %84 : vector<64x32xf32>
      %86 = vector.broadcast %65 : vector<1x32xf32> to vector<64x32xf32>
      %87 = arith.addf %85, %86 : vector<64x32xf32>
      %88 = arith.truncf %87 : vector<64x32xf32> to vector<64x32xbf16>
      %89 = arith.index_cast %arg28 : i32 to index
      %c0_55 = arith.constant 0 : index
      %c0_56 = arith.constant 0 : index
      %90 = vector.load %arg5[%89, %c0_55, %c0_56] : memref<12x32x96xbf16, #tpu.memory_space<vmem>>, vector<1x32x96xbf16>
      %91 = vector.shape_cast %90 : vector<1x32x96xbf16> to vector<32x96xbf16>
      %cst_57 = arith.constant dense<0.000000e+00> : vector<64x96xf32>
      %92 = tpu.matmul %88, %91, %cst_57 {dimension_numbers = #tpu.dot_dimension_numbers<[1], [0], [0], [1], [0, 0, 1, 1], [], []>} : vector<64x32xbf16>, vector<32x96xbf16>, vector<64x96xf32> -> vector<64x96xf32>
      %93 = arith.index_cast %arg28 : i32 to index
      %c0_58 = arith.constant 0 : index
      %c0_59 = arith.constant 0 : index
      %94 = vector.load %arg6[%93, %c0_58, %c0_59] : memref<12x1x96xf32, #tpu.memory_space<vmem>>, vector<1x1x96xf32>
      %95 = vector.shape_cast %94 : vector<1x1x96xf32> to vector<1x96xf32>
      %96 = vector.broadcast %95 : vector<1x96xf32> to vector<64x96xf32>
      %97 = arith.addf %92, %96 : vector<64x96xf32>
      %98 = vector.extract_strided_slice %97 {offsets = [0, 0], sizes = [64, 32], strides = [1, 1]} : vector<64x96xf32> to vector<64x32xf32>
      %99 = arith.truncf %98 : vector<64x32xf32> to vector<64x32xbf16>
      %100 = vector.shape_cast %99 : vector<64x32xbf16> to vector<2x32x32xbf16>
      %101 = vector.extract_strided_slice %97 {offsets = [0, 32], sizes = [64, 32], strides = [1, 1]} : vector<64x96xf32> to vector<64x32xf32>
      %102 = arith.truncf %101 : vector<64x32xf32> to vector<64x32xbf16>
      %103 = vector.shape_cast %102 : vector<64x32xbf16> to vector<2x32x32xbf16>
      %104 = vector.extract_strided_slice %97 {offsets = [0, 64], sizes = [64, 32], strides = [1, 1]} : vector<64x96xf32> to vector<64x32xf32>
      %105 = arith.truncf %104 : vector<64x32xf32> to vector<64x32xbf16>
      %106 = vector.shape_cast %105 : vector<64x32xbf16> to vector<2x32x32xbf16>
      %107 = tpu.concatenate %103, %103, %103, %103 in 1 : vector<2x32x32xbf16>, vector<2x32x32xbf16>, vector<2x32x32xbf16>, vector<2x32x32xbf16> -> vector<2x128x32xbf16>
      %108 = arith.mulf %107, %7 : vector<2x128x32xbf16>
      %109 = tpu.concatenate %106, %106, %106, %106 in 1 : vector<2x32x32xbf16>, vector<2x32x32xbf16>, vector<2x32x32xbf16>, vector<2x32x32xbf16> -> vector<2x128x32xbf16>
      %110 = arith.mulf %109, %7 : vector<2x128x32xbf16>
      "tpu.trace_start"() <{level = 10 : i32, message = "bqe,bje->bqj"}> : () -> ()
      %cst_60 = arith.constant dense<0.000000e+00> : vector<2x32x128xf32>
      %111 = tpu.matmul %100, %108, %cst_60 {dimension_numbers = #tpu.dot_dimension_numbers<[2], [2], [1], [1], [0, 0, 0, 1, 1, 1], [0], [0]>} : vector<2x32x32xbf16>, vector<2x128x32xbf16>, vector<2x32x128xf32> -> vector<2x32x128xf32>
      "tpu.trace_stop"() : () -> ()
      %112 = vector.shape_cast %111 : vector<2x32x128xf32> to vector<64x128xf32>
      %113 = vector.broadcast %8 : vector<1x128xf32> to vector<64x128xf32>
      %114 = arith.addf %112, %113 : vector<64x128xf32>
      %cst_61 = arith.constant dense<0xFF800000> : vector<64xf32>
      %115 = vector.multi_reduction <maximumf>, %114, %cst_61 [1] : vector<64x128xf32> to vector<64xf32>
      %116 = vector.shape_cast %115 : vector<64xf32> to vector<64x1xf32>
      %117 = vector.broadcast %116 : vector<64x1xf32> to vector<64x128xf32>
      %118 = arith.subf %114, %117 : vector<64x128xf32>
      %119 = math.exp %118 : vector<64x128xf32>
      %cst_62 = arith.constant dense<0.000000e+00> : vector<64x128xf32>
      %120 = tpu.matmul %119, %9, %cst_62 {dimension_numbers = #tpu.dot_dimension_numbers<[1], [0], [0], [1], [0, 0, 1, 1], [], []>} : vector<64x128xf32>, vector<128x128xf32>, vector<64x128xf32> -> vector<64x128xf32>
      %cst_63 = arith.constant 1.000000e-30 : f32
      %121 = vector.broadcast %cst_63 : f32 to vector<64x128xf32>
      %122 = arith.maximumf %120, %121 : vector<64x128xf32>
      %123 = tpu.reciprocal %122 {approx = true} : vector<64x128xf32> -> vector<64x128xf32>
      %124 = arith.mulf %119, %123 : vector<64x128xf32>
      %125 = arith.truncf %124 : vector<64x128xf32> to vector<64x128xbf16>
      %126 = vector.shape_cast %125 : vector<64x128xbf16> to vector<2x32x128xbf16>
      "tpu.trace_start"() <{level = 10 : i32, message = "bqj,bje->bqe"}> : () -> ()
      %cst_64 = arith.constant dense<0.000000e+00> : vector<2x32x32xf32>
      %127 = tpu.matmul %126, %110, %cst_64 {dimension_numbers = #tpu.dot_dimension_numbers<[2], [1], [1], [2], [0, 0, 0, 1, 1, 2], [0], [0]>} : vector<2x32x128xbf16>, vector<2x128x32xbf16>, vector<2x32x32xf32> -> vector<2x32x32xf32>
      "tpu.trace_stop"() : () -> ()
      %128 = vector.shape_cast %127 : vector<2x32x32xf32> to vector<64x32xf32>
      %129 = arith.truncf %128 : vector<64x32xf32> to vector<64x32xbf16>
      %130 = arith.index_cast %arg28 : i32 to index
      %c0_65 = arith.constant 0 : index
      %c0_66 = arith.constant 0 : index
      %131 = vector.load %arg7[%130, %c0_65, %c0_66] : memref<12x32x32xbf16, #tpu.memory_space<vmem>>, vector<1x32x32xbf16>
      %132 = vector.shape_cast %131 : vector<1x32x32xbf16> to vector<32x32xbf16>
      %cst_67 = arith.constant dense<0.000000e+00> : vector<64x32xf32>
      %133 = tpu.matmul %129, %132, %cst_67 {dimension_numbers = #tpu.dot_dimension_numbers<[1], [0], [0], [1], [0, 0, 1, 1], [], []>} : vector<64x32xbf16>, vector<32x32xbf16>, vector<64x32xf32> -> vector<64x32xf32>
      %134 = arith.addf %arg29, %133 : vector<64x32xf32>
      %135 = arith.index_cast %arg28 : i32 to index
      %c0_68 = arith.constant 0 : index
      %c0_69 = arith.constant 0 : index
      %136 = vector.load %arg8[%135, %c0_68, %c0_69] : memref<12x1x32xf32, #tpu.memory_space<vmem>>, vector<1x1x32xf32>
      %137 = vector.shape_cast %136 : vector<1x1x32xf32> to vector<1x32xf32>
      %138 = vector.broadcast %137 : vector<1x32xf32> to vector<64x32xf32>
      %139 = arith.addf %134, %138 : vector<64x32xf32>
      %140 = arith.index_cast %arg28 : i32 to index
      %c0_70 = arith.constant 0 : index
      %c0_71 = arith.constant 0 : index
      %141 = vector.load %arg9[%140, %c0_70, %c0_71] : memref<12x1x32xf32, #tpu.memory_space<vmem>>, vector<1x1x32xf32>
      %142 = vector.shape_cast %141 : vector<1x1x32xf32> to vector<1x32xf32>
      %143 = arith.index_cast %arg28 : i32 to index
      %c0_72 = arith.constant 0 : index
      %c0_73 = arith.constant 0 : index
      %144 = vector.load %arg10[%143, %c0_72, %c0_73] : memref<12x1x32xf32, #tpu.memory_space<vmem>>, vector<1x1x32xf32>
      %145 = vector.shape_cast %144 : vector<1x1x32xf32> to vector<1x32xf32>
      %cst_74 = arith.constant dense<0.000000e+00> : vector<64xf32>
      %146 = vector.multi_reduction <add>, %139, %cst_74 [1] : vector<64x32xf32> to vector<64xf32>
      %147 = vector.shape_cast %146 : vector<64xf32> to vector<64x1xf32>
      %cst_75 = arith.constant 3.200000e+01 : f32
      %148 = vector.broadcast %cst_75 : f32 to vector<64x1xf32>
      %149 = arith.divf %147, %148 : vector<64x1xf32>
      %150 = vector.broadcast %149 : vector<64x1xf32> to vector<64x32xf32>
      %151 = arith.subf %139, %150 : vector<64x32xf32>
      %152 = arith.mulf %151, %151 : vector<64x32xf32>
      %cst_76 = arith.constant dense<0.000000e+00> : vector<64xf32>
      %153 = vector.multi_reduction <add>, %152, %cst_76 [1] : vector<64x32xf32> to vector<64xf32>
      %154 = vector.shape_cast %153 : vector<64xf32> to vector<64x1xf32>
      %cst_77 = arith.constant 3.200000e+01 : f32
      %155 = vector.broadcast %cst_77 : f32 to vector<64x1xf32>
      %156 = arith.divf %154, %155 : vector<64x1xf32>
      %157 = vector.broadcast %149 : vector<64x1xf32> to vector<64x32xf32>
      %158 = arith.subf %139, %157 : vector<64x32xf32>
      %cst_78 = arith.constant 9.99999997E-7 : f32
      %159 = vector.broadcast %cst_78 : f32 to vector<64x1xf32>
      %160 = arith.addf %156, %159 : vector<64x1xf32>
      %161 = math.rsqrt %160 : vector<64x1xf32>
      %162 = vector.broadcast %161 : vector<64x1xf32> to vector<64x32xf32>
      %163 = arith.mulf %158, %162 : vector<64x32xf32>
      %164 = vector.broadcast %142 : vector<1x32xf32> to vector<64x32xf32>
      %165 = arith.mulf %163, %164 : vector<64x32xf32>
      %166 = vector.broadcast %145 : vector<1x32xf32> to vector<64x32xf32>
      %167 = arith.addf %165, %166 : vector<64x32xf32>
      %168 = arith.truncf %167 : vector<64x32xf32> to vector<64x32xbf16>
      %169 = arith.index_cast %arg28 : i32 to index
      %c0_79 = arith.constant 0 : index
      %c0_80 = arith.constant 0 : index
      %170 = vector.load %arg11[%169, %c0_79, %c0_80] : memref<12x32x128xbf16, #tpu.memory_space<vmem>>, vector<1x32x128xbf16>
      %171 = vector.shape_cast %170 : vector<1x32x128xbf16> to vector<32x128xbf16>
      %cst_81 = arith.constant dense<0.000000e+00> : vector<64x128xf32>
      %172 = tpu.matmul %168, %171, %cst_81 {dimension_numbers = #tpu.dot_dimension_numbers<[1], [0], [0], [1], [0, 0, 1, 1], [], []>} : vector<64x32xbf16>, vector<32x128xbf16>, vector<64x128xf32> -> vector<64x128xf32>
      %173 = arith.index_cast %arg28 : i32 to index
      %c0_82 = arith.constant 0 : index
      %c0_83 = arith.constant 0 : index
      %174 = vector.load %arg12[%173, %c0_82, %c0_83] : memref<12x1x128xf32, #tpu.memory_space<vmem>>, vector<1x1x128xf32>
      %175 = vector.shape_cast %174 : vector<1x1x128xf32> to vector<1x128xf32>
      %176 = vector.broadcast %175 : vector<1x128xf32> to vector<64x128xf32>
      %177 = arith.addf %172, %176 : vector<64x128xf32>
      %cst_84 = arith.constant 5.000000e-01 : f32
      %178 = vector.broadcast %cst_84 : f32 to vector<64x128xf32>
      %179 = arith.mulf %178, %177 : vector<64x128xf32>
      %cst_85 = arith.constant 4.471500e-02 : f32
      %180 = vector.broadcast %cst_85 : f32 to vector<64x128xf32>
      %181 = arith.mulf %180, %177 : vector<64x128xf32>
      %182 = arith.mulf %181, %177 : vector<64x128xf32>
      %183 = arith.mulf %182, %177 : vector<64x128xf32>
      %184 = arith.addf %177, %183 : vector<64x128xf32>
      %cst_86 = arith.constant 0.797884583 : f32
      %185 = vector.broadcast %cst_86 : f32 to vector<64x128xf32>
      %186 = arith.mulf %185, %184 : vector<64x128xf32>
      %187 = math.tanh %186 : vector<64x128xf32>
      %cst_87 = arith.constant 1.000000e+00 : f32
      %188 = vector.broadcast %cst_87 : f32 to vector<64x128xf32>
      %189 = arith.addf %188, %187 : vector<64x128xf32>
      %190 = arith.mulf %179, %189 : vector<64x128xf32>
      %191 = arith.truncf %190 : vector<64x128xf32> to vector<64x128xbf16>
      %192 = arith.index_cast %arg28 : i32 to index
      %c0_88 = arith.constant 0 : index
      %c0_89 = arith.constant 0 : index
      %193 = vector.load %arg13[%192, %c0_88, %c0_89] : memref<12x128x32xbf16, #tpu.memory_space<vmem>>, vector<1x128x32xbf16>
      %194 = vector.shape_cast %193 : vector<1x128x32xbf16> to vector<128x32xbf16>
      %cst_90 = arith.constant dense<0.000000e+00> : vector<64x32xf32>
      %195 = tpu.matmul %191, %194, %cst_90 {dimension_numbers = #tpu.dot_dimension_numbers<[1], [0], [0], [1], [0, 0, 1, 1], [], []>} : vector<64x128xbf16>, vector<128x32xbf16>, vector<64x32xf32> -> vector<64x32xf32>
      %196 = arith.index_cast %arg28 : i32 to index
      %c0_91 = arith.constant 0 : index
      %c0_92 = arith.constant 0 : index
      %197 = vector.load %arg14[%196, %c0_91, %c0_92] : memref<12x1x32xf32, #tpu.memory_space<vmem>>, vector<1x1x32xf32>
      %198 = vector.shape_cast %197 : vector<1x1x32xf32> to vector<1x32xf32>
      %199 = vector.broadcast %198 : vector<1x32xf32> to vector<64x32xf32>
      %200 = arith.addf %195, %199 : vector<64x32xf32>
      %201 = arith.addf %139, %200 : vector<64x32xf32>
      scf.yield %201 : vector<64x32xf32>
    }
    %c12_i32_11 = arith.constant 12 : i32
    %c0_12 = arith.constant 0 : index
    %c0_13 = arith.constant 0 : index
    %12 = vector.load %arg15[%c0_12, %c0_13] : memref<1x32xf32, #tpu.memory_space<vmem>>, vector<1x32xf32>
    %c0_14 = arith.constant 0 : index
    %c0_15 = arith.constant 0 : index
    %13 = vector.load %arg16[%c0_14, %c0_15] : memref<1x32xf32, #tpu.memory_space<vmem>>, vector<1x32xf32>
    %cst_16 = arith.constant dense<0.000000e+00> : vector<64xf32>
    %14 = vector.multi_reduction <add>, %11, %cst_16 [1] : vector<64x32xf32> to vector<64xf32>
    %15 = vector.shape_cast %14 : vector<64xf32> to vector<64x1xf32>
    %cst_17 = arith.constant 3.200000e+01 : f32
    %16 = vector.broadcast %cst_17 : f32 to vector<64x1xf32>
    %17 = arith.divf %15, %16 : vector<64x1xf32>
    %18 = vector.broadcast %17 : vector<64x1xf32> to vector<64x32xf32>
    %19 = arith.subf %11, %18 : vector<64x32xf32>
    %20 = arith.mulf %19, %19 : vector<64x32xf32>
    %cst_18 = arith.constant dense<0.000000e+00> : vector<64xf32>
    %21 = vector.multi_reduction <add>, %20, %cst_18 [1] : vector<64x32xf32> to vector<64xf32>
    %22 = vector.shape_cast %21 : vector<64xf32> to vector<64x1xf32>
    %cst_19 = arith.constant 3.200000e+01 : f32
    %23 = vector.broadcast %cst_19 : f32 to vector<64x1xf32>
    %24 = arith.divf %22, %23 : vector<64x1xf32>
    %25 = vector.broadcast %17 : vector<64x1xf32> to vector<64x32xf32>
    %26 = arith.subf %11, %25 : vector<64x32xf32>
    %cst_20 = arith.constant 9.99999997E-7 : f32
    %27 = vector.broadcast %cst_20 : f32 to vector<64x1xf32>
    %28 = arith.addf %24, %27 : vector<64x1xf32>
    %29 = math.rsqrt %28 : vector<64x1xf32>
    %30 = vector.broadcast %29 : vector<64x1xf32> to vector<64x32xf32>
    %31 = arith.mulf %26, %30 : vector<64x32xf32>
    %32 = vector.broadcast %12 : vector<1x32xf32> to vector<64x32xf32>
    %33 = arith.mulf %31, %32 : vector<64x32xf32>
    %34 = vector.broadcast %13 : vector<1x32xf32> to vector<64x32xf32>
    %35 = arith.addf %33, %34 : vector<64x32xf32>
    %c0_21 = arith.constant 0 : index
    %c0_22 = arith.constant 0 : index
    %36 = vector.load %arg20[%c0_21, %c0_22] : memref<28x64xbf16, #tpu.memory_space<vmem>>, vector<28x64xbf16>
    %37 = arith.truncf %35 : vector<64x32xf32> to vector<64x32xbf16>
    %cst_23 = arith.constant dense<0.000000e+00> : vector<28x32xf32>
    %38 = tpu.matmul %36, %37, %cst_23 {dimension_numbers = #tpu.dot_dimension_numbers<[1], [0], [0], [1], [0, 0, 1, 1], [], []>} : vector<28x64xbf16>, vector<64x32xbf16>, vector<28x32xf32> -> vector<28x32xf32>
    %39 = vector.shape_cast %38 : vector<28x32xf32> to vector<14x2x32xf32>
    %40 = arith.truncf %39 : vector<14x2x32xf32> to vector<14x2x32xbf16>
    %c0_24 = arith.constant 0 : index
    %c0_25 = arith.constant 0 : index
    %c0_26 = arith.constant 0 : index
    %41 = vector.load %arg21[%c0_24, %c0_25, %c0_26] : memref<14x32x32xbf16, #tpu.memory_space<vmem>>, vector<14x32x32xbf16>
    "tpu.trace_start"() <{level = 10 : i32, message = "pbd,pdl->pbl"}> : () -> ()
    %cst_27 = arith.constant dense<0.000000e+00> : vector<14x2x32xf32>
    %42 = tpu.matmul %40, %41, %cst_27 {dimension_numbers = #tpu.dot_dimension_numbers<[2], [1], [1], [2], [0, 0, 0, 1, 1, 2], [0], [0]>} : vector<14x2x32xbf16>, vector<14x32x32xbf16>, vector<14x2x32xf32> -> vector<14x2x32xf32>
    "tpu.trace_stop"() : () -> ()
    %c0_28 = arith.constant 0 : index
    %c0_29 = arith.constant 0 : index
    %c0_30 = arith.constant 0 : index
    %43 = vector.load %arg22[%c0_28, %c0_29, %c0_30] : memref<14x1x32xf32, #tpu.memory_space<vmem>>, vector<14x1x32xf32>
    %44 = vector.broadcast %43 : vector<14x1x32xf32> to vector<14x2x32xf32>
    %45 = arith.addf %42, %44 : vector<14x2x32xf32>
    %c0_31 = arith.constant 0 : index
    %c0_32 = arith.constant 0 : index
    %c0_33 = arith.constant 0 : index
    %46 = vector.load %arg23[%c0_31, %c0_32, %c0_33] : memref<14x1x32xf32, #tpu.memory_space<vmem>>, vector<14x1x32xf32>
    %47 = vector.broadcast %46 : vector<14x1x32xf32> to vector<14x2x32xf32>
    %48 = arith.mulf %45, %47 : vector<14x2x32xf32>
    %c0_34 = arith.constant 0 : index
    %c0_35 = arith.constant 0 : index
    %c0_36 = arith.constant 0 : index
    %49 = vector.load %arg24[%c0_34, %c0_35, %c0_36] : memref<14x1x32xf32, #tpu.memory_space<vmem>>, vector<14x1x32xf32>
    %50 = vector.broadcast %49 : vector<14x1x32xf32> to vector<14x2x32xf32>
    %51 = arith.addf %48, %50 : vector<14x2x32xf32>
    %52 = arith.truncf %51 : vector<14x2x32xf32> to vector<14x2x32xbf16>
    %c0_37 = arith.constant 0 : index
    %c0_38 = arith.constant 0 : index
    %c0_39 = arith.constant 0 : index
    %53 = vector.load %arg25[%c0_37, %c0_38, %c0_39] : memref<14x32x128xbf16, #tpu.memory_space<vmem>>, vector<14x32x128xbf16>
    "tpu.trace_start"() <{level = 10 : i32, message = "pbl,plc->pbc"}> : () -> ()
    %cst_40 = arith.constant dense<0.000000e+00> : vector<14x2x128xf32>
    %54 = tpu.matmul %52, %53, %cst_40 {dimension_numbers = #tpu.dot_dimension_numbers<[2], [1], [1], [2], [0, 0, 0, 1, 1, 2], [0], [0]>} : vector<14x2x32xbf16>, vector<14x32x128xbf16>, vector<14x2x128xf32> -> vector<14x2x128xf32>
    "tpu.trace_stop"() : () -> ()
    %c0_41 = arith.constant 0 : index
    %c0_42 = arith.constant 0 : index
    %c0_43 = arith.constant 0 : index
    %55 = vector.load %arg26[%c0_41, %c0_42, %c0_43] : memref<14x1x128xf32, #tpu.memory_space<vmem>>, vector<14x1x128xf32>
    %56 = vector.broadcast %55 : vector<14x1x128xf32> to vector<14x2x128xf32>
    %57 = arith.addf %54, %56 : vector<14x2x128xf32>
    %58 = vector.shape_cast %57 : vector<14x2x128xf32> to vector<28x128xf32>
    %c0_44 = arith.constant 0 : index
    %c0_45 = arith.constant 0 : index
    %59 = vector.load %arg27[%c0_44, %c0_45] : memref<28x128xf32, #tpu.memory_space<vmem>>, vector<28x128xf32>
    tpu.vector_store %arg27[%c0_44, %c0_45], %58 {strides = array<i32>} : memref<28x128xf32, #tpu.memory_space<vmem>>, vector<28x128xf32>,
    return
  }
}

</mosaic_0001>

<bundles_post_ra>
// kernel: la_transformer_forward.1
= control target key start
LH: loop header
LB: loop body
LE: loop exit
PB: predicated region body
PF: predicated region fallthrough
CT: control target
= control target key end

     0   :  { %v5638_v0 = vmov 0   ;;  %vm235_vm0 = vcmask 523264   ;;  %s7236_s3 = inlined_call_operand.vmem [shape: f32[12,1,32], index: 3, kind: input, shape index: {}]   ;;  %s7237_s4 = inlined_call_operand.vmem [shape: f32[12,1,32], index: 4, kind: input, shape index: {}]   ;;  %s7238_s5 = inlined_call_operand.vmem [shape: bf16[12,32,96], index: 5, kind: input, shape index: {}]   ;;  %s7239_s6 = inlined_call_operand.vmem [shape: f32[12,1,96], index: 6, kind: input, shape index: {}]   ;;  %s7240_s7 = inlined_call_operand.vmem [shape: bf16[12,32,32], index: 7, kind: input, shape index: {}]   ;;  %s7241_s8 = inlined_call_operand.vmem [shape: f32[12,1,32], index: 8, kind: input, shape index: {}]   ;;  %s7242_s9 = inlined_call_operand.vmem [shape: f32[12,1,32], index: 9, kind: input, shape index: {}]   ;;  %s7243_s10 = inlined_call_operand.vmem [shape: f32[12,1,32], index: 10, kind: input, shape index: {}]   ;;  %s7244_s11 = inlined_call_operand.vmem [shape: bf16[12,32,128], index: 11, kind: input, shape index: {}]   ;;  %s7245_s12 = inlined_call_operand.vmem [shape: f32[12,1,128], index: 12, kind: input, shape index: {}]   ;;  %s7246_s13 = inlined_call_operand.vmem [shape: bf16[12,128,32], index: 13, kind: input, shape index: {}]   ;;  %s7247_s14 = inlined_call_operand.vmem [shape: f32[12,1,32], index: 14, kind: input, shape index: {}]   ;;  %s7248_s15 = inlined_call_operand.vmem [shape: f32[1,32], index: 15, kind: input, shape index: {}]   ;;  %s7249_s16 = inlined_call_operand.vmem [shape: f32[1,32], index: 16, kind: input, shape index: {}]   ;;  %s7250_s20 = inlined_call_operand.vmem [shape: bf16[28,64], index: 20, kind: input, shape index: {}]   ;;  %s7251_s21 = inlined_call_operand.vmem [shape: bf16[14,32,32], index: 21, kind: input, shape index: {}]   ;;  %s7252_s22 = inlined_call_operand.vmem [shape: f32[14,1,32], index: 22, kind: input, shape index: {}]   ;;  %s7253_s23 = inlined_call_operand.vmem [shape: f32[14,1,32], index: 23, kind: input, shape index: {}]   ;;  %s7254_s24 = inlined_call_operand.vmem [shape: f32[14,1,32], index: 24, kind: input, shape index: {}]   ;;  %s7255_s25 = inlined_call_operand.vmem [shape: bf16[14,32,128], index: 25, kind: input, shape index: {}]   ;;  %s7256_s26 = inlined_call_operand.vmem [shape: f32[14,1,128], index: 26, kind: input, shape index: {}]   ;;  %s7257_s27 = inlined_call_operand.vmem [shape: f32[28,128], index: 27, kind: output, shape index: {}]   ;;  %s7258_s1 = inlined_call_operand.vmem [shape: bf16[192,32], index: 1, kind: input, shape index: {}]   ;;  %s7259_s0 = inlined_call_operand.vmem [shape: bf16[64,192], index: 0, kind: input, shape index: {}]   ;;  %s7260_s17 = inlined_call_operand.vmem [shape: bf16[128,32], index: 17, kind: input, shape index: {}]   ;;  %s7261_s18 = inlined_call_operand.vmem [shape: f32[1,128], index: 18, kind: input, shape index: {}]   ;;  %s7262_s19 = inlined_call_operand.vmem [shape: f32[128,128], index: 19, kind: input, shape index: {}]   ;;  %s7263_s2 = inlined_call_operand.vmem [shape: f32[64,32], index: 2, kind: input, shape index: {}]  }
   0x1   :  { %7264 = sst [smem:[#allocation14_spill]] %s7236_s3  ;;  %248 = vmatprep.subr.bf16.mxu0 %v5638_v0  ;;  %5255 = vmatprep.subr.bf16.mxu1 %v5638_v0  ;;  %v5374_v1 = vld [vmem:[%s7258_s1] sm:$0xff]   ;;  %v5375_v2 = vld [vmem:[%s7258_s1 + $0x8] sm:$0xff]   ;;  %v5376_v3 = vld [vmem:[%s7258_s1 + $0x10] sm:$0xff]  }
   0x2   :  { %7265 = sst [smem:[#allocation15_spill]] %s7237_s4  ;;  %249 = vmatpush1.bf16.msra.mxu0 %v5374_v1  ;;  %5267 = vmatpush1.bf16.msra.mxu1 %v5374_v1  ;;  %v5377_v4 = vld [vmem:[%s7258_s1 + $0x18] sm:$0xff]   ;;  %v5388_v5 = vld [vmem:[%s7259_s0 + $0x4] ss:$8 sps:$4 sm:$0xff]   ;;  %v5380_v9 = vld [vmem:[%s7258_s1 + $0x30] sm:$0xff]  }
   0x3   :  { %7266 = sst [smem:[#allocation16_spill]] %s7238_s5  ;;  %250 = vmatprep.subr.bf16.mxu0 %v5638_v0  ;;  %5256 = vmatprep.subr.bf16.mxu1 %v5638_v0  ;;  %v5378_v6 = vld [vmem:[%s7258_s1 + $0x20] sm:$0xff]   ;;  %v5379_v8 = vld [vmem:[%s7258_s1 + $0x28] sm:$0xff]   ;;  %v5381_v10 = vld [vmem:[%s7258_s1 + $0x38] sm:$0xff]  }
   0x4   :  { %7267 = sst [smem:[#allocation17_spill]] %s7239_s6  ;;  %v5391_v7 = vld [vmem:[%s7259_s0 + $0x24] ss:$8 sps:$4 sm:$0xff]   ;;  %4411 = vmatprep.mubr.msk.bf16.mxu0 %vm235_vm0, %v5388_v5  ;;  %v5384_v13 = vld [vmem:[%s7258_s1 + $0x50] sm:$0xff]   ;;  %v5385_v14 = vld [vmem:[%s7258_s1 + $0x58] sm:$0xff]  }
   0x5   :  { %7268 = sst [smem:[#allocation18_spill]] %s7240_s7  ;;  %4413 = vmatprep.mubr.msk.bf16.mxu1 %vm235_vm0, %v5391_v7  ;;  %v5382_v11 = vld [vmem:[%s7258_s1 + $0x40] sm:$0xff]   ;;  %v5383_v12 = vld [vmem:[%s7258_s1 + $0x48] sm:$0xff]   ;;  %v5392_v17 = vld [vmem:[%s7259_s0 + $0x14] ss:$8 sps:$4 sm:$0xff]  }
   0x6   :  { %7269 = sst [smem:[#allocation19_spill]] %s7241_s8  ;;  %251 = vmatpush1.bf16.msra.mxu0 %v5375_v2  ;;  %5268 = vmatpush1.bf16.msra.mxu1 %v5375_v2  ;;  %v5386_v15 = vld [vmem:[%s7259_s0] ss:$8 sps:$4 sm:$0xff]   ;;  %v5394_v18 = vld [vmem:[%s7259_s0 + $0x34] ss:$8 sps:$4 sm:$0xff]  }
   0x7   :  { %7270 = sst [smem:[#allocation20_spill]] %s7242_s9  ;;  %252 = vmatprep.subr.bf16.mxu0 %v5638_v0  ;;  %5257 = vmatprep.subr.bf16.mxu1 %v5638_v0  ;;  %v5389_v16 = vld [vmem:[%s7259_s0 + $0x20] ss:$8 sps:$4 sm:$0xff]   ;;  %v5396_v19 = vld [vmem:[%s7259_s0 + $0x10] ss:$8 sps:$4 sm:$0xff]  }
   0x8   :  { %7271 = sst [smem:[#allocation21_spill]] %s7243_s10  ;;  %v5397_v20 = vld [vmem:[%s7259_s0 + $0x30] ss:$8 sps:$4 sm:$0xff]   ;;  %v5876_v21 = vld [vmem:[%s7260_s17] sm:$0xf]  ;;  %v5966_v39 = vld [vmem:[%s7262_s19 + $0x8] sm:$0xff] }
   0x9   :  { %7272 = sst [smem:[#allocation22_spill]] %s7244_s11  ;;  %7276 = vst [vmem:[#allocation2_spill] sm:$0xff] %v5876_v21  ;;  %v5881_v22 = vld [vmem:[%s7260_s17 + $0x4] sm:$0xf]  ;;  %v5886_v23 = vld [vmem:[%s7260_s17 + $0x8] sm:$0xf] }
   0xa   :  { %7273 = sst [smem:[#allocation23_spill]] %s7245_s12  ;;  %253 = vmatpush1.bf16.msra.mxu0 %v5376_v3  ;;  %5269 = vmatpush1.bf16.msra.mxu1 %v5376_v3  ;;  %7277 = vst [vmem:[#allocation3_spill] sm:$0xff] %v5881_v22  ;;  %7278 = vst [vmem:[#allocation4_spill] sm:$0xff] %v5886_v23  ;;  %v5891_v24 = vld [vmem:[%s7260_s17 + $0xc] sm:$0xf]  ;;  %v5961_v38 = vld [vmem:[%s7262_s19] sm:$0xff] }
   0xb   :  { %7274 = sst [smem:[#allocation24_spill]] %s7246_s13  ;;  %254 = vmatprep.subr.bf16.mxu0 %v5638_v0  ;;  %5258 = vmatprep.subr.bf16.mxu1 %v5638_v0  ;;  %7279 = vst [vmem:[#allocation5_spill] sm:$0xff] %v5891_v24  ;;  %v5896_v25 = vld [vmem:[%s7260_s17 + $0x10] sm:$0xf]  ;;  %v5901_v26 = vld [vmem:[%s7260_s17 + $0x14] sm:$0xf] }
   0xc   :  { %7275 = sst [smem:[#allocation25_spill]] %s7247_s14  ;;  %7280 = vst [vmem:[#allocation6_spill] sm:$0xff] %v5896_v25  ;;  %7281 = vst [vmem:[#allocation7_spill] sm:$0xff] %v5901_v26  ;;  %v5906_v27 = vld [vmem:[%s7260_s17 + $0x18] sm:$0xf]  ;;  %v5971_v40 = vld [vmem:[%s7262_s19 + $0x10] sm:$0xff] }
   0xd   :  { %7282 = vst [vmem:[#allocation8_spill] sm:$0xff] %v5906_v27  ;;  %v5911_v28 = vld [vmem:[%s7260_s17 + $0x1c] sm:$0xf]  ;;  %v5916_v29 = vld [vmem:[%s7260_s17 + $0x20] sm:$0xf]  ;;  %v5986_v43 = vld [vmem:[%s7262_s19 + $0x28] sm:$0xff] }
   0xe   :  { %255 = vmatpush1.bf16.msra.mxu0 %v5377_v4  ;;  %5270 = vmatpush1.bf16.msra.mxu1 %v5377_v4  ;;  %7283 = vst [vmem:[#allocation9_spill] sm:$0xff] %v5911_v28  ;;  %7284 = vst [vmem:[#allocation10_spill] sm:$0xff] %v5916_v29  ;;  %v5921_v30 = vld [vmem:[%s7260_s17 + $0x24] sm:$0xf]  ;;  %v5926_v31 = vld [vmem:[%s7260_s17 + $0x28] sm:$0xf] }
   0xf   :  { %256 = vmatprep.subr.bf16.mxu0 %v5638_v0  ;;  %5259 = vmatprep.subr.bf16.mxu1 %v5638_v0  ;;  %7285 = vst [vmem:[#allocation11_spill] sm:$0xff] %v5921_v30  ;;  %7286 = vst [vmem:[#allocation12_spill] sm:$0xff] %v5926_v31  ;;  %v5931_v32 = vld [vmem:[%s7260_s17 + $0x2c] sm:$0xf]  ;;  %v5936_v33 = vld [vmem:[%s7260_s17 + $0x30] sm:$0xf] }
  0x10   :  { %7287 = vst [vmem:[#allocation13_spill] sm:$0xff] %v5931_v32  ;;  %v5941_v34 = vld [vmem:[%s7260_s17 + $0x34] sm:$0xf]  ;;  %v5946_v35 = vld [vmem:[%s7260_s17 + $0x38] sm:$0xf]  ;;  %v5981_v42 = vld [vmem:[%s7262_s19 + $0x20] sm:$0xff] }
  0x11   :  { %v5951_v36 = vld [vmem:[%s7260_s17 + $0x3c] sm:$0xf]  ;;  %v5956_v37 = vld [vmem:[%s7261_s18] ss:$0 sm:$0xff]  ;;  %v5991_v44 = vld [vmem:[%s7262_s19 + $0x30] sm:$0xff] }
  0x12   :  { %257 = vmatpush1.bf16.msra.mxu0 %v5378_v6  ;;  %5271 = vmatpush1.bf16.msra.mxu1 %v5378_v6  ;;  %v5976_v41 = vld [vmem:[%s7262_s19 + $0x18] sm:$0xff]  ;;  %v6001_v46 = vld [vmem:[%s7262_s19 + $0x40] sm:$0xff]  ;;  %v6006_v47 = vld [vmem:[%s7262_s19 + $0x48] sm:$0xff] }
  0x13   :  { %258 = vmatprep.subr.bf16.mxu0 %v5638_v0  ;;  %5260 = vmatprep.subr.bf16.mxu1 %v5638_v0  ;;  %v5996_v45 = vld [vmem:[%s7262_s19 + $0x38] sm:$0xff]  ;;  %v6011_v48 = vld [vmem:[%s7262_s19 + $0x50] sm:$0xff]  ;;  %v6021_v50 = vld [vmem:[%s7262_s19 + $0x60] sm:$0xff] }
  0x14   :  { %v6016_v49 = vld [vmem:[%s7262_s19 + $0x58] sm:$0xff]  ;;  %v6026_v51 = vld [vmem:[%s7262_s19 + $0x68] sm:$0xff]  ;;  %v6031_v52 = vld [vmem:[%s7262_s19 + $0x70] sm:$0xff] }
  0x15   :  { %v6036_v53 = vld [vmem:[%s7262_s19 + $0x78] sm:$0xff]  ;;  %v119_v54 = vld [vmem:[%s7263_s2] sm:$0xff]  ;;  %v120_v58 = vld [vmem:[%s7263_s2 + $0x8] sm:$0xff] }
  0x16   :  { %259 = vmatpush1.bf16.msra.mxu0 %v5379_v8  ;;  %5272 = vmatpush1.bf16.msra.mxu1 %v5379_v8  ;;  %v123_v55 = vld [vmem:[%s7263_s2 + $0x20] sm:$0xff]  ;;  %v124_v59 = vld [vmem:[%s7263_s2 + $0x28] sm:$0xff]  ;;  %v121_v6 = vld [vmem:[%s7263_s2 + $0x10] sm:$0xff] }
  0x17   :  { %260 = vmatprep.subr.bf16.mxu0 %v5638_v0  ;;  %5261 = vmatprep.subr.bf16.mxu1 %v5638_v0  ;;  %v125_v7 = vld [vmem:[%s7263_s2 + $0x30] sm:$0xff] }
  0x1a   :  { %261 = vmatpush1.bf16.msra.mxu0 %v5380_v9  ;;  %5273 = vmatpush1.bf16.msra.mxu1 %v5380_v9 }
  0x1b   :  { %262 = vmatprep.subr.bf16.mxu0 %v5638_v0  ;;  %5262 = vmatprep.subr.bf16.mxu1 %v5638_v0 }
  0x1e   :  { %263 = vmatpush1.bf16.msra.mxu0 %v5381_v10  ;;  %5274 = vmatpush1.bf16.msra.mxu1 %v5381_v10  ;;  %v122_v10 = vld [vmem:[%s7263_s2 + $0x18] sm:$0xff] }
  0x1f   :  { %264 = vmatprep.subr.bf16.mxu0 %v5638_v0  ;;  %5263 = vmatprep.subr.bf16.mxu1 %v5638_v0 }
  0x22   :  { %265 = vmatpush1.bf16.msra.mxu0 %v5382_v11  ;;  %5275 = vmatpush1.bf16.msra.mxu1 %v5382_v11  ;;  %v126_v11 = vld [vmem:[%s7263_s2 + $0x38] sm:$0xff]  ;;  %s6078_s2 = smov 0  }
  0x23   :  { %266 = vmatprep.subr.bf16.mxu0 %v5638_v0  ;;  %5264 = vmatprep.subr.bf16.mxu1 %v5638_v0 }
  0x26   :  { %267 = vmatpush1.bf16.msra.mxu0 %v5383_v12  ;;  %5276 = vmatpush1.bf16.msra.mxu1 %v5383_v12 }
  0x27   :  { %268 = vmatprep.subr.bf16.mxu0 %v5638_v0  ;;  %5265 = vmatprep.subr.bf16.mxu1 %v5638_v0 }
  0x2a   :  { %269 = vmatpush1.bf16.msra.mxu0 %v5384_v13  ;;  %5277 = vmatpush1.bf16.msra.mxu1 %v5384_v13 }
  0x2b   :  { %270 = vmatprep.subr.bf16.mxu0 %v5638_v0  ;;  %5266 = vmatprep.subr.bf16.mxu1 %v5638_v0 }
  0x2e   :  { %271 = vmatpush1.bf16.msra.mxu0 %v5385_v14  ;;  %5278 = vmatpush1.bf16.msra.mxu1 %v5385_v14 }
  0x31   :  { %281 = vmatmul.mubr.bf16.vlgmr.msra.gmra.mrb[0].mxu0 %v5386_v15  ;;  %297 = vmatmul.mubr.bf16.vlgmr.msra.gmra.mrb[0].mxu1 %v5389_v16 }
  0x32   :  { %4412 = vmatprep.mubr.msk.bf16.mxu0 %vm235_vm0, %v5392_v17  ;;  %4414 = vmatprep.mubr.msk.bf16.mxu1 %vm235_vm0, %v5394_v18 }
  0x39   :  { %289 = vmatmul.mubr.bf16.gmra.mrb[4].mxu0 %v5396_v19  ;;  %305 = vmatmul.mubr.bf16.gmra.mrb[4].mxu1 %v5397_v20 }
 0x104   :  { %v282_v56 = vpop.f32.mrb[0].mxu0  ;;  %v298_v57 = vpop.f32.mrb[0].mxu1 }
 0x105   :  { %v283_v60 = vadd.f32 %v282_v56, %v119_v54   ;;  %v299_v61 = vadd.f32 %v298_v57, %v123_v55   ;;  %v284_v62 = vpop.f32.mrb[1].mxu0  ;;  %v300_v63 = vpop.f32.mrb[1].mxu1 }
 0x106   :  { %v285_v0 = vpop.f32.mrb[2].mxu0  ;;  %v301_v1 = vpop.f32.mrb[2].mxu1 }
 0x107   :  { %v286_v2 = vadd.f32 %v285_v0, %v120_v58   ;;  %v302_v3 = vadd.f32 %v301_v1, %v124_v59   ;;  %v287_v4 = vpop.f32.mrb[3].mxu0  ;;  %v303_v5 = vpop.f32.mrb[3].mxu1 }
 0x10c   :  { %v290_v8 = vpop.f32.mrb[4].mxu0  ;;  %v306_v9 = vpop.f32.mrb[4].mxu1 }
 0x10d   :  { %v291_v12 = vadd.f32 %v290_v8, %v121_v6   ;;  %v307_v13 = vadd.f32 %v306_v9, %v125_v7   ;;  %v292_v14 = vpop.f32.mrb[5].mxu0  ;;  %v308_v15 = vpop.f32.mrb[5].mxu1 }
 0x10e   :  { %v293_v16 = vpop.f32.mrb[6].mxu0  ;;  %v309_v17 = vpop.f32.mrb[6].mxu1 }
 0x10f   :  { %v294_v18 = vadd.f32 %v293_v16, %v122_v10   ;;  %v310_v19 = vadd.f32 %v309_v17, %v126_v11   ;;  %v295_v20 = vpop.f32.mrb[7].mxu0  ;;  %v311_v54 = vpop.f32.mrb[7].mxu1 }
 0x110 LB: > { %vm364_vm1 = vcmask 261120   ;;  %s6172_s7 = sshll.u32 %s5636_s2, 4  ;;  %s7288_s30 = sld [smem:[#allocation16_spill]]  ;;  %v7290_v24 = vld [vmem:[#allocation5_spill] sm:$0xff]  ;;  %v7291_v23 = vld [vmem:[#allocation4_spill] sm:$0xff]  ;;  %v7292_v22 = vld [vmem:[#allocation3_spill] sm:$0xff]  ;;  %s5636_s2 = sphi %s6078_s2, %s351_s2   ;;  %v5632_v60 = vphi %v283_v60, %v7321_v60   ;;  %v5628_v2 = vphi %v286_v2, %v7320_v2   ;;  %v5624_v12 = vphi %v291_v12, %v7319_v12   ;;  %v5620_v18 = vphi %v294_v18, %v7318_v18   ;;  %v5616_v61 = vphi %v299_v61, %v7317_v61   ;;  %v5612_v3 = vphi %v302_v3, %v7316_v3   ;;  %v5608_v13 = vphi %v307_v13, %v7315_v13   ;;  %v5604_v19 = vphi %v310_v19, %v7314_v19  }
 0x111   : > { %v365_v55 = vsel %vm364_vm1, %v5632_v60, 0.0  ;;  %v371_v56 = vsel %vm364_vm1, %v5624_v12, 0.0  ;;  %v368_v57 = vsel %vm364_vm1, %v5628_v2, 0.0  ;;  %v374_v58 = vsel %vm364_vm1, %v5620_v18, 0.0  ;;  %s4618_s1 = sshll.u32 %s5636_s2, 6  ;;  %s7289_s3 = sld [smem:[#allocation24_spill]] }
 0x112   : > { %366 = vadd.xlane.f32.xlu0 %v365_v55  ;;  %372 = vadd.xlane.f32.xlu1 %v371_v56  ;;  %v377_v59 = vsel %vm364_vm1, %v5616_v61, 0.0  ;;  %v380_v62 = vsel %vm364_vm1, %v5612_v3, 0.0  ;;  %v383_v63 = vsel %vm364_vm1, %v5608_v13, 0.0  ;;  %v386_v0 = vsel %vm364_vm1, %v5604_v19, 0.0  ;;  %v7293_v21 = vld [vmem:[#allocation2_spill] sm:$0xff]  ;;  %s5639_s29 = smov 32  }
 0x113   : > { %v7294_v26 = vld [vmem:[#allocation7_spill] sm:$0xff]  ;;  %v7295_v25 = vld [vmem:[#allocation6_spill] sm:$0xff]  ;;  %v7298_v28 = vld [vmem:[#allocation9_spill] sm:$0xff]  ;;  %s7302_s9 = sld [smem:[#allocation14_spill]]  ;;  %s7303_s17 = sld [smem:[#allocation15_spill]] }
 0x114   : > { %v7296_v30 = vld [vmem:[#allocation11_spill] sm:$0xff]  ;;  %v7297_v29 = vld [vmem:[#allocation10_spill] sm:$0xff]  ;;  %v7299_v27 = vld [vmem:[#allocation8_spill] sm:$0xff]  ;;  %s7304_s11 = sld [smem:[#allocation17_spill]]  ;;  %s7308_s0 = sld [smem:[#allocation20_spill]] }
 0x115   : > { %v7300_v32 = vld [vmem:[#allocation13_spill] sm:$0xff]  ;;  %v7301_v31 = vld [vmem:[#allocation12_spill] sm:$0xff] }
 0x116   : > { %369 = vadd.xlane.f32.xlu0 %v368_v57  ;;  %375 = vadd.xlane.f32.xlu1 %v374_v58  ;;  %s504_s12 = scalar_lea.vmem %s7288_s30, %s6172_s7 }
 0x117   : > { %s6182_s13 = scalar_lea.vmem %s7289_s3, %s4618_s1  ;;  %s5641_s1 = smov 64  }
 0x118   : > { %s7305_s3 = sld [smem:[#allocation18_spill]] }
 0x119   : > { %s360_s14 = scalar_lea.vmem %s7302_s9, %s5636_s2  ;;  %s362_s10 = scalar_lea.vmem %s7303_s17, %s5636_s2 }
 0x11a   : > { %378 = vadd.xlane.f32.xlu0 %v377_v59  ;;  %381 = vadd.xlane.f32.xlu1 %v380_v62  ;;  %s509_s30 = scalar_lea.vmem %s7304_s11, %s5636_s2  ;;  %s7306_s9 = sld [smem:[#allocation19_spill]] }
 0x11b   : > { %s7307_s17 = sld [smem:[#allocation22_spill]]  ;;  %s1408_s11 = scalar_lea.vmem %s7308_s0, %s5636_s2 }
 0x11e   : > { %384 = vadd.xlane.f32.xlu0 %v383_v63  ;;  %387 = vadd.xlane.f32.xlu1 %v386_v0 }
 0x19f   : > { %v367_v1 = vpop.xlane.xlu0 %366  ;;  %v373_v4 = vpop.xlane.xlu1 %372 }
 0x1a0   : > { %v390_v5 = vmul.f32 0.03125, %v367_v1  ;;  %v392_v6 = vmul.f32 0.03125, %v373_v4 }
 0x1a2   : > { %v6124_v7 = vsub.f32 %v5632_v60, %v390_v5  ;;  %v6127_v8 = vsub.f32 %v5624_v12, %v392_v6 }
 0x1a3   : > { %v370_v9 = vpop.xlane.xlu0 %369  ;;  %v376_v10 = vpop.xlane.xlu1 %375 }
 0x1a4   : > { %v391_v11 = vmul.f32 0.03125, %v370_v9  ;;  %v393_v14 = vmul.f32 0.03125, %v376_v10  ;;  %v406_v15 = vmul.f32 %v6124_v7, %v6124_v7  ;;  %v408_v16 = vmul.f32 %v6127_v8, %v6127_v8 }
 0x1a6   : > { %v6134_v17 = vsub.f32 %v5628_v2, %v391_v11  ;;  %v6137_v20 = vsub.f32 %v5620_v18, %v393_v14  ;;  %v414_v54 = vsel %vm364_vm1, %v406_v15, 0.0  ;;  %v420_v57 = vsel %vm364_vm1, %v408_v16, 0.0 }
 0x1a7   : > { %v379_v55 = vpop.xlane.xlu0 %378  ;;  %415 = vadd.xlane.f32.xlu0 %v414_v54  ;;  %v382_v56 = vpop.xlane.xlu1 %381 }
 0x1a8   : > { %v394_v58 = vmul.f32 0.03125, %v379_v55  ;;  %v395_v59 = vmul.f32 0.03125, %v382_v56  ;;  %v407_v62 = vmul.f32 %v6134_v17, %v6134_v17  ;;  %v409_v63 = vmul.f32 %v6137_v20, %v6137_v20 }
 0x1aa   : > { %v6146_v0 = vsub.f32 %v5616_v61, %v394_v58  ;;  %v6149_v1 = vsub.f32 %v5612_v3, %v395_v59  ;;  %v417_v4 = vsel %vm364_vm1, %v407_v62, 0.0  ;;  %v423_v6 = vsel %vm364_vm1, %v409_v63, 0.0  ;;  %v5398_v63 = vld [vmem:[%s504_s12] sm:$0xff]  }
 0x1ab   : > { %421 = vadd.xlane.f32.xlu0 %v420_v57  ;;  %v385_v5 = vpop.xlane.xlu0 %384  ;;  %418 = vadd.xlane.f32.xlu1 %v417_v4  ;;  %v388_v9 = vpop.xlane.xlu1 %387  ;;  %v5399_v4 = vld [vmem:[%s504_s12 + $0x8] sm:$0xff]   ;;  %s5640_s12 = smov 96  }
 0x1ac   : > { %v396_v10 = vmul.f32 0.03125, %v385_v5  ;;  %v410_v11 = vmul.f32 %v6146_v0, %v6146_v0  ;;  %v397_v14 = vmul.f32 0.03125, %v388_v9  ;;  %v411_v15 = vmul.f32 %v6149_v1, %v6149_v1  ;;  %4803 = vmatprep.subr.bf16.mxu0 %v5398_v63 }
 0x1ad   : > { %4804 = vmatpush3.bf16.msra.mxu0 %v5398_v63  ;;  %v6186_v5 = vcombine.low %v7291_v23, %v7290_v24  ;;  %v6195_v9 = vcombine.low %v7295_v25, %v7294_v26 }
 0x1ae   : > { %v6158_v16 = vsub.f32 %v5608_v13, %v396_v10  ;;  %v426_v54 = vsel %vm364_vm1, %v410_v11, 0.0  ;;  %v6162_v55 = vsub.f32 %v5604_v19, %v397_v14  ;;  %v429_v57 = vsel %vm364_vm1, %v411_v15, 0.0  ;;  %4805 = vmatprep.subr.bf16.mxu0 %v5399_v4 }
 0x1af   : > { %427 = vadd.xlane.f32.xlu0 %v426_v54  ;;  %424 = vadd.xlane.f32.xlu1 %v423_v6  ;;  %v6190_v6 = vcombine.low %v7293_v21, %v7292_v22  ;;  %v6200_v10 = vcombine.low %v7297_v29, %v7296_v30  ;;  %v6205_v11 = vcombine.low %v7299_v27, %v7298_v28 }
 0x1b0   : > { %v412_v56 = vmul.f32 %v6158_v16, %v6158_v16  ;;  %v413_v58 = vmul.f32 %v6162_v55, %v6162_v55  ;;  %v6210_v14 = vcombine.low %v5936_v33, %v5941_v34  ;;  %v6215_v15 = vcombine.low %v7301_v31, %v7300_v32 }
 0x1b1   : > { %4806 = vmatpush3.bf16.msra.mxu0 %v5399_v4  ;;  %v6221_v54 = vcombine.low %v5946_v35, %v5951_v36 }
 0x1b2   : > { %v432_v59 = vsel %vm364_vm1, %v412_v56, 0.0  ;;  %v435_v62 = vsel %vm364_vm1, %v413_v58, 0.0 }
 0x1b3   : > { %433 = vadd.xlane.f32.xlu0 %v432_v59  ;;  %430 = vadd.xlane.f32.xlu1 %v429_v57 }
 0x1b7   : > { %436 = vadd.xlane.f32.xlu1 %v435_v62 }
 0x1c8   : > { %652 = vrot.lane.b32.xlu1 %v6186_v5, %s5639_s29 }
 0x1c9   : > { %650 = vrot.lane.b32.xlu0 %v6190_v6, %s5639_s29 }
 0x1cc   : > { %654 = vrot.lane.b32.xlu1 %v6195_v9, %s5639_s29 }
 0x1cd   : > { %658 = vrot.lane.b32.xlu0 %v6200_v10, %s5639_s29 }
 0x1d0   : > { %656 = vrot.lane.b32.xlu1 %v6205_v11, %s5639_s29 }
 0x1d1   : > { %662 = vrot.lane.b32.xlu0 %v6210_v14, %s5639_s29 }
 0x1d4   : > { %660 = vrot.lane.b32.xlu1 %v6215_v15, %s5639_s29 }
 0x1d8   : > { %664 = vrot.lane.b32.xlu1 %v6221_v54, %s5639_s29  ;;  %s6428_s29 = scalar_lea.vmem %s7305_s3, %s6172_s7 }
 0x234   : > { %v416_v56 = vpop.xlane.xlu0 %415 }
 0x235   : > { %v438_v57 = vmul.f32 0.03125, %v416_v56 }
 0x237   : > { %v446_v58 = vadd.f32 1e-06, %v438_v57 }
 0x238   : > { %v422_v59 = vpop.xlane.xlu0 %421  ;;  %v419_v62 = vpop.xlane.xlu1 %418 }
 0x239   : > { %5412 = vrsqrt.f32 %v446_v58  ;;  %v440_v63 = vmul.f32 0.03125, %v422_v59  ;;  %v439_v4 = vmul.f32 0.03125, %v419_v62 }
 0x23b   : > { %v448_v21 = vadd.f32 1e-06, %v440_v63  ;;  %v447_v22 = vadd.f32 1e-06, %v439_v4  ;;  %v4416_v63 = vld [vmem:[%s362_s10] ss:$0 sm:$0xff]  ;;  %s1549_s10 = scalar_lea.vmem %s7307_s17, %s6172_s7 }
 0x23c   : > { %v428_v23 = vpop.xlane.xlu0 %427  ;;  %v425_v24 = vpop.xlane.xlu1 %424 }
 0x23d   : > { %5414 = vrsqrt.f32 %v448_v21  ;;  %v442_v25 = vmul.f32 0.03125, %v428_v23  ;;  %v441_v26 = vmul.f32 0.03125, %v425_v24  ;;  %v4415_v24 = vld [vmem:[%s360_s14] ss:$0 sm:$0xff]  ;;  %s1392_s14 = scalar_lea.vmem %s7306_s9, %s5636_s2  ;;  %s7311_s9 = sld [smem:[#allocation25_spill]] }
 0x23e   : > { %5416 = vrsqrt.f32 %v447_v22 }
 0x23f   : > { %v450_v27 = vadd.f32 1e-06, %v442_v25  ;;  %v449_v28 = vadd.f32 1e-06, %v441_v26 }
 0x240   : > { %v434_v29 = vpop.xlane.xlu0 %433  ;;  %v431_v56 = vpop.xlane.xlu1 %430 }
 0x241   : > { %5418 = vrsqrt.f32 %v450_v27  ;;  %v444_v57 = vmul.f32 0.03125, %v434_v29  ;;  %v443_v30 = vmul.f32 0.03125, %v431_v56 }
 0x242   : > { %5420 = vrsqrt.f32 %v449_v28 }
 0x243   : > { %v5413_v58 = vpop.eup %5412  ;;  %v452_v59 = vadd.f32 1e-06, %v444_v57  ;;  %v451_v62 = vadd.f32 1e-06, %v443_v30 }
 0x244   : > { %v437_v21 = vpop.xlane.xlu1 %436  ;;  %v462_v23 = vmul.f32 %v5413_v58, %v6124_v7 }
 0x245   : > { %5422 = vrsqrt.f32 %v452_v59  ;;  %v445_v22 = vmul.f32 0.03125, %v437_v21 }
 0x246   : > { %5424 = vrsqrt.f32 %v451_v62  ;;  %v476_v28 = vmul.f32 %v4415_v24, %v462_v23 }
 0x247   : > { %v5415_v25 = vpop.eup %5414  ;;  %v453_v26 = vadd.f32 1e-06, %v445_v22 }
 0x248   : > { %v5417_v27 = vpop.eup %5416  ;;  %v464_v29 = vmul.f32 %v5415_v25, %v6127_v8  ;;  %v490_v57 = vadd.f32 %v4416_v63, %v476_v28 }
 0x249   : > { %5426 = vrsqrt.f32 %v453_v26  ;;  %v463_v30 = vmul.f32 %v5417_v27, %v6134_v17 }
 0x24a   : > { %v478_v21 = vmul.f32 %v4415_v24, %v464_v29 }
 0x24b   : > { %v5419_v4 = vpop.eup %5418  ;;  %v477_v7 = vmul.f32 %v4415_v24, %v463_v30 }
 0x24c   : > { %v5421_v56 = vpop.eup %5420  ;;  %v466_v58 = vmul.f32 %v5419_v4, %v6146_v0  ;;  %v492_v17 = vadd.f32 %v4416_v63, %v478_v21 }
 0x24d   : > { %v465_v59 = vmul.f32 %v5421_v56, %v6137_v20  ;;  %v491_v62 = vadd.f32 %v4416_v63, %v477_v7 }
 0x24e   : > { %v480_v27 = vmul.f32 %v4415_v24, %v466_v58 }
 0x24f   : > { %v5423_v31 = vpop.eup %5422  ;;  %v498_v22 = vpack.c.bf16 %v491_v62, %v490_v57  ;;  %v479_v32 = vmul.f32 %v4415_v24, %v465_v59  ;;  %v653_v59 = vpop.permute.xlu1 %652 }
 0x250   : > { %v5425_v23 = vpop.eup %5424  ;;  %v468_v8 = vmul.f32 %v5423_v31, %v6158_v16  ;;  %v494_v4 = vadd.f32 %v4416_v63, %v480_v27 }
 0x251   : > { %v467_v25 = vmul.f32 %v5425_v23, %v6149_v1  ;;  %4807 = vmatprep.mubr.msk.bf16.mxu0 %vm364_vm1, %v498_v22  ;;  %v493_v26 = vadd.f32 %v4416_v63, %v479_v32 }
 0x252   : > { %v482_v29 = vmul.f32 %v4415_v24, %v468_v8 }
 0x253   : > { %v5427_v28 = vpop.eup %5426  ;;  %v499_v0 = vpack.c.bf16 %v493_v26, %v492_v17  ;;  %v481_v30 = vmul.f32 %v4415_v24, %v467_v25  ;;  %v651_v17 = vpop.permute.xlu0 %650 }
 0x254   : > { %v469_v20 = vmul.f32 %v5427_v28, %v6162_v55  ;;  %v496_v16 = vadd.f32 %v4416_v63, %v482_v29  ;;  %v4419_v55 = vld [vmem:[%s509_s30] ss:$0 sm:$0xff]  ;;  %v655_v27 = vpop.permute.xlu1 %654 }
 0x255   : > { %4808 = vmatmul.mubr.msk.bf16.vlgmr.msra.gmra.mrb[0].mxu0 %vm364_vm1, %v499_v0  ;;  %v495_v7 = vadd.f32 %v4416_v63, %v481_v30 }
 0x256   : > { %v483_v56 = vmul.f32 %v4415_v24, %v469_v20 }
 0x257   : > { %v500_v31 = vpack.c.bf16 %v495_v7, %v494_v4 }
 0x258   : > { %v497_v1 = vadd.f32 %v4416_v63, %v483_v56 }
 0x259   : > { %4811 = vmatprep.mubr.msk.bf16.mxu0 %vm364_vm1, %v500_v31 }
 0x25a   : > { %v501_v57 = vpack.c.bf16 %v497_v1, %v496_v16 }
 0x25d   : > { %4812 = vmatmul.mubr.msk.bf16.gmra.mrb[4].mxu0 %vm364_vm1, %v501_v57  ;;  %v657_v57 = vpop.permute.xlu1 %656 }
 0x328   : > { %v4809_v32 = vpop.f32.mrb[0].mxu0 }
 0x329   : > { %v575_v58 = vpop.f32.mrb[1].mxu0  ;;  %v584_v21 = vadd.f32 %v4809_v32, %v4419_v55 }
 0x32a   : > { %v4810_v62 = vpop.f32.mrb[2].mxu0  ;;  %v576_v23 = vadd.f32 %v4419_v55, %v575_v58 }
 0x32b   : > { %v587_v22 = vadd.f32 %v4810_v62, %v4419_v55  ;;  %v578_v24 = vpop.f32.mrb[3].mxu0 }
 0x32c   : > { %v579_v8 = vadd.f32 %v4419_v55, %v578_v24  ;;  %v661_v24 = vpop.permute.xlu1 %660 }
 0x32d   : > { %v6248_v63 = vpack.c.bf16 %v587_v22, %v584_v21  ;;  %v659_v21 = vpop.permute.xlu0 %658 }
 0x32e   : > { %v6250_v25 = vpack.c.bf16 %v579_v8, %v576_v23 }
 0x32f   : > { %v675_v26 = vmul.bf16 %v653_v59, %v6248_v63  ;;  %v677_v58 = vmul.bf16 %v657_v57, %v6248_v63  ;;  %v679_v23 = vmul.bf16 %v661_v24, %v6248_v63 }
 0x330   : > { %v4813_v28 = vpop.f32.mrb[4].mxu0  ;;  %4831 = vmatprep.mubr.msk.bf16.mxu1 %vm364_vm1, %v6250_v25  ;;  %v674_v0 = vmul.bf16 %v651_v17, %v6250_v25  ;;  %v676_v56 = vmul.bf16 %v655_v27, %v6250_v25 }
 0x331   : > { %v591_v30 = vpop.f32.mrb[5].mxu0  ;;  %740 = vrot.lane.b32.xlu1 %v675_v26, %s5640_s12  ;;  %v600_v29 = vadd.f32 %v4813_v28, %v4419_v55  ;;  %v663_v8 = vpop.permute.xlu0 %662 }
 0x332   : > { %738 = vrot.lane.b32.xlu0 %v674_v0, %s5640_s12  ;;  %v4814_v20 = vpop.f32.mrb[6].mxu0  ;;  %v592_v31 = vadd.f32 %v4419_v55, %v591_v30  ;;  %v665_v28 = vpop.permute.xlu1 %664 }
 0x333   : > { %v603_v4 = vadd.f32 %v4814_v20, %v4419_v55  ;;  %v594_v7 = vpop.f32.mrb[7].mxu0 }
 0x334   : > { %v595_v16 = vadd.f32 %v4419_v55, %v594_v7  ;;  %v678_v55 = vmul.bf16 %v659_v21, %v6250_v25 }
 0x335   : > { %v6259_v1 = vpack.c.bf16 %v603_v4, %v600_v29  ;;  %742 = vrot.lane.b32.xlu1 %v676_v56, %s5640_s12 }
 0x336   : > { %v6262_v32 = vpack.c.bf16 %v595_v16, %v592_v31 }
 0x337   : > { %v683_v22 = vmul.bf16 %v653_v59, %v6259_v1  ;;  %v685_v0 = vmul.bf16 %v657_v57, %v6259_v1  ;;  %v681_v59 = vmul.bf16 %v665_v28, %v6248_v63  ;;  %v687_v20 = vmul.bf16 %v661_v24, %v6259_v1 }
 0x338   : > { %4851 = vmatprep.mubr.msk.bf16.mxu0 %vm364_vm1, %v6262_v32  ;;  %v682_v62 = vmul.bf16 %v651_v17, %v6262_v32  ;;  %v684_v26 = vmul.bf16 %v655_v27, %v6262_v32  ;;  %v680_v17 = vmul.bf16 %v663_v8, %v6250_v25  ;;  %v686_v30 = vmul.bf16 %v659_v21, %v6262_v32 }
 0x339   : > { %744 = vrot.lane.b32.xlu1 %v677_v58, %s5640_s12  ;;  %v689_v27 = vmul.bf16 %v665_v28, %v6259_v1  ;;  %v688_v29 = vmul.bf16 %v663_v8, %v6262_v32 }
 0x33a   : > { %841 = vrot.lane.b32.xlu0 %v682_v62, %s5640_s12 }
 0x33d   : > { %746 = vrot.lane.b32.xlu1 %v678_v55, %s5640_s12 }
 0x33e   : > { %843 = vrot.lane.b32.xlu0 %v683_v22, %s5640_s12 }
 0x341   : > { %748 = vrot.lane.b32.xlu1 %v679_v23, %s5640_s12 }
 0x342   : > { %845 = vrot.lane.b32.xlu0 %v684_v26, %s5640_s12 }
 0x345   : > { %750 = vrot.lane.b32.xlu1 %v680_v17, %s5640_s12 }
 0x346   : > { %847 = vrot.lane.b32.xlu0 %v685_v0, %s5640_s12 }
 0x349   : > { %752 = vrot.lane.b32.xlu1 %v681_v59, %s5640_s12 }
 0x34a   : > { %849 = vrot.lane.b32.xlu0 %v686_v30, %s5640_s12 }
 0x34d   : > { %855 = vrot.lane.b32.xlu1 %v689_v27, %s5640_s12 }
 0x34e   : > { %851 = vrot.lane.b32.xlu0 %v687_v20, %s5640_s12 }
 0x352   : > { %853 = vrot.lane.b32.xlu0 %v688_v29, %s5640_s12 }
 0x3a3   : > { %v741_v56 = vpop.permute.xlu1 %740 }
 0x3a4   : > { %v739_v4 = vpop.permute.xlu0 %738  ;;  %v764_v57 = vsel %vm364_vm1, %v741_v56, 0 }
 0x3a5   : > { %5279 = vmatprep.subr.msk.bf16.mxu1 %vm364_vm1, %v739_v4  ;;  %v761_v7 = vsel %vm364_vm1, %v739_v4, 0 }
 0x3a6   : > { %4816 = vmatpush3.bf16.xpose.msra.mxu1 %v761_v7 }
 0x3a7   : > { %5280 = vmatprep.subr.msk.bf16.mxu1 %vm364_vm1, %v741_v56  ;;  %v743_v58 = vpop.permute.xlu1 %742 }
 0x3a8   : > { %v767_v55 = vsel %vm364_vm1, %v743_v58, 0 }
 0x3ab   : > { %v745_v22 = vpop.permute.xlu1 %744 }
 0x3ac   : > { %v842_v31 = vpop.permute.xlu0 %841  ;;  %v770_v8 = vsel %vm364_vm1, %v745_v22, 0 }
 0x3ad   : > { %v864_v16 = vsel %vm364_vm1, %v842_v31, 0  ;;  %5287 = vmatprep.subr.msk.bf16.mxu0 %vm364_vm1, %v842_v31 }
 0x3ae   : > { %4818 = vmatpush3.bf16.xpose.msra.mxu1 %v764_v57  ;;  %4836 = vmatpush3.bf16.xpose.msra.mxu0 %v864_v16 }
 0x3af   : > { %5281 = vmatprep.subr.msk.bf16.mxu1 %vm364_vm1, %v743_v58  ;;  %v747_v26 = vpop.permute.xlu1 %746 }
 0x3b0   : > { %v844_v62 = vpop.permute.xlu0 %843  ;;  %v773_v0 = vsel %vm364_vm1, %v747_v26, 0 }
 0x3b1   : > { %5288 = vmatprep.subr.msk.bf16.mxu0 %vm364_vm1, %v844_v62  ;;  %v867_v21 = vsel %vm364_vm1, %v844_v62, 0 }
 0x3b3   : > { %v749_v59 = vpop.permute.xlu1 %748 }
 0x3b4   : > { %v846_v24 = vpop.permute.xlu0 %845  ;;  %v776_v20 = vsel %vm364_vm1, %v749_v59, 0 }
 0x3b5   : > { %v870_v23 = vsel %vm364_vm1, %v846_v24, 0 }
 0x3b6   : > { %4820 = vmatpush3.bf16.xpose.msra.mxu1 %v767_v55  ;;  %4838 = vmatpush3.bf16.xpose.msra.mxu0 %v867_v21  ;;  %v5223_v55 = vpack.c.bf16 %v5966_v39, %v5961_v38 }
 0x3b7   : > { %5282 = vmatprep.subr.msk.bf16.mxu1 %vm364_vm1, %v745_v22  ;;  %5289 = vmatprep.subr.msk.bf16.mxu0 %vm364_vm1, %v846_v24  ;;  %v751_v29 = vpop.permute.xlu1 %750  ;;  %v5227_v22 = vpack.c.bf16 %v5976_v41, %v5971_v40  ;;  %v5231_v24 = vpack.c.bf16 %v5986_v43, %v5981_v42 }
 0x3b8   : > { %v848_v17 = vpop.permute.xlu0 %847  ;;  %v779_v56 = vsel %vm364_vm1, %v751_v29, 0 }
 0x3b9   : > { %v873_v28 = vsel %vm364_vm1, %v848_v17, 0 }
 0x3bb   : > { %v753_v31 = vpop.permute.xlu1 %752 }
 0x3bc   : > { %v850_v30 = vpop.permute.xlu0 %849  ;;  %v782_v58 = vsel %vm364_vm1, %v753_v31, 0 }
 0x3bd   : > { %v876_v27 = vsel %vm364_vm1, %v850_v30, 0 }
 0x3be   : > { %4822 = vmatpush3.bf16.xpose.msra.mxu1 %v770_v8  ;;  %4840 = vmatpush3.bf16.xpose.msra.mxu0 %v870_v23  ;;  %v5235_v23 = vpack.c.bf16 %v5996_v45, %v5991_v44 }
 0x3bf   : > { %5283 = vmatprep.subr.msk.bf16.mxu1 %vm364_vm1, %v747_v26  ;;  %5290 = vmatprep.subr.msk.bf16.mxu0 %vm364_vm1, %v848_v17  ;;  %v856_v62 = vpop.permute.xlu1 %855 }
 0x3c0   : > { %v852_v4 = vpop.permute.xlu0 %851  ;;  %v885_v21 = vsel %vm364_vm1, %v856_v62, 0 }
 0x3c1   : > { %v879_v7 = vsel %vm364_vm1, %v852_v4, 0 }
 0x3c4   : > { %v854_v16 = vpop.permute.xlu0 %853 }
 0x3c5   : > { %v882_v57 = vsel %vm364_vm1, %v854_v16, 0 }
 0x3c6   : > { %4824 = vmatpush3.bf16.xpose.msra.mxu1 %v773_v0  ;;  %4842 = vmatpush3.bf16.xpose.msra.mxu0 %v873_v28 }
 0x3c7   : > { %5284 = vmatprep.subr.msk.bf16.mxu1 %vm364_vm1, %v749_v59  ;;  %5291 = vmatprep.subr.msk.bf16.mxu0 %vm364_vm1, %v850_v30 }
 0x3ce   : > { %4826 = vmatpush3.bf16.xpose.msra.mxu1 %v776_v20  ;;  %4844 = vmatpush3.bf16.xpose.msra.mxu0 %v876_v27 }
 0x3cf   : > { %5285 = vmatprep.subr.msk.bf16.mxu1 %vm364_vm1, %v751_v29  ;;  %5292 = vmatprep.subr.msk.bf16.mxu0 %vm364_vm1, %v852_v4 }
 0x3d6   : > { %4828 = vmatpush3.bf16.xpose.msra.mxu1 %v779_v56  ;;  %4846 = vmatpush3.bf16.xpose.msra.mxu0 %v879_v7 }
 0x3d7   : > { %5286 = vmatprep.subr.msk.bf16.mxu1 %vm364_vm1, %v753_v31  ;;  %5293 = vmatprep.subr.msk.bf16.mxu0 %vm364_vm1, %v854_v16 }
 0x3de   : > { %4830 = vmatpush3.bf16.xpose.msra.mxu1 %v782_v58  ;;  %4848 = vmatpush3.bf16.xpose.msra.mxu0 %v882_v57  ;;  %v5239_v57 = vpack.c.bf16 %v6006_v47, %v6001_v46 }
 0x3df   : > { %5294 = vmatprep.subr.msk.bf16.mxu0 %vm364_vm1, %v856_v62  ;;  %5224 = vmatprep.subr.bf16.mxu1 %v5223_v55  ;;  %v5243_v62 = vpack.c.bf16 %v6016_v49, %v6011_v48 }
 0x3e5   : > { %4832 = vmatmul.mubr.msk.bf16.vlgmr.msra.gmra.mrb[0].mxu1 %vm364_vm1, %v6248_v63 }
 0x3e6   : > { %4850 = vmatpush3.bf16.xpose.msra.mxu0 %v885_v21  ;;  %5226 = vmatpush3.bf16.msra.mxu1 %v5223_v55  ;;  %v5247_v21 = vpack.c.bf16 %v6026_v51, %v6021_v50  ;;  %v5251_v55 = vpack.c.bf16 %v6036_v53, %v6031_v52 }
 0x3e7   : > { %5228 = vmatprep.subr.bf16.mxu1 %v5227_v22 }
 0x3ea   : > { %5230 = vmatpush3.bf16.msra.mxu1 %v5227_v22 }
 0x3eb   : > { %5232 = vmatprep.subr.bf16.mxu1 %v5231_v24 }
 0x3ed   : > { %4852 = vmatmul.mubr.msk.bf16.vlgmr.msra.gmra.mrb[8].mxu0 %vm364_vm1, %v6259_v1 }
 0x3ee   : > { %5234 = vmatpush3.bf16.msra.mxu1 %v5231_v24 }
 0x3ef   : > { %5236 = vmatprep.subr.bf16.mxu1 %v5235_v23 }
 0x3f2   : > { %5238 = vmatpush3.bf16.msra.mxu1 %v5235_v23 }
 0x3f3   : > { %5240 = vmatprep.subr.bf16.mxu1 %v5239_v57 }
 0x3f6   : > { %5242 = vmatpush3.bf16.msra.mxu1 %v5239_v57 }
 0x3f7   : > { %5244 = vmatprep.subr.bf16.mxu1 %v5243_v62 }
 0x3fa   : > { %5246 = vmatpush3.bf16.msra.mxu1 %v5243_v62 }
 0x3fb   : > { %5248 = vmatprep.subr.bf16.mxu1 %v5247_v21 }
 0x3fe   : > { %5250 = vmatpush3.bf16.msra.mxu1 %v5247_v21 }
 0x3ff   : > { %5252 = vmatprep.subr.bf16.mxu1 %v5251_v55 }
 0x402   : > { %5254 = vmatpush3.bf16.msra.mxu1 %v5251_v55 }
 0x4b8   : > { %v4833_v8 = vpop.f32.mrb[0].mxu1 }
 0x4b9   : > { %v818_v26 = vpop.f32.mrb[1].mxu1  ;;  %v944_v30 = vadd.f32 %v4833_v8, %v5956_v37 }
 0x4ba   : > { %v942_v17 = vadd.f32 %v5956_v37, %v818_v26  ;;  %v4834_v28 = vpop.f32.mrb[2].mxu1 }
 0x4bb   : > { %v821_v0 = vpop.f32.mrb[3].mxu1  ;;  %v945_v29 = vadd.f32 %v4834_v28, %v5956_v37 }
 0x4bc   : > { %v943_v59 = vadd.f32 %v5956_v37, %v821_v0  ;;  %950 = vmax.xlane.f32.xlu0 %v942_v17 }
 0x4be   : > { %952 = vmax.xlane.f32.xlu1 %v943_v59 }
 0x4c0   : > { %954 = vmax.xlane.f32.xlu0 %v944_v30  ;;  %v4853_v27 = vpop.f32.mrb[8].mxu0 }
 0x4c1   : > { %v921_v20 = vpop.f32.mrb[9].mxu0  ;;  %v948_v58 = vadd.f32 %v4853_v27, %v5956_v37 }
 0x4c2   : > { %v4854_v4 = vpop.f32.mrb[10].mxu0  ;;  %v946_v31 = vadd.f32 %v5956_v37, %v921_v20 }
 0x4c3   : > { %v924_v7 = vpop.f32.mrb[11].mxu0  ;;  %v949_v16 = vadd.f32 %v4854_v4, %v5956_v37 }
 0x4c4   : > { %v947_v56 = vadd.f32 %v5956_v37, %v924_v7  ;;  %956 = vmax.xlane.f32.xlu0 %v945_v29 }
 0x4c6   : > { %960 = vmax.xlane.f32.xlu1 %v947_v56 }
 0x4c8   : > { %958 = vmax.xlane.f32.xlu0 %v946_v31 }
 0x4ca   : > { %964 = vmax.xlane.f32.xlu1 %v949_v16 }
 0x4cc   : > { %962 = vmax.xlane.f32.xlu0 %v948_v58 }
 0x4db   : > { %692 = vrot.lane.b32.xlu1 %v6186_v5, %s5641_s1 }
 0x4df   : > { %694 = vrot.lane.b32.xlu1 %v6195_v9, %s5641_s1 }
 0x4e2   : > { %690 = vrot.lane.b32.xlu0 %v6190_v6, %s5641_s1 }
 0x4e3   : > { %696 = vrot.lane.b32.xlu1 %v6205_v11, %s5641_s1 }
 0x4e6   : > { %698 = vrot.lane.b32.xlu0 %v6200_v10, %s5641_s1 }
 0x4e7   : > { %700 = vrot.lane.b32.xlu1 %v6215_v15, %s5641_s1 }
 0x4ea   : > { %702 = vrot.lane.b32.xlu0 %v6210_v14, %s5641_s1 }
 0x4eb   : > { %704 = vrot.lane.b32.xlu1 %v6221_v54, %s5641_s1 }
 0x549   : > { %v951_v5 = vpop.xlane.xlu0 %950 }
 0x54a   : > { %v966_v9 = vsub.f32 %v942_v17, %v951_v5 }
 0x54b   : > { %v953_v22 = vpop.xlane.xlu1 %952 }
 0x54c   : > { %v974_v24 = vmul.f32 1.442695, %v966_v9  ;;  %v967_v6 = vsub.f32 %v943_v59, %v953_v22 }
 0x54d   : > { %v955_v23 = vpop.xlane.xlu0 %954 }
 0x54e   : > { %5428 = vpow2.f32 %v974_v24  ;;  %v976_v11 = vmul.f32 1.442695, %v967_v6  ;;  %v968_v8 = vsub.f32 %v944_v30, %v955_v23 }
 0x550   : > { %5430 = vpow2.f32 %v976_v11  ;;  %v978_v10 = vmul.f32 1.442695, %v968_v8 }
 0x551   : > { %v957_v26 = vpop.xlane.xlu0 %956 }
 0x552   : > { %5432 = vpow2.f32 %v978_v10  ;;  %v969_v15 = vsub.f32 %v945_v29, %v957_v26 }
 0x553   : > { %v961_v28 = vpop.xlane.xlu1 %960 }
 0x554   : > { %v980_v0 = vmul.f32 1.442695, %v969_v15  ;;  %v971_v14 = vsub.f32 %v947_v56, %v961_v28 }
 0x555   : > { %v959_v27 = vpop.xlane.xlu0 %958 }
 0x556   : > { %5434 = vpow2.f32 %v980_v0  ;;  %v970_v54 = vsub.f32 %v946_v31, %v959_v27  ;;  %v984_v20 = vmul.f32 1.442695, %v971_v14 }
 0x557   : > { %v965_v17 = vpop.xlane.xlu1 %964 }
 0x558   : > { %v6368_v4 = vpop.eup %5428  ;;  %v982_v59 = vmul.f32 1.442695, %v970_v54  ;;  %v973_v7 = vsub.f32 %v949_v16, %v965_v17 }
 0x559   : > { %4887 = vmatprep.mubr.f32.mxu1 %v6368_v4  ;;  %v963_v30 = vpop.xlane.xlu0 %962 }
 0x55a   : > { %v6371_v57 = vpop.eup %5430  ;;  %5436 = vpow2.f32 %v982_v59  ;;  %v972_v62 = vsub.f32 %v948_v58, %v963_v30  ;;  %v988_v29 = vmul.f32 1.442695, %v973_v7 }
 0x55b   : > { %5438 = vpow2.f32 %v984_v20  ;;  %4888 = vmatmul.mubr.f32.vlgmr.msra.gmra.mrb[4].mxu1 %v6371_v57  ;;  %v693_v56 = vpop.permute.xlu1 %692 }
 0x55c   : > { %v6374_v21 = vpop.eup %5432  ;;  %v986_v31 = vmul.f32 1.442695, %v972_v62  ;;  %v715_v55 = vmul.bf16 %v693_v56, %v6248_v63  ;;  %v723_v11 = vmul.bf16 %v693_v56, %v6259_v1 }
 0x55d   : > { %v691_v5 = vpop.permute.xlu0 %690  ;;  %4890 = vmatprep.mubr.f32.mxu1 %v6374_v21 }
 0x55e   : > { %5440 = vpow2.f32 %v986_v31  ;;  %v714_v16 = vmul.bf16 %v691_v5, %v6250_v25  ;;  %1133 = vrot.lane.b32.xlu1 %v715_v55, %s5641_s1  ;;  %v722_v22 = vmul.bf16 %v691_v5, %v6262_v32 }
 0x55f   : > { %5442 = vpow2.f32 %v988_v29  ;;  %v695_v58 = vpop.permute.xlu1 %694 }
 0x560   : > { %v6380_v9 = vpop.eup %5434  ;;  %1131 = vrot.lane.b32.xlu0 %v714_v16, %s5641_s1  ;;  %v716_v24 = vmul.bf16 %v695_v58, %v6250_v25  ;;  %v724_v28 = vmul.bf16 %v695_v58, %v6262_v32 }
 0x561   : > { %4891 = vmatmul.mubr.f32.gmra.mrb[6].mxu1 %v6380_v9  ;;  %v699_v26 = vpop.permute.xlu0 %698 }
 0x562   : > { %1212 = vrot.lane.b32.xlu1 %v722_v22, %s5641_s1  ;;  %v718_v14 = vmul.bf16 %v699_v26, %v6250_v25  ;;  %v726_v59 = vmul.bf16 %v699_v26, %v6262_v32 }
 0x563   : > { %v697_v6 = vpop.permute.xlu1 %696 }
 0x564   : > { %v6387_v23 = vpop.eup %5436  ;;  %1135 = vrot.lane.b32.xlu0 %v716_v24, %s5641_s1  ;;  %v717_v10 = vmul.bf16 %v697_v6, %v6248_v63  ;;  %v725_v54 = vmul.bf16 %v697_v6, %v6259_v1 }
 0x565   : > { %v6391_v8 = vpop.eup %5438  ;;  %4893 = vmatprep.mubr.f32.mxu1 %v6387_v23  ;;  %v703_v17 = vpop.permute.xlu0 %702 }
 0x566   : > { %4894 = vmatmul.mubr.f32.gmra.mrb[8].mxu1 %v6391_v8  ;;  %1214 = vrot.lane.b32.xlu1 %v723_v11, %s5641_s1  ;;  %v720_v7 = vmul.bf16 %v703_v17, %v6250_v25  ;;  %v728_v31 = vmul.bf16 %v703_v17, %v6262_v32 }
 0x567   : > { %v701_v27 = vpop.permute.xlu1 %700 }
 0x568   : > { %v6397_v15 = vpop.eup %5440  ;;  %1137 = vrot.lane.b32.xlu0 %v717_v10, %s5641_s1  ;;  %v719_v20 = vmul.bf16 %v701_v27, %v6248_v63  ;;  %v727_v62 = vmul.bf16 %v701_v27, %v6259_v1  ;;  %v5400_v27 = vld [vmem:[%s6428_s29] sm:$0xff]  }
 0x569   : > { %v6401_v0 = vpop.eup %5442  ;;  %4896 = vmatprep.mubr.f32.mxu1 %v6397_v15 }
 0x56a   : > { %4897 = vmatmul.mubr.f32.gmra.mrb[10].mxu1 %v6401_v0  ;;  %1216 = vrot.lane.b32.xlu1 %v724_v28, %s5641_s1 }
 0x56b   : > { %v705_v30 = vpop.permute.xlu1 %704 }
 0x56c   : > { %1139 = vrot.lane.b32.xlu0 %v718_v14, %s5641_s1  ;;  %v721_v29 = vmul.bf16 %v705_v30, %v6248_v63  ;;  %v729_v56 = vmul.bf16 %v705_v30, %v6259_v1 }
 0x56e   : > { %1218 = vrot.lane.b32.xlu1 %v725_v54, %s5641_s1 }
 0x570   : > { %1141 = vrot.lane.b32.xlu0 %v719_v20, %s5641_s1 }
 0x572   : > { %1220 = vrot.lane.b32.xlu1 %v726_v59, %s5641_s1 }
 0x574   : > { %1143 = vrot.lane.b32.xlu0 %v720_v7, %s5641_s1 }
 0x576   : > { %1222 = vrot.lane.b32.xlu1 %v727_v62, %s5641_s1 }
 0x578   : > { %1145 = vrot.lane.b32.xlu0 %v721_v29, %s5641_s1 }
 0x57a   : > { %1226 = vrot.lane.b32.xlu1 %v729_v56, %s5641_s1 }
 0x57c   : > { %1224 = vrot.lane.b32.xlu0 %v728_v31, %s5641_s1  ;;  %s7309_s1 = sld [smem:[#allocation21_spill]] }
 0x582   : > { %s1410_s8 = scalar_lea.vmem %s7309_s1, %s5636_s2 }
 0x5d0   : > { %v1134_v25 = vpop.permute.xlu1 %1133 }
 0x5d2   : > { %v1132_v55 = vpop.permute.xlu0 %1131 }
 0x5d3   : > { %4899 = vmatprep.subr.bf16.mxu0 %v1132_v55 }
 0x5d4   : > { %4900 = vmatpush3.bf16.msra.mxu0 %v1132_v55  ;;  %v1213_v63 = vpop.permute.xlu1 %1212 }
 0x5d5   : > { %4901 = vmatprep.subr.bf16.mxu0 %v1134_v25  ;;  %4919 = vmatprep.subr.bf16.mxu1 %v1213_v63 }
 0x5d6   : > { %v1136_v1 = vpop.permute.xlu0 %1135  ;;  %4920 = vmatpush3.bf16.msra.mxu1 %v1213_v63 }
 0x5d8   : > { %4902 = vmatpush3.bf16.msra.mxu0 %v1134_v25  ;;  %v1215_v32 = vpop.permute.xlu1 %1214 }
 0x5d9   : > { %4903 = vmatprep.subr.bf16.mxu0 %v1136_v1  ;;  %4921 = vmatprep.subr.bf16.mxu1 %v1215_v32 }
 0x5da   : > { %v1138_v5 = vpop.permute.xlu0 %1137  ;;  %4922 = vmatpush3.bf16.msra.mxu1 %v1215_v32 }
 0x5dc   : > { %4904 = vmatpush3.bf16.msra.mxu0 %v1136_v1  ;;  %v1217_v16 = vpop.permute.xlu1 %1216 }
 0x5dd   : > { %4905 = vmatprep.subr.bf16.mxu0 %v1138_v5  ;;  %4923 = vmatprep.subr.bf16.mxu1 %v1217_v16 }
 0x5de   : > { %v1140_v58 = vpop.permute.xlu0 %1139  ;;  %4924 = vmatpush3.bf16.msra.mxu1 %v1217_v16 }
 0x5e0   : > { %4906 = vmatpush3.bf16.msra.mxu0 %v1138_v5  ;;  %v1219_v22 = vpop.permute.xlu1 %1218 }
 0x5e1   : > { %4907 = vmatprep.subr.bf16.mxu0 %v1140_v58  ;;  %4925 = vmatprep.subr.bf16.mxu1 %v1219_v22 }
 0x5e2   : > { %v1142_v24 = vpop.permute.xlu0 %1141  ;;  %4926 = vmatpush3.bf16.msra.mxu1 %v1219_v22 }
 0x5e4   : > { %4908 = vmatpush3.bf16.msra.mxu0 %v1140_v58  ;;  %v1221_v6 = vpop.permute.xlu1 %1220 }
 0x5e5   : > { %4909 = vmatprep.subr.bf16.mxu0 %v1142_v24  ;;  %4927 = vmatprep.subr.bf16.mxu1 %v1221_v6 }
 0x5e6   : > { %v1144_v11 = vpop.permute.xlu0 %1143  ;;  %4928 = vmatpush3.bf16.msra.mxu1 %v1221_v6 }
 0x5e8   : > { %4910 = vmatpush3.bf16.msra.mxu0 %v1142_v24  ;;  %v1223_v10 = vpop.permute.xlu1 %1222 }
 0x5e9   : > { %4911 = vmatprep.subr.bf16.mxu0 %v1144_v11  ;;  %4929 = vmatprep.subr.bf16.mxu1 %v1223_v10 }
 0x5ea   : > { %v1146_v26 = vpop.permute.xlu0 %1145  ;;  %4930 = vmatpush3.bf16.msra.mxu1 %v1223_v10 }
 0x5ec   : > { %4912 = vmatpush3.bf16.msra.mxu0 %v1144_v11  ;;  %v1227_v14 = vpop.permute.xlu1 %1226 }
 0x5ed   : > { %4913 = vmatprep.subr.bf16.mxu0 %v1146_v26 }
 0x5ee   : > { %v1225_v28 = vpop.permute.xlu0 %1224 }
 0x5ef   : > { %4931 = vmatprep.subr.bf16.mxu1 %v1225_v28 }
 0x5f0   : > { %4914 = vmatpush3.bf16.msra.mxu0 %v1146_v26  ;;  %4932 = vmatpush3.bf16.msra.mxu1 %v1225_v28 }
 0x5f1   : > { %4933 = vmatprep.subr.bf16.mxu1 %v1227_v14 }
 0x5f4   : > { %4934 = vmatpush3.bf16.msra.mxu1 %v1227_v14 }
 0x5f5   : > { %4939 = vmatprep.subr.bf16.mxu1 %v5400_v27 }
 0x62e   : > { %v4889_v54 = vpop.f32.mrb[4].mxu1 }
 0x62f   : > { %v1096_v20 = vmax.f32 %v4889_v54, 1e-30  ;;  %v1056_v17 = vpop.f32.mrb[5].mxu1 }
 0x630   : > { %v1095_v59 = vmax.f32 %v1056_v17, 1e-30 }
 0x631   : > { %5444 = vrcp.f32 %v1096_v20 }
 0x632   : > { %5446 = vrcp.f32 %v1095_v59 }
 0x634   : > { %v4892_v7 = vpop.f32.mrb[6].mxu1 }
 0x635   : > { %v1098_v30 = vmax.f32 %v4892_v7, 1e-30  ;;  %v1066_v62 = vpop.f32.mrb[7].mxu1 }
 0x636   : > { %v1097_v29 = vmax.f32 %v1066_v62, 1e-30 }
 0x637   : > { %5448 = vrcp.f32 %v1098_v30 }
 0x638   : > { %5450 = vrcp.f32 %v1097_v29 }
 0x639   : > { %v4895_v56 = vpop.f32.mrb[8].mxu1 }
 0x63a   : > { %v1100_v31 = vmax.f32 %v4895_v56, 1e-30  ;;  %v1076_v25 = vpop.f32.mrb[9].mxu1 }
 0x63b   : > { %v5445_v55 = vpop.eup %5444  ;;  %v1099_v63 = vmax.f32 %v1076_v25, 1e-30 }
 0x63c   : > { %v5447_v1 = vpop.eup %5446  ;;  %5452 = vrcp.f32 %v1100_v31  ;;  %v1112_v32 = vmul.f32 %v5445_v55, %v6371_v57 }
 0x63d   : > { %5454 = vrcp.f32 %v1099_v63  ;;  %v4898_v5 = vpop.f32.mrb[10].mxu1  ;;  %v1111_v16 = vmul.f32 %v5447_v1, %v6368_v4 }
 0x63e   : > { %v1102_v58 = vmax.f32 %v4898_v5, 1e-30  ;;  %v1086_v22 = vpop.f32.mrb[11].mxu1  ;;  %v4446_v5 = vld [vmem:[%s1392_s14] ss:$0 sm:$0xff]  ;;  %s1746_s14 = scalar_lea.vmem %s7311_s9, %s5636_s2 }
 0x63f   : > { %v1101_v24 = vmax.f32 %v1086_v22, 1e-30  ;;  %v1119_v6 = vpack.c.bf16 %v1112_v32, %v1111_v16 }
 0x640   : > { %5456 = vrcp.f32 %v1102_v58 }
 0x641   : > { %v5449_v11 = vpop.eup %5448  ;;  %5458 = vrcp.f32 %v1101_v24  ;;  %4915 = vmatprep.mubr.bf16.mxu0 %v1119_v6 }
 0x642   : > { %v5451_v10 = vpop.eup %5450  ;;  %v1114_v26 = vmul.f32 %v5449_v11, %v6380_v9 }
 0x643   : > { %v1113_v28 = vmul.f32 %v5451_v10, %v6374_v21  ;;  %v5401_v21 = vld [vmem:[%s6428_s29 + $0x8] sm:$0xff]   ;;  %s7310_s29 = sld [smem:[#allocation23_spill]] }
 0x645   : > { %v1120_v14 = vpack.c.bf16 %v1114_v26, %v1113_v28 }
 0x646   : > { %v5453_v57 = vpop.eup %5452 }
 0x647   : > { %v5455_v54 = vpop.eup %5454  ;;  %4916 = vmatmul.mubr.bf16.vlgmr.msra.gmra.mrb[12].mxu0 %v1120_v14  ;;  %v1116_v4 = vmul.f32 %v5453_v57, %v6391_v8 }
 0x648   : > { %v1115_v20 = vmul.f32 %v5455_v54, %v6387_v23 }
 0x649   : > { %s1554_s4 = scalar_lea.vmem %s7310_s29, %s5636_s2  ;;  %s351_s2 = sadd.s32 1, %s5636_s2  }
 0x64a   : > { %v5457_v17 = vpop.eup %5456  ;;  %v1121_v59 = vpack.c.bf16 %v1116_v4, %v1115_v20  ;;  %p348_p0 = scmp.ge.s32.totalorder %s351_s2, 12  }
 0x64b   : > { %v5459_v7 = vpop.eup %5458  ;;  %v1118_v30 = vmul.f32 %v5457_v17, %v6401_v0  ;;  %vm5643_vm2 = vmmov (%p348_p0), 0  }
 0x64c   : > { %v1117_v62 = vmul.f32 %v5459_v7, %v6397_v15  ;;  %4935 = vmatprep.mubr.bf16.mxu1 %v1121_v59 }
 0x64e   : > { %v1122_v9 = vpack.c.bf16 %v1118_v30, %v1117_v62 }
 0x650   : > { %4936 = vmatmul.mubr.bf16.vlgmr.msra.gmra.mrb[12].mxu1 %v1122_v9 }
 0x651   : > { %4940 = vmatpush3.bf16.msra.mxu1 %v5400_v27 }
 0x652   : > { %4941 = vmatprep.subr.bf16.mxu1 %v5401_v21 }
 0x655   : > { %4942 = vmatpush3.bf16.msra.mxu1 %v5401_v21 }
 0x71a   : > { %v4917_v29 = vpop.f32.mrb[12].mxu0 }
 0x71b   : > { %v1189_v56 = vpop.f32.mrb[13].mxu0 }
 0x71c   : > { %v4918_v8 = vpop.f32.mrb[14].mxu0 }
 0x71d   : > { %v1286_v31 = vpack.c.bf16 %v4918_v8, %v4917_v29  ;;  %v1192_v23 = vpop.f32.mrb[15].mxu0 }
 0x71e   : > { %v1285_v25 = vpack.c.bf16 %v1192_v23, %v1189_v56 }
 0x720   : > { %4943 = vmatprep.mubr.msk.bf16.mxu1 %vm364_vm1, %v1285_v25 }
 0x721   : > { %4944 = vmatmul.mubr.msk.bf16.vlgmr.msra.gmra.mrb[16].mxu1 %vm364_vm1, %v1286_v31 }
 0x723   : > { %v4937_v0 = vpop.f32.mrb[12].mxu1 }
 0x724   : > { %v1270_v15 = vpop.f32.mrb[13].mxu1 }
 0x725   : > { %v4938_v55 = vpop.f32.mrb[14].mxu1 }
 0x726   : > { %v1288_v63 = vpack.c.bf16 %v4938_v55, %v4937_v0  ;;  %v1273_v1 = vpop.f32.mrb[15].mxu1 }
 0x727   : > { %v1287_v27 = vpack.c.bf16 %v1273_v1, %v1270_v15 }
 0x729   : > { %4947 = vmatprep.mubr.msk.bf16.mxu1 %vm364_vm1, %v1287_v27 }
 0x72a   : > { %4948 = vmatmul.mubr.msk.bf16.gmra.mrb[20].mxu1 %vm364_vm1, %v1288_v63 }
 0x7f4   : > { %v4945_v32 = vpop.f32.mrb[16].mxu1 }
 0x7f5   : > { %v1353_v16 = vpop.f32.mrb[17].mxu1  ;;  %v1386_v58 = vadd.f32 %v5624_v12, %v4945_v32 }
 0x7f6   : > { %v1384_v22 = vadd.f32 %v5632_v60, %v1353_v16  ;;  %v4946_v24 = vpop.f32.mrb[18].mxu1 }
 0x7f7   : > { %v1356_v6 = vpop.f32.mrb[19].mxu1  ;;  %v6453_v26 = vadd.f32 %v4446_v5, %v1386_v58  ;;  %v1387_v28 = vadd.f32 %v5620_v18, %v4946_v24 }
 0x7f8   : > { %v6450_v11 = vadd.f32 %v4446_v5, %v1384_v22  ;;  %v1385_v10 = vadd.f32 %v5628_v2, %v1356_v6 }
 0x7f9   : > { %v6462_v54 = vadd.f32 %v4446_v5, %v1387_v28  ;;  %v1418_v2 = vsel %vm364_vm1, %v6453_v26, 0.0 }
 0x7fa   : > { %v6456_v14 = vadd.f32 %v4446_v5, %v1385_v10  ;;  %v1412_v57 = vsel %vm364_vm1, %v6450_v11, 0.0 }
 0x7fb   : > { %1413 = vadd.xlane.f32.xlu0 %v1412_v57  ;;  %v1421_v9 = vsel %vm364_vm1, %v6462_v54, 0.0 }
 0x7fc   : > { %v1415_v12 = vsel %vm364_vm1, %v6456_v14, 0.0 }
 0x7fd   : > { %1416 = vadd.xlane.f32.xlu1 %v1415_v12  ;;  %v4949_v60 = vpop.f32.mrb[20].mxu1 }
 0x7fe   : > { %v1369_v4 = vpop.f32.mrb[21].mxu1  ;;  %v1390_v30 = vadd.f32 %v5608_v13, %v4949_v60 }
 0x7ff   : > { %v1388_v20 = vadd.f32 %v5616_v61, %v1369_v4  ;;  %1419 = vadd.xlane.f32.xlu0 %v1418_v2  ;;  %v4950_v18 = vpop.f32.mrb[22].mxu1 }
 0x800   : > { %v1372_v17 = vpop.f32.mrb[23].mxu1  ;;  %v1391_v59 = vadd.f32 %v5604_v19, %v4950_v18  ;;  %v6480_v56 = vadd.f32 %v4446_v5, %v1390_v30 }
 0x801   : > { %v1389_v7 = vadd.f32 %v5612_v3, %v1372_v17  ;;  %v6470_v62 = vadd.f32 %v4446_v5, %v1388_v20 }
 0x802   : > { %v6476_v29 = vadd.f32 %v4446_v5, %v1391_v59  ;;  %v1430_v19 = vsel %vm364_vm1, %v6480_v56, 0.0 }
 0x803   : > { %v6474_v21 = vadd.f32 %v4446_v5, %v1389_v7  ;;  %1422 = vadd.xlane.f32.xlu0 %v1421_v9  ;;  %v1424_v3 = vsel %vm364_vm1, %v6470_v62, 0.0 }
 0x804   : > { %v1433_v13 = vsel %vm364_vm1, %v6476_v29, 0.0 }
 0x805   : > { %v1427_v61 = vsel %vm364_vm1, %v6474_v21, 0.0 }
 0x806   : > { %1428 = vadd.xlane.f32.xlu1 %v1427_v61 }
 0x807   : > { %1425 = vadd.xlane.f32.xlu0 %v1424_v3 }
 0x80a   : > { %1434 = vadd.xlane.f32.xlu1 %v1433_v13 }
 0x80b   : > { %1431 = vadd.xlane.f32.xlu0 %v1430_v19 }
 0x888   : > { %v1414_v8 = vpop.xlane.xlu0 %1413 }
 0x889   : > { %v1436_v31 = vmul.f32 0.03125, %v1414_v8 }
 0x88a   : > { %v1417_v23 = vpop.xlane.xlu1 %1416 }
 0x88b   : > { %v6489_v25 = vsub.f32 %v6450_v11, %v1436_v31  ;;  %v1437_v0 = vmul.f32 0.03125, %v1417_v23 }
 0x88c   : > { %v1420_v15 = vpop.xlane.xlu0 %1419 }
 0x88d   : > { %v6492_v55 = vsub.f32 %v6456_v14, %v1437_v0  ;;  %v1438_v63 = vmul.f32 0.03125, %v1420_v15  ;;  %v1452_v1 = vmul.f32 %v6489_v25, %v6489_v25 }
 0x88f   : > { %v6497_v27 = vsub.f32 %v6453_v26, %v1438_v63  ;;  %v1460_v32 = vsel %vm364_vm1, %v1452_v1, 0.0  ;;  %v1453_v5 = vmul.f32 %v6492_v55, %v6492_v55  ;;  %v5402_v63 = vld [vmem:[%s1549_s10] sm:$0xff]   ;;  %v5403_v1 = vld [vmem:[%s1549_s10 + $0x8] sm:$0xff]  }
 0x890   : > { %v1423_v16 = vpop.xlane.xlu0 %1422  ;;  %1461 = vadd.xlane.f32.xlu0 %v1460_v32  ;;  %4951 = vmatprep.subr.bf16.mxu0 %v5402_v63 }
 0x891   : > { %v1439_v58 = vmul.f32 0.03125, %v1423_v16  ;;  %v1463_v22 = vsel %vm364_vm1, %v1453_v5, 0.0  ;;  %v1454_v24 = vmul.f32 %v6497_v27, %v6497_v27  ;;  %4952 = vmatpush3.bf16.msra.mxu0 %v5402_v63 }
 0x892   : > { %1464 = vadd.xlane.f32.xlu1 %v1463_v22  ;;  %4953 = vmatprep.subr.bf16.mxu0 %v5403_v1 }
 0x893   : > { %v6506_v6 = vsub.f32 %v6462_v54, %v1439_v58  ;;  %v1429_v10 = vpop.xlane.xlu1 %1428  ;;  %v1466_v28 = vsel %vm364_vm1, %v1454_v24, 0.0 }
 0x894   : > { %v1441_v57 = vmul.f32 0.03125, %v1429_v10  ;;  %1467 = vadd.xlane.f32.xlu0 %v1466_v28  ;;  %v1426_v12 = vpop.xlane.xlu0 %1425 }
 0x895   : > { %v1440_v60 = vmul.f32 0.03125, %v1426_v12  ;;  %v1455_v4 = vmul.f32 %v6506_v6, %v6506_v6  ;;  %4954 = vmatpush3.bf16.msra.mxu0 %v5403_v1 }
 0x896   : > { %v6512_v2 = vsub.f32 %v6474_v21, %v1441_v57 }
 0x897   : > { %v6515_v20 = vsub.f32 %v6470_v62, %v1440_v60  ;;  %v1435_v18 = vpop.xlane.xlu1 %1434  ;;  %v1469_v17 = vsel %vm364_vm1, %v1455_v4, 0.0 }
 0x898   : > { %v1443_v59 = vmul.f32 0.03125, %v1435_v18  ;;  %v1432_v7 = vpop.xlane.xlu0 %1431  ;;  %1470 = vadd.xlane.f32.xlu1 %v1469_v17  ;;  %v1457_v30 = vmul.f32 %v6512_v2, %v6512_v2 }
 0x899   : > { %v1442_v9 = vmul.f32 0.03125, %v1432_v7  ;;  %v1456_v61 = vmul.f32 %v6515_v20, %v6515_v20 }
 0x89a   : > { %v6523_v3 = vsub.f32 %v6476_v29, %v1443_v59  ;;  %v1475_v13 = vsel %vm364_vm1, %v1457_v30, 0.0 }
 0x89b   : > { %v6527_v19 = vsub.f32 %v6480_v56, %v1442_v9  ;;  %v1472_v8 = vsel %vm364_vm1, %v1456_v61, 0.0  ;;  %v4447_v9 = vld [vmem:[%s1408_s11] ss:$0 sm:$0xff] }
 0x89c   : > { %1473 = vadd.xlane.f32.xlu0 %v1472_v8  ;;  %1476 = vadd.xlane.f32.xlu1 %v1475_v13  ;;  %v1459_v31 = vmul.f32 %v6523_v3, %v6523_v3 }
 0x89d   : > { %v1458_v23 = vmul.f32 %v6527_v19, %v6527_v19 }
 0x89e   : > { %v1481_v0 = vsel %vm364_vm1, %v1459_v31, 0.0 }
 0x89f   : > { %v1478_v15 = vsel %vm364_vm1, %v1458_v23, 0.0 }
 0x8a0   : > { %1479 = vadd.xlane.f32.xlu0 %v1478_v15  ;;  %1482 = vadd.xlane.f32.xlu1 %v1481_v0 }
 0x91d   : > { %v1462_v32 = vpop.xlane.xlu0 %1461 }
 0x91e   : > { %v1484_v5 = vmul.f32 0.03125, %v1462_v32 }
 0x91f   : > { %v1465_v16 = vpop.xlane.xlu1 %1464 }
 0x920   : > { %v1492_v58 = vadd.f32 1e-06, %v1484_v5  ;;  %v1485_v22 = vmul.f32 0.03125, %v1465_v16 }
 0x921   : > { %v1468_v24 = vpop.xlane.xlu0 %1467 }
 0x922   : > { %5460 = vrsqrt.f32 %v1492_v58  ;;  %v1493_v10 = vadd.f32 1e-06, %v1485_v22  ;;  %v1486_v28 = vmul.f32 0.03125, %v1468_v24  ;;  %v4448_v22 = vld [vmem:[%s1410_s8] ss:$0 sm:$0xff] }
 0x924   : > { %5462 = vrsqrt.f32 %v1493_v10  ;;  %v1494_v57 = vadd.f32 1e-06, %v1486_v28 }
 0x925   : > { %v1471_v12 = vpop.xlane.xlu1 %1470 }
 0x926   : > { %5464 = vrsqrt.f32 %v1494_v57  ;;  %v1487_v60 = vmul.f32 0.03125, %v1471_v12 }
 0x928   : > { %v1495_v4 = vadd.f32 1e-06, %v1487_v60 }
 0x929   : > { %v1474_v18 = vpop.xlane.xlu0 %1473  ;;  %v1477_v17 = vpop.xlane.xlu1 %1476 }
 0x92a   : > { %5466 = vrsqrt.f32 %v1495_v4  ;;  %v1488_v59 = vmul.f32 0.03125, %v1474_v18  ;;  %v1489_v7 = vmul.f32 0.03125, %v1477_v17 }
 0x92c   : > { %v5461_v30 = vpop.eup %5460  ;;  %v1496_v61 = vadd.f32 1e-06, %v1488_v59  ;;  %v1497_v13 = vadd.f32 1e-06, %v1489_v7 }
 0x92d   : > { %v1508_v8 = vmul.f32 %v5461_v30, %v6489_v25  ;;  %v1480_v31 = vpop.xlane.xlu0 %1479  ;;  %v1483_v23 = vpop.xlane.xlu1 %1482 }
 0x92e   : > { %v5463_v0 = vpop.eup %5462  ;;  %5468 = vrsqrt.f32 %v1496_v61  ;;  %v1490_v15 = vmul.f32 0.03125, %v1480_v31  ;;  %v1491_v63 = vmul.f32 0.03125, %v1483_v23 }
 0x92f   : > { %v1509_v1 = vmul.f32 %v5463_v0, %v6492_v55  ;;  %5470 = vrsqrt.f32 %v1497_v13  ;;  %v1522_v32 = vmul.f32 %v4447_v9, %v1508_v8 }
 0x930   : > { %v5465_v5 = vpop.eup %5464  ;;  %v1498_v16 = vadd.f32 1e-06, %v1490_v15  ;;  %v1499_v58 = vadd.f32 1e-06, %v1491_v63 }
 0x931   : > { %v1510_v25 = vmul.f32 %v5465_v5, %v6497_v27  ;;  %v1523_v24 = vmul.f32 %v4447_v9, %v1509_v1  ;;  %v1536_v10 = vadd.f32 %v4448_v22, %v1522_v32 }
 0x932   : > { %5472 = vrsqrt.f32 %v1498_v16 }
 0x933   : > { %5474 = vrsqrt.f32 %v1499_v58  ;;  %v1537_v28 = vadd.f32 %v4448_v22, %v1523_v24  ;;  %v1524_v12 = vmul.f32 %v4447_v9, %v1510_v25  ;;  %v5406_v58 = vld [vmem:[%s6182_s13 + $0x10] sm:$0xff]   ;;  %v5409_v25 = vld [vmem:[%s6182_s13 + $0x28] sm:$0xff]  }
 0x934   : > { %v5467_v57 = vpop.eup %5466  ;;  %v5410_v24 = vld [vmem:[%s6182_s13 + $0x30] sm:$0xff]  }
 0x935   : > { %v1511_v60 = vmul.f32 %v5467_v57, %v6506_v6  ;;  %v1544_v4 = vpack.c.bf16 %v1537_v28, %v1536_v10  ;;  %v1538_v7 = vadd.f32 %v4448_v22, %v1524_v12  ;;  %v5411_v10 = vld [vmem:[%s6182_s13 + $0x38] sm:$0xff]   ;;  %v4450_v28 = vld [vmem:[%s1554_s4] ss:$0 sm:$0xff] }
 0x937   : > { %v1525_v18 = vmul.f32 %v4447_v9, %v1511_v60  ;;  %4955 = vmatprep.mubr.msk.bf16.mxu0 %vm364_vm1, %v1544_v4 }
 0x938   : > { %v5469_v55 = vpop.eup %5468 }
 0x939   : > { %v5471_v17 = vpop.eup %5470  ;;  %v1512_v59 = vmul.f32 %v5469_v55, %v6515_v20  ;;  %v1539_v30 = vadd.f32 %v4448_v22, %v1525_v18 }
 0x93a   : > { %v1513_v27 = vmul.f32 %v5471_v17, %v6512_v2 }
 0x93b   : > { %v1545_v61 = vpack.c.bf16 %v1539_v30, %v1538_v7  ;;  %v1526_v13 = vmul.f32 %v4447_v9, %v1512_v59 }
 0x93c   : > { %v5473_v8 = vpop.eup %5472  ;;  %v1527_v31 = vmul.f32 %v4447_v9, %v1513_v27 }
 0x93d   : > { %v5475_v23 = vpop.eup %5474  ;;  %v1514_v6 = vmul.f32 %v5473_v8, %v6527_v19  ;;  %4956 = vmatmul.mubr.msk.bf16.vlgmr.msra.gmra.mrb[16].mxu0 %vm364_vm1, %v1545_v61  ;;  %v1540_v0 = vadd.f32 %v4448_v22, %v1526_v13  ;;  %v5404_v19 = vld [vmem:[%s6182_s13] sm:$0xff]  }
 0x93e   : > { %v1515_v15 = vmul.f32 %v5475_v23, %v6523_v3  ;;  %v1541_v20 = vadd.f32 %v4448_v22, %v1527_v31  ;;  %4963 = vmatprep.subr.bf16.mxu0 %v5404_v19  ;;  %v5405_v3 = vld [vmem:[%s6182_s13 + $0x8] sm:$0xff]  }
 0x93f   : > { %v1528_v63 = vmul.f32 %v4447_v9, %v1514_v6  ;;  %4964 = vmatpush3.bf16.msra.mxu0 %v5404_v19 }
 0x940   : > { %v1546_v1 = vpack.c.bf16 %v1541_v20, %v1540_v0  ;;  %v1529_v2 = vmul.f32 %v4447_v9, %v1515_v15  ;;  %4965 = vmatprep.subr.bf16.mxu0 %v5405_v3  ;;  %v5407_v9 = vld [vmem:[%s6182_s13 + $0x18] sm:$0xff]  }
 0x941   : > { %v1542_v32 = vadd.f32 %v4448_v22, %v1528_v63 }
 0x942   : > { %4959 = vmatprep.mubr.msk.bf16.mxu0 %vm364_vm1, %v1546_v1  ;;  %v1543_v5 = vadd.f32 %v4448_v22, %v1529_v2  ;;  %v5408_v22 = vld [vmem:[%s6182_s13 + $0x20] sm:$0xff]  }
 0x943   : > { %4966 = vmatpush3.bf16.msra.mxu0 %v5405_v3 }
 0x944   : > { %v1547_v16 = vpack.c.bf16 %v1543_v5, %v1542_v32  ;;  %4967 = vmatprep.subr.bf16.mxu0 %v5406_v58 }
 0x946   : > { %4960 = vmatmul.mubr.msk.bf16.gmra.mrb[20].mxu0 %vm364_vm1, %v1547_v16 }
 0x947   : > { %4968 = vmatpush3.bf16.msra.mxu0 %v5406_v58 }
 0x948   : > { %4969 = vmatprep.subr.bf16.mxu0 %v5407_v9 }
 0x94b   : > { %4970 = vmatpush3.bf16.msra.mxu0 %v5407_v9 }
 0x94c   : > { %4971 = vmatprep.subr.bf16.mxu0 %v5408_v22 }
 0x94f   : > { %4972 = vmatpush3.bf16.msra.mxu0 %v5408_v22 }
 0x950   : > { %4973 = vmatprep.subr.bf16.mxu0 %v5409_v25 }
 0x953   : > { %4974 = vmatpush3.bf16.msra.mxu0 %v5409_v25 }
 0x954   : > { %4975 = vmatprep.subr.bf16.mxu0 %v5410_v24 }
 0x957   : > { %4976 = vmatpush3.bf16.msra.mxu0 %v5410_v24 }
 0x958   : > { %4977 = vmatprep.subr.bf16.mxu0 %v5411_v10 }
 0x95b   : > { %4978 = vmatpush3.bf16.msra.mxu0 %v5411_v10 }
 0xa10   : > { %v4957_v57 = vpop.f32.mrb[16].mxu0 }
 0xa11   : > { %v6572_v12 = vadd.f32 %v4957_v57, %v4450_v28  ;;  %v1620_v60 = vpop.f32.mrb[17].mxu0 }
 0xa12   : > { %v6574_v4 = vadd.f32 %v4450_v28, %v1620_v60  ;;  %v4958_v18 = vpop.f32.mrb[18].mxu0 }
 0xa13   : > { %v1661_v55 = vmul.f32 0.044715, %v6572_v12  ;;  %v6577_v17 = vadd.f32 %v4958_v18, %v4450_v28  ;;  %v1623_v59 = vpop.f32.mrb[19].mxu0 }
 0xa14   : > { %v1659_v7 = vmul.f32 0.044715, %v6574_v4  ;;  %v6580_v30 = vadd.f32 %v4450_v28, %v1623_v59 }
 0xa15   : > { %v1669_v27 = vmul.f32 %v1661_v55, %v6572_v12  ;;  %v1662_v61 = vmul.f32 0.044715, %v6577_v17 }
 0xa16   : > { %v1667_v13 = vmul.f32 %v1659_v7, %v6574_v4  ;;  %v1660_v8 = vmul.f32 0.044715, %v6580_v30 }
 0xa17   : > { %v1677_v31 = vmul.f32 %v1669_v27, %v6572_v12  ;;  %v1670_v23 = vmul.f32 %v1662_v61, %v6577_v17 }
 0xa18   : > { %v1675_v6 = vmul.f32 %v1667_v13, %v6574_v4  ;;  %v1668_v0 = vmul.f32 %v1660_v8, %v6580_v30 }
 0xa19   : > { %v1685_v15 = vadd.f32 %v1677_v31, %v6572_v12  ;;  %v1678_v20 = vmul.f32 %v1670_v23, %v6577_v17  ;;  %v4961_v63 = vpop.f32.mrb[20].mxu0 }
 0xa1a   : > { %v1676_v1 = vmul.f32 %v1668_v0, %v6580_v30  ;;  %v6593_v2 = vadd.f32 %v4961_v63, %v4450_v28  ;;  %v1636_v32 = vpop.f32.mrb[21].mxu0  ;;  %v1683_v5 = vadd.f32 %v1675_v6, %v6574_v4 }
 0xa1b   : > { %v1693_v16 = vmul.f32 0.7978846, %v1685_v15  ;;  %v1686_v19 = vadd.f32 %v1678_v20, %v6577_v17  ;;  %v6597_v3 = vadd.f32 %v4450_v28, %v1636_v32  ;;  %v4962_v58 = vpop.f32.mrb[22].mxu0 }
 0xa1c   : > { %v1665_v9 = vmul.f32 0.044715, %v6593_v2  ;;  %v1648_v22 = vadd.f32 %v4962_v58, %v4450_v28  ;;  %v1639_v25 = vpop.f32.mrb[23].mxu0  ;;  %v1684_v24 = vadd.f32 %v1676_v1, %v6580_v30  ;;  %v1691_v10 = vmul.f32 0.7978846, %v1683_v5 }
 0xa1d   : > { %5476 = vtanh.f32 %v1693_v16  ;;  %v1694_v57 = vmul.f32 0.7978846, %v1686_v19  ;;  %v1663_v60 = vmul.f32 0.044715, %v6597_v3  ;;  %v1640_v18 = vadd.f32 %v4450_v28, %v1639_v25 }
 0xa1e   : > { %v1673_v55 = vmul.f32 %v1665_v9, %v6593_v2  ;;  %v1666_v59 = vmul.f32 0.044715, %v1648_v22  ;;  %v1692_v7 = vmul.f32 0.7978846, %v1684_v24  ;;  %5478 = vtanh.f32 %v1691_v10 }
 0xa1f   : > { %5480 = vtanh.f32 %v1694_v57  ;;  %v1671_v27 = vmul.f32 %v1663_v60, %v6597_v3  ;;  %v1664_v61 = vmul.f32 0.044715, %v1640_v18  ;;  %v1653_v57 = vmul.f32 0.5, %v6572_v12 }
 0xa20   : > { %v1681_v13 = vmul.f32 %v1673_v55, %v6593_v2  ;;  %v1674_v8 = vmul.f32 %v1666_v59, %v1648_v22  ;;  %5482 = vtanh.f32 %v1692_v7  ;;  %v1654_v60 = vmul.f32 0.5, %v6577_v17 }
 0xa21   : > { %v1679_v31 = vmul.f32 %v1671_v27, %v6597_v3  ;;  %v1672_v23 = vmul.f32 %v1664_v61, %v1640_v18  ;;  %v1651_v59 = vmul.f32 0.5, %v6574_v4  ;;  %v1652_v7 = vmul.f32 0.5, %v6580_v30 }
 0xa22   : > { %v1682_v6 = vmul.f32 %v1674_v8, %v1648_v22  ;;  %v1689_v0 = vadd.f32 %v1681_v13, %v6593_v2  ;;  %v1657_v4 = vmul.f32 0.5, %v6593_v2 }
 0xa23   : > { %v1680_v28 = vmul.f32 %v1672_v23, %v1640_v18  ;;  %v1687_v15 = vadd.f32 %v1679_v31, %v6597_v3 }
 0xa24   : > { %v1690_v20 = vadd.f32 %v1682_v6, %v1648_v22  ;;  %v1697_v63 = vmul.f32 0.7978846, %v1689_v0 }
 0xa25   : > { %v1688_v1 = vadd.f32 %v1680_v28, %v1640_v18  ;;  %v1695_v32 = vmul.f32 0.7978846, %v1687_v15 }
 0xa26   : > { %v1698_v5 = vmul.f32 0.7978846, %v1690_v20  ;;  %5484 = vtanh.f32 %v1697_v63  ;;  %v1658_v63 = vmul.f32 0.5, %v1648_v22 }
 0xa27   : > { %v5477_v16 = vpop.eup %5476  ;;  %v1696_v19 = vmul.f32 0.7978846, %v1688_v1  ;;  %5486 = vtanh.f32 %v1695_v32  ;;  %v1655_v1 = vmul.f32 0.5, %v6597_v3  ;;  %v1656_v32 = vmul.f32 0.5, %v1640_v18 }
 0xa28   : > { %v5479_v58 = vpop.eup %5478  ;;  %v1709_v9 = vadd.f32 1.0, %v5477_v16  ;;  %5488 = vtanh.f32 %v1698_v5 }
 0xa29   : > { %v5481_v25 = vpop.eup %5480  ;;  %v1707_v24 = vadd.f32 1.0, %v5479_v58  ;;  %5490 = vtanh.f32 %v1696_v19 }
 0xa2a   : > { %v5483_v10 = vpop.eup %5482  ;;  %v1710_v55 = vadd.f32 1.0, %v5481_v25  ;;  %v1717_v61 = vmul.f32 %v1709_v9, %v1653_v57 }
 0xa2b   : > { %v1708_v27 = vadd.f32 1.0, %v5483_v10  ;;  %v1715_v8 = vmul.f32 %v1707_v24, %v1651_v59  ;;  %v4459_v10 = vld [vmem:[%s1746_s14] ss:$0 sm:$0xff] }
 0xa2c   : > { %v1718_v13 = vmul.f32 %v1710_v55, %v1654_v60 }
 0xa2d   : > { %v1716_v31 = vmul.f32 %v1708_v27, %v1652_v7 }
 0xa2e   : > { %v1724_v23 = vpack.c.bf16 %v1718_v13, %v1717_v61 }
 0xa2f   : > { %v1723_v6 = vpack.c.bf16 %v1716_v31, %v1715_v8 }
 0xa30   : > { %v5485_v0 = vpop.eup %5484 }
 0xa31   : > { %v5487_v28 = vpop.eup %5486  ;;  %4979 = vmatprep.mubr.bf16.mxu0 %v1723_v6  ;;  %v1713_v15 = vadd.f32 1.0, %v5485_v0 }
 0xa32   : > { %v5489_v20 = vpop.eup %5488  ;;  %4980 = vmatmul.mubr.bf16.vlgmr.msra.gmra.mrb[24].mxu0 %v1724_v23  ;;  %v1711_v12 = vadd.f32 1.0, %v5487_v28 }
 0xa33   : > { %v5491_v17 = vpop.eup %5490  ;;  %v1714_v30 = vadd.f32 1.0, %v5489_v20  ;;  %v1721_v16 = vmul.f32 %v1713_v15, %v1657_v4 }
 0xa34   : > { %v1712_v5 = vadd.f32 1.0, %v5491_v17  ;;  %v1719_v58 = vmul.f32 %v1711_v12, %v1655_v1 }
 0xa35   : > { %v1722_v19 = vmul.f32 %v1714_v30, %v1658_v63 }
 0xa36   : > { %v1720_v9 = vmul.f32 %v1712_v5, %v1656_v32 }
 0xa37   : > { %v1726_v25 = vpack.c.bf16 %v1722_v19, %v1721_v16 }
 0xa38   : > { %v1725_v24 = vpack.c.bf16 %v1720_v9, %v1719_v58 }
 0xa3a   : > { %4983 = vmatprep.mubr.bf16.mxu0 %v1725_v24 }
 0xa3b   : > { %4984 = vmatmul.mubr.bf16.gmra.mrb[28].mxu0 %v1726_v25 }
 0xb05   : > { %v4981_v2 = vpop.f32.mrb[24].mxu0 }
 0xb06   : > { %v1845_v22 = vadd.f32 %v4981_v2, %v4459_v10  ;;  %v1836_v57 = vpop.f32.mrb[25].mxu0 }
 0xb07   : > { %v1837_v60 = vadd.f32 %v4459_v10, %v1836_v57  ;;  %v4982_v3 = vpop.f32.mrb[26].mxu0 }
 0xb08   : > { %v1869_v55 = vadd.f32 %v1845_v22, %v6453_v26   ;;  %v1848_v18 = vadd.f32 %v4982_v3, %v4459_v10  ;;  %v1839_v59 = vpop.f32.mrb[27].mxu0 }
 0xb09   : > { %v1867_v7 = vadd.f32 %v1837_v60, %v6450_v11   ;;  %v1840_v27 = vadd.f32 %v4459_v10, %v1839_v59 }
 0xb0a   : > { %v1870_v8 = vadd.f32 %v1848_v18, %v6462_v54  }
 0xb0b   : > { %v1868_v31 = vadd.f32 %v1840_v27, %v6456_v14   ;;  %v7321_v60 = vmov %v1867_v7  ;;  %v1878_v14 = vsel (%p348_p0), %vm364_vm1, %v1867_v7, 0.0  ;;  %v5494_v27 = vld [vmem:[%s7251_s21] sm:$0xff] (%p348_p0)  }
 0xb0c   : > { %v7318_v18 = vmov %v1870_v8  ;;  %1879 = vadd.xlane.f32.xlu0 (%p348_p0), %v1878_v14 }
 0xb0d   : > { %v7320_v2 = vmov %v1868_v31 }
 0xb0e   : > { %v4985_v61 = vpop.f32.mrb[28].mxu0 }
 0xb0f   : > { %v1861_v13 = vadd.f32 %v4985_v61, %v4459_v10  ;;  %v1852_v23 = vpop.f32.mrb[29].mxu0 }
 0xb10   : > { %v1853_v6 = vadd.f32 %v4459_v10, %v1852_v23  ;;  %v4986_v0 = vpop.f32.mrb[30].mxu0  ;;  %350 = sbr.rel (!%p348_p0) target bundleno = 272 (0x110), region = 147 }
 0xb11   : > { %v6623_v13 = vadd.f32 %v1861_v13, %v6480_v56   ;;  %v1864_v15 = vadd.f32 %v4986_v0, %v4459_v10  ;;  %v1855_v20 = vpop.f32.mrb[31].mxu0 }
 0xb12   : > { %v1871_v26 = vadd.f32 %v1853_v6, %v6470_v62   ;;  %v1856_v12 = vadd.f32 %v4459_v10, %v1855_v20  ;;  %v1884_v62 = vsel (%p348_p0), %vm364_vm1, %v1869_v55, 0.0 }
 0xb13   : > { %v7312_v28 = vmov %v6623_v13  ;;  %v6627_v19 = vadd.f32 %v1864_v15, %v6476_v29   ;;  %v1887_v29 = vsel (%p348_p0), %vm364_vm1, %v1870_v8, 0.0  ;;  %1885 = vadd.xlane.f32.xlu1 (%p348_p0), %v1884_v62 }
 0xb14   : > { %v1872_v54 = vadd.f32 %v1856_v12, %v6474_v21   ;;  %v7315_v13 = vmov %v7312_v28  ;;  %v7317_v61 = vmov %v1871_v26  ;;  %v7319_v12 = vmov %v1869_v55 }
 0xb15   : > { %v7313_v11 = vmov %v6627_v19  ;;  %v1881_v21 = vsel (%p348_p0), %vm364_vm1, %v1868_v31, 0.0  ;;  %v1890_v56 = vsel (%p348_p0), %vm364_vm1, %v1871_v26, 0.0  ;;  %v1896_v4 = vsel (%p348_p0), %vm364_vm1, %v7312_v28, 0.0 }
 0xb16   : > { %v7314_v19 = vmov %v7313_v11  ;;  %v7316_v3 = vmov %v1872_v54  ;;  %v1893_v17 = vsel (%p348_p0), %vm364_vm1, %v1872_v54, 0.0  ;;  %v1899_v63 = vsel (%p348_p0), %vm364_vm1, %v7313_v11, 0.0  ;;  %1882 = vadd.xlane.f32.xlu0 (%p348_p0), %v1881_v21 }
 0xb17   :  { %1888 = vadd.xlane.f32.xlu1 %v1887_v29 }
 0xb1a   :  { %1891 = vadd.xlane.f32.xlu0 %v1890_v56 }
 0xb1b   :  { %1894 = vadd.xlane.f32.xlu1 %v1893_v17 }
 0xb1e   :  { %1897 = vadd.xlane.f32.xlu0 %v1896_v4 }
 0xb1f   :  { %1900 = vadd.xlane.f32.xlu1 %v1899_v63 }
 0xb99   :  { %v1880_v33 = vpop.xlane.xlu0 %1879 }
 0xb9a   :  { %v1903_v35 = vmul.f32 0.03125, %v1880_v33 }
 0xb9c   :  { %v6661_v37 = vsub.f32 %v1867_v7, %v1903_v35  ;;  %v5492_v7 = vld [vmem:[%s7250_s20] sm:$0xff]  }
 0xb9d   :  { %4995 = vmatprep.mubr.msk.bf16.mxu0 %vm235_vm0, %v5492_v7 }
 0xb9e   :  { %v1919_v43 = vmul.f32 %v6661_v37, %v6661_v37 }
 0xba0   :  { %v1886_v34 = vpop.xlane.xlu1 %1885  ;;  %v1927_v47 = vsel %vm364_vm1, %v1919_v43, 0.0 }
 0xba1   :  { %v1905_v36 = vmul.f32 0.03125, %v1886_v34  ;;  %1928 = vadd.xlane.f32.xlu0 %v1927_v47  ;;  %v4469_v47 = vld [vmem:[%s7249_s16] ss:$0 sm:$0xff] }
 0xba3   :  { %v6663_v38 = vsub.f32 %v1869_v55, %v1905_v36  ;;  %v1883_v39 = vpop.xlane.xlu0 %1882 }
 0xba4   :  { %v1889_v40 = vpop.xlane.xlu1 %1888  ;;  %v1904_v41 = vmul.f32 0.03125, %v1883_v39  ;;  %v4468_v39 = vld [vmem:[%s7248_s15] ss:$0 sm:$0xff] }
 0xba5   :  { %v1906_v42 = vmul.f32 0.03125, %v1889_v40  ;;  %v1921_v44 = vmul.f32 %v6663_v38, %v6663_v38 }
 0xba6   :  { %v6669_v45 = vsub.f32 %v1868_v31, %v1904_v41 }
 0xba7   :  { %v6671_v46 = vsub.f32 %v1870_v8, %v1906_v42  ;;  %v1892_v48 = vpop.xlane.xlu0 %1891  ;;  %v1933_v50 = vsel %vm364_vm1, %v1921_v44, 0.0  ;;  %v5642_v8 = vmov 0.0  }
 0xba8   :  { %v1895_v49 = vpop.xlane.xlu1 %1894  ;;  %v1907_v51 = vmul.f32 0.03125, %v1892_v48  ;;  %v1920_v53 = vmul.f32 %v6669_v45, %v6669_v45  ;;  %1934 = vadd.xlane.f32.xlu0 %v1933_v50  ;;  %4999 = vmatprep.subr.bf16.mxu1 %v5642_v8 }
 0xba9   :  { %v1908_v52 = vmul.f32 0.03125, %v1895_v49  ;;  %v1922_v30 = vmul.f32 %v6671_v46, %v6671_v46  ;;  %5000 = vmatpush3.bf16.msra.mxu1 %v5494_v27  ;;  %5003 = vmatprep.mubr.msk.bf16.mxu1 %vm5643_vm2, %v5642_v8 }
 0xbaa   :  { %v6679_v1 = vsub.f32 %v1871_v26, %v1907_v51  ;;  %v1930_v5 = vsel %vm364_vm1, %v1920_v53, 0.0  ;;  %5001 = vmatprep.subr.bf16.mxu1 %v5642_v8 }
 0xbab   :  { %v6681_v32 = vsub.f32 %v1872_v54, %v1908_v52  ;;  %1931 = vadd.xlane.f32.xlu1 %v1930_v5  ;;  %v1898_v16 = vpop.xlane.xlu0 %1897  ;;  %v1936_v58 = vsel %vm364_vm1, %v1922_v30, 0.0 }
 0xbac   :  { %v1901_v19 = vpop.xlane.xlu1 %1900  ;;  %v1909_v9 = vmul.f32 0.03125, %v1898_v16  ;;  %v1923_v24 = vmul.f32 %v6679_v1, %v6679_v1 }
 0xbad   :  { %v1910_v25 = vmul.f32 0.03125, %v1901_v19  ;;  %v1924_v10 = vmul.f32 %v6681_v32, %v6681_v32 }
 0xbae   :  { %v6690_v2 = vsub.f32 %v7312_v28, %v1909_v9  ;;  %v1939_v57 = vsel %vm364_vm1, %v1923_v24, 0.0 }
 0xbaf   :  { %v6693_v22 = vsub.f32 %v7313_v11, %v1910_v25  ;;  %1937 = vadd.xlane.f32.xlu1 %v1936_v58  ;;  %1940 = vadd.xlane.f32.xlu0 %v1939_v57  ;;  %v1942_v60 = vsel %vm364_vm1, %v1924_v10, 0.0 }
 0xbb0   :  { %v1925_v3 = vmul.f32 %v6690_v2, %v6690_v2 }
 0xbb1   :  { %v1926_v55 = vmul.f32 %v6693_v22, %v6693_v22 }
 0xbb2   :  { %v1945_v18 = vsel %vm364_vm1, %v1925_v3, 0.0 }
 0xbb3   :  { %1943 = vadd.xlane.f32.xlu1 %v1942_v60  ;;  %1946 = vadd.xlane.f32.xlu0 %v1945_v18  ;;  %v1948_v59 = vsel %vm364_vm1, %v1926_v55, 0.0 }
 0xbb7   :  { %1949 = vadd.xlane.f32.xlu1 %v1948_v59 }
 0xc2e   :  { %v1929_v31 = vpop.xlane.xlu0 %1928 }
 0xc2f   :  { %v1951_v61 = vmul.f32 0.03125, %v1929_v31 }
 0xc31   :  { %v1959_v13 = vadd.f32 1e-06, %v1951_v61  ;;  %v5496_v61 = vld [vmem:[%s7251_s21 + $0x8] sm:$0xff]  }
 0xc32   :  { %5002 = vmatpush3.bf16.msra.mxu1 %v5496_v61 }
 0xc33   :  { %5550 = vrsqrt.f32 %v1959_v13  ;;  %5007 = vmatprep.subr.bf16.mxu1 %v5642_v8  ;;  %v5497_v13 = vld [vmem:[%s7251_s21 + $0x28] sm:$0xff]  }
 0xc35   :  { %v1935_v6 = vpop.xlane.xlu0 %1934 }
 0xc36   :  { %v1953_v28 = vmul.f32 0.03125, %v1935_v6 }
 0xc38   :  { %v1932_v23 = vpop.xlane.xlu1 %1931  ;;  %v1961_v20 = vadd.f32 1e-06, %v1953_v28 }
 0xc39   :  { %v1952_v0 = vmul.f32 0.03125, %v1932_v23  ;;  %v5644_v23 = vmov 1983009808  }
 0xc3a   :  { %v2090_v6 = vunpack.c.l.s4 %v5644_v23 }
 0xc3b   :  { %v1960_v15 = vadd.f32 1e-06, %v1952_v0  ;;  %v2092_v0 = vlaneseq }
 0xc3c   :  { %v1938_v26 = vpop.xlane.xlu1 %1937  ;;  %v1941_v12 = vpop.xlane.xlu0 %1940  ;;  %v2091_v28 = vunpack.c.0.s8 %v2090_v6 }
 0xc3d   :  { %5552 = vrsqrt.f32 %v1960_v15  ;;  %v1954_v11 = vmul.f32 0.03125, %v1938_v26  ;;  %v1955_v54 = vmul.f32 0.03125, %v1941_v12  ;;  %v5551_v4 = vpop.eup %5550  ;;  %v2093_v15 = vshrl.u32 %v2092_v0, 7  ;;  %v5522_v0 = vld [vmem:[%s7255_s25] sm:$0xff]  }
 0xc3e   :  { %5554 = vrsqrt.f32 %v1961_v20  ;;  %v1975_v35 = vmul.f32 %v5551_v4, %v6661_v37 }
 0xc3f   :  { %v1962_v14 = vadd.f32 1e-06, %v1954_v11  ;;  %v1963_v62 = vadd.f32 1e-06, %v1955_v54  ;;  %v6747_v20 = vsub.s32 %v2091_v28, %v2093_v15  ;;  %v5523_v28 = vld [vmem:[%s7255_s25 + $0x8] sm:$0xff]   ;;  %v5524_v15 = vld [vmem:[%s7255_s25 + $0x10] sm:$0xff]  }
 0xc40   :  { %v1944_v21 = vpop.xlane.xlu1 %1943  ;;  %v1947_v29 = vpop.xlane.xlu0 %1946  ;;  %v1989_v44 = vmul.f32 %v4468_v39, %v1975_v35 }
 0xc41   :  { %5556 = vrsqrt.f32 %v1962_v14  ;;  %v1956_v56 = vmul.f32 0.03125, %v1944_v21  ;;  %v1957_v17 = vmul.f32 0.03125, %v1947_v29  ;;  %v5498_v21 = vld [vmem:[%s7251_s21 + $0x10] sm:$0xff]  }
 0xc42   :  { %5558 = vrsqrt.f32 %v1963_v62  ;;  %v2003_v51 = vadd.f32 %v4469_v47, %v1989_v44 }
 0xc43   :  { %v1964_v63 = vadd.f32 1e-06, %v1956_v56  ;;  %v1965_v33 = vadd.f32 1e-06, %v1957_v17  ;;  %v5499_v17 = vld [vmem:[%s7251_s21 + $0x40] sm:$0xff]  }
 0xc44   :  { %v1950_v34 = vpop.xlane.xlu1 %1949 }
 0xc45   :  { %5560 = vrsqrt.f32 %v1964_v63  ;;  %v1958_v36 = vmul.f32 0.03125, %v1950_v34  ;;  %v5500_v63 = vld [vmem:[%s7251_s21 + $0x18] sm:$0xff]   ;;  %v5501_v34 = vld [vmem:[%s7251_s21 + $0x48] sm:$0xff]  }
 0xc46   :  { %5562 = vrsqrt.f32 %v1965_v33 }
 0xc47   :  { %v5553_v40 = vpop.eup %5552  ;;  %v1966_v41 = vadd.f32 1e-06, %v1958_v36  ;;  %v5502_v36 = vld [vmem:[%s7251_s21 + $0x30] sm:$0xff]  }
 0xc48   :  { %v5555_v42 = vpop.eup %5554  ;;  %v1976_v43 = vmul.f32 %v5553_v40, %v6669_v45  ;;  %v5503_v40 = vld [vmem:[%s7251_s21 + $0x60] sm:$0xff]  }
 0xc49   :  { %5564 = vrsqrt.f32 %v1966_v41  ;;  %v1977_v37 = vmul.f32 %v5555_v42, %v6663_v38 }
 0xc4a   :  { %v1990_v48 = vmul.f32 %v4468_v39, %v1976_v43  ;;  %v5504_v43 = vld [vmem:[%s7251_s21 + $0x38] sm:$0xff]  }
 0xc4b   :  { %v5557_v49 = vpop.eup %5556  ;;  %v1991_v30 = vmul.f32 %v4468_v39, %v1977_v37 }
 0xc4c   :  { %v5559_v50 = vpop.eup %5558  ;;  %v2004_v52 = vadd.f32 %v4469_v47, %v1990_v48  ;;  %v1978_v53 = vmul.f32 %v5557_v49, %v6671_v46  ;;  %v5506_v48 = vld [vmem:[%s7251_s21 + $0x50] sm:$0xff]  }
 0xc4d   :  { %v1979_v5 = vmul.f32 %v5559_v50, %v6679_v1  ;;  %v2005_v9 = vadd.f32 %v4469_v47, %v1991_v30  ;;  %v5507_v50 = vld [vmem:[%s7251_s21 + $0x80] sm:$0xff]   ;;  %v5509_v30 = vld [vmem:[%s7251_s21 + $0x88] sm:$0xff]  }
 0xc4e   :  { %v2015_v16 = vpack.c.bf16 %v2004_v52, %v2003_v51  ;;  %v1992_v45 = vmul.f32 %v4468_v39, %v1978_v53  ;;  %v5508_v52 = vld [vmem:[%s7251_s21 + $0x58] sm:$0xff]  }
 0xc4f   :  { %v5561_v19 = vpop.eup %5560  ;;  %v1993_v38 = vmul.f32 %v4468_v39, %v1979_v5 }
 0xc50   :  { %v5563_v58 = vpop.eup %5562  ;;  %4987 = vmatprep.subr.bf16.mxu0 %v2015_v16  ;;  %v2006_v25 = vadd.f32 %v4469_v47, %v1992_v45  ;;  %v1980_v24 = vmul.f32 %v5561_v19, %v6681_v32  ;;  %v5511_v19 = vld [vmem:[%s7251_s21 + $0xa0] sm:$0xff]  }
 0xc51   :  { %4988 = vmatpush3.bf16.msra.mxu0 %v2015_v16  ;;  %v1981_v10 = vmul.f32 %v5563_v58, %v6690_v2  ;;  %v2007_v46 = vadd.f32 %v4469_v47, %v1993_v38  ;;  %v5493_v2 = vld [vmem:[%s7250_s20 + $0x8] sm:$0x3f]   ;;  %v5510_v16 = vld [vmem:[%s7251_s21 + $0x70] sm:$0xff]  }
 0xc52   :  { %v2016_v57 = vpack.c.bf16 %v2006_v25, %v2005_v9  ;;  %v1994_v60 = vmul.f32 %v4468_v39, %v1980_v24  ;;  %v5512_v25 = vld [vmem:[%s7251_s21 + $0x78] sm:$0xff]   ;;  %v5513_v38 = vld [vmem:[%s7251_s21 + $0xa8] sm:$0xff]  }
 0xc53   :  { %v5565_v3 = vpop.eup %5564  ;;  %v1995_v18 = vmul.f32 %v4468_v39, %v1981_v10 }
 0xc54   :  { %4989 = vmatprep.subr.bf16.mxu0 %v2016_v57  ;;  %v2008_v55 = vadd.f32 %v4469_v47, %v1994_v60  ;;  %v1982_v1 = vmul.f32 %v5565_v3, %v6693_v22  ;;  %v5495_v22 = vld [vmem:[%s7251_s21 + $0x20] sm:$0xff]  }
 0xc55   :  { %4990 = vmatpush3.bf16.msra.mxu0 %v2016_v57  ;;  %v2009_v27 = vadd.f32 %v4469_v47, %v1995_v18  ;;  %v5514_v57 = vld [vmem:[%s7251_s21 + $0x90] sm:$0xff]   ;;  %v5515_v3 = vld [vmem:[%s7251_s21 + $0xc0] sm:$0xff]   ;;  %v5517_v18 = vld [vmem:[%s7251_s21 + $0xc8] sm:$0xff]  }
 0xc56   :  { %v2017_v59 = vpack.c.bf16 %v2008_v55, %v2007_v46  ;;  %v1996_v7 = vmul.f32 %v4468_v39, %v1982_v1  ;;  %v5516_v55 = vld [vmem:[%s7251_s21 + $0x98] sm:$0xff]  }
 0xc58   :  { %4991 = vmatprep.subr.bf16.mxu0 %v2017_v59  ;;  %v2010_v31 = vadd.f32 %v4469_v47, %v1996_v7  ;;  %v5505_v47 = vld [vmem:[%s7251_s21 + $0x68] sm:$0xff]   ;;  %v5518_v7 = vld [vmem:[%s7251_s21 + $0xb0] sm:$0xff]  }
 0xc59   :  { %4992 = vmatpush3.bf16.msra.mxu0 %v2017_v59 }
 0xc5a   :  { %v2018_v32 = vpack.c.bf16 %v2010_v31, %v2009_v27 }
 0xc5c   :  { %4993 = vmatprep.subr.bf16.mxu0 %v2018_v32 }
 0xc5d   :  { %4994 = vmatpush3.bf16.msra.mxu0 %v2018_v32  ;;  %v5519_v32 = vld [vmem:[%s7251_s21 + $0xb8] sm:$0xff]  }
 0xc5e   :  { %5015 = vmatprep.subr.bf16.mxu0 %v5642_v8 }
 0xc60   :  { %4996 = vmatmul.mubr.msk.bf16.vlgmr.msra.gmra.mrb[0].mxu0 %vm235_vm0, %v5493_v2 }
 0xc61   :  { %5016 = vmatpush3.bf16.msra.mxu0 %v5495_v22  ;;  %5019 = vmatprep.mubr.msk.bf16.mxu0 %vm5643_vm2, %v5642_v8  ;;  %v5520_v22 = vld [vmem:[%s7251_s21 + $0xd0] sm:$0xff]  }
 0xc62   :  { %5017 = vmatprep.subr.bf16.mxu0 %v5642_v8 }
 0xc65   :  { %5018 = vmatpush3.bf16.msra.mxu0 %v5497_v13  ;;  %v5521_v13 = vld [vmem:[%s7251_s21 + $0xd8] sm:$0xff]  }
 0xc66   :  { %5031 = vmatprep.subr.bf16.mxu0 %v5642_v8 }
 0xd33   :  { %v6749_v26 = vpop.f32.mrb[0].mxu0 }
 0xd34   :  { %v2069_v12 = vpop.f32.mrb[1].mxu0  ;;  %v2129_v5 = vrot.slane %v6749_v26, %v6747_v20  ;;  %v2122_v58 = vcombine.high %v6749_v26, %v6749_v26  ;;  %v5526_v26 = vld [vmem:[%s7255_s25 + $0x18] sm:$0xff]  }
 0xd35   :  { %v2088_v11 = vcombine.high %v2069_v12, %v2069_v12  ;;  %v2095_v54 = vrot.slane %v2069_v12, %v6747_v20  ;;  %v6752_v14 = vpop.f32.mrb[2].mxu0  ;;  %v4474_v12 = vld [vmem:[%s7252_s22] ss:$0 sm:$0xff] }
 0xd36   :  { %v2072_v62 = vpop.f32.mrb[3].mxu0  ;;  %v2169_v9 = vpack.c.bf16 %v2129_v5, %v2129_v5  ;;  %v2136_v10 = vrot.slane %v2122_v58, %v6747_v20  ;;  %v2137_v1 = vcombine.high %v2129_v5, %v2129_v5  ;;  %v2145_v59 = vrot.slane %v6752_v14, %v6747_v20  ;;  %v4476_v14 = vld [vmem:[%s7252_s22 + $0x2] ss:$0 sm:$0xff]  ;;  %v5527_v5 = vld [vmem:[%s7255_s25 + $0x28] sm:$0xff]  }
 0xd37   :  { %v2102_v29 = vrot.slane %v2088_v11, %v6747_v20  ;;  %v2161_v56 = vpack.c.bf16 %v2095_v54, %v2095_v54  ;;  %v2103_v33 = vcombine.high %v2095_v54, %v2095_v54  ;;  %v2112_v35 = vrot.slane %v2072_v62, %v6747_v20  ;;  %v4530_v54 = vld [vmem:[%s7253_s23] ss:$0 sm:$0xff] }
 0xd38   :  { %v2105_v41 = vcombine.high %v2072_v62, %v2072_v62  ;;  %v2171_v46 = vpack.c.bf16 %v2136_v10, %v2136_v10  ;;  %v2170_v27 = vpack.c.bf16 %v2137_v1, %v2137_v1  ;;  %v2173_v31 = vpack.c.bf16 %v2145_v59, %v2145_v59 }
 0xd39   :  { %v2163_v4 = vpack.c.bf16 %v2102_v29, %v2102_v29  ;;  %5004 = vmatmul.mubr.msk.bf16.vlgmr.msra.gmra.mrb[0].mxu1 %vm364_vm1, %v2161_v56  ;;  %v2162_v39 = vpack.c.bf16 %v2103_v33, %v2103_v33  ;;  %v2165_v42 = vpack.c.bf16 %v2112_v35, %v2112_v35  ;;  %v2104_v44 = vcombine.high %v2102_v29, %v2102_v29  ;;  %v4544_v29 = vld [vmem:[%s7254_s24] ss:$0 sm:$0xff] }
 0xd3a   :  { %5008 = vmatpush3.bf16.msra.mxu1 %v5498_v21  ;;  %5011 = vmatprep.mubr.msk.bf16.mxu1 %vm5643_vm2, %v5642_v8  ;;  %v2119_v37 = vrot.slane %v2105_v41, %v6747_v20  ;;  %v2120_v53 = vcombine.high %v2112_v35, %v2112_v35  ;;  %v2138_v2 = vcombine.high %v2136_v10, %v2136_v10  ;;  %v4532_v35 = vld [vmem:[%s7253_s23 + $0x2] ss:$0 sm:$0xff]  ;;  %v4475_v41 = vld [vmem:[%s7252_s22 + $0x1] ss:$0 sm:$0xff] }
 0xd3b   :  { %5020 = vmatmul.mubr.msk.bf16.vlgmr.msra.gmra.mrb[4].mxu0 %vm364_vm1, %v2163_v4  ;;  %5009 = vmatprep.subr.bf16.mxu1 %v5642_v8  ;;  %v2164_v49 = vpack.c.bf16 %v2104_v44, %v2104_v44  ;;  %v2146_v23 = vcombine.high %v2145_v59, %v2145_v59 }
 0xd3c   :  { %5032 = vmatpush3.bf16.msra.mxu0 %v5499_v17  ;;  %5035 = vmatprep.mubr.msk.bf16.mxu0 %vm5643_vm2, %v5642_v8  ;;  %v2167_v51 = vpack.c.bf16 %v2119_v37, %v2119_v37  ;;  %v2166_v45 = vpack.c.bf16 %v2120_v53, %v2120_v53  ;;  %v2121_v24 = vcombine.high %v2119_v37, %v2119_v37 }
 0xd3d   :  { %5033 = vmatprep.subr.bf16.mxu0 %v5642_v8  ;;  %v2172_v61 = vpack.c.bf16 %v2138_v2, %v2138_v2  ;;  %v2174_v6 = vpack.c.bf16 %v2146_v23, %v2146_v23  ;;  %v4547_v2 = vld [vmem:[%s7254_s24 + $0x3] ss:$0 sm:$0xff]  ;;  %v5531_v23 = vld [vmem:[%s7255_s25 + $0x48] sm:$0xff]  }
 0xd3e   :  { %5010 = vmatpush3.bf16.msra.mxu1 %v5500_v63  ;;  %v2168_v60 = vpack.c.bf16 %v2121_v24, %v2121_v24 }
 0xd3f   :  { %5023 = vmatprep.subr.bf16.mxu1 %v5642_v8 }
 0xd40   :  { %5034 = vmatpush3.bf16.msra.mxu0 %v5501_v34 }
 0xd41   :  { %5012 = vmatmul.mubr.msk.bf16.vlgmr.msra.gmra.mrb[4].mxu1 %vm364_vm1, %v2162_v39  ;;  %5047 = vmatprep.subr.bf16.mxu0 %v5642_v8 }
 0xd42   :  { %5024 = vmatpush3.bf16.msra.mxu1 %v5502_v36  ;;  %5027 = vmatprep.mubr.msk.bf16.mxu1 %vm5643_vm2, %v5642_v8 }
 0xd43   :  { %5036 = vmatmul.mubr.msk.bf16.vlgmr.msra.gmra.mrb[8].mxu0 %vm364_vm1, %v2165_v42  ;;  %5025 = vmatprep.subr.bf16.mxu1 %v5642_v8  ;;  %v5525_v42 = vld [vmem:[%s7255_s25 + $0x20] sm:$0xff]  }
 0xd44   :  { %5048 = vmatpush3.bf16.msra.mxu0 %v5503_v40  ;;  %5051 = vmatprep.mubr.msk.bf16.mxu0 %vm5643_vm2, %v5642_v8 }
 0xd45   :  { %5049 = vmatprep.subr.bf16.mxu0 %v5642_v8 }
 0xd46   :  { %5026 = vmatpush3.bf16.msra.mxu1 %v5504_v43 }
 0xd47   :  { %5039 = vmatprep.subr.bf16.mxu1 %v5642_v8 }
 0xd48   :  { %5050 = vmatpush3.bf16.msra.mxu0 %v5505_v47  ;;  %v4546_v47 = vld [vmem:[%s7254_s24 + $0x2] ss:$0 sm:$0xff] }
 0xd49   :  { %5028 = vmatmul.mubr.msk.bf16.vlgmr.msra.gmra.mrb[8].mxu1 %vm364_vm1, %v2164_v49  ;;  %5063 = vmatprep.subr.bf16.mxu0 %v5642_v8  ;;  %v4478_v49 = vld [vmem:[%s7252_s22 + $0x4] ss:$0 sm:$0xff] }
 0xd4a   :  { %5040 = vmatpush3.bf16.msra.mxu1 %v5506_v48  ;;  %5043 = vmatprep.mubr.msk.bf16.mxu1 %vm5643_vm2, %v5642_v8  ;;  %v4531_v48 = vld [vmem:[%s7253_s23 + $0x1] ss:$0 sm:$0xff] }
 0xd4b   :  { %5052 = vmatmul.mubr.msk.bf16.vlgmr.msra.gmra.mrb[12].mxu0 %vm364_vm1, %v2167_v51  ;;  %5041 = vmatprep.subr.bf16.mxu1 %v5642_v8 }
 0xd4c   :  { %5064 = vmatpush3.bf16.msra.mxu0 %v5507_v50  ;;  %5067 = vmatprep.mubr.msk.bf16.mxu0 %vm5643_vm2, %v5642_v8 }
 0xd4d   :  { %5065 = vmatprep.subr.bf16.mxu0 %v5642_v8 }
 0xd4e   :  { %5042 = vmatpush3.bf16.msra.mxu1 %v5508_v52  ;;  %v4545_v52 = vld [vmem:[%s7254_s24 + $0x1] ss:$0 sm:$0xff] }
 0xd4f   :  { %5055 = vmatprep.subr.bf16.mxu1 %v5642_v8 }
 0xd50   :  { %5066 = vmatpush3.bf16.msra.mxu0 %v5509_v30 }
 0xd51   :  { %5044 = vmatmul.mubr.msk.bf16.vlgmr.msra.gmra.mrb[12].mxu1 %vm364_vm1, %v2166_v45  ;;  %5079 = vmatprep.subr.bf16.mxu0 %v5642_v8 }
 0xd52   :  { %5056 = vmatpush3.bf16.msra.mxu1 %v5510_v16  ;;  %5059 = vmatprep.mubr.msk.bf16.mxu1 %vm5643_vm2, %v5642_v8 }
 0xd53   :  { %5068 = vmatmul.mubr.msk.bf16.vlgmr.msra.gmra.mrb[16].mxu0 %vm364_vm1, %v2169_v9  ;;  %5057 = vmatprep.subr.bf16.mxu1 %v5642_v8 }
 0xd54   :  { %5080 = vmatpush3.bf16.msra.mxu0 %v5511_v19  ;;  %5083 = vmatprep.mubr.msk.bf16.mxu0 %vm5643_vm2, %v5642_v8 }
 0xd55   :  { %5081 = vmatprep.subr.bf16.mxu0 %v5642_v8 }
 0xd56   :  { %5058 = vmatpush3.bf16.msra.mxu1 %v5512_v25  ;;  %v4534_v25 = vld [vmem:[%s7253_s23 + $0x4] ss:$0 sm:$0xff] }
 0xd57   :  { %5071 = vmatprep.subr.bf16.mxu1 %v5642_v8 }
 0xd58   :  { %5082 = vmatpush3.bf16.msra.mxu0 %v5513_v38 }
 0xd59   :  { %5060 = vmatmul.mubr.msk.bf16.vlgmr.msra.gmra.mrb[16].mxu1 %vm364_vm1, %v2168_v60  ;;  %5095 = vmatprep.subr.bf16.mxu0 %v5642_v8  ;;  %v5528_v60 = vld [vmem:[%s7255_s25 + $0x30] sm:$0xff]  }
 0xd5a   :  { %5072 = vmatpush3.bf16.msra.mxu1 %v5514_v57  ;;  %5075 = vmatprep.mubr.msk.bf16.mxu1 %vm5643_vm2, %v5642_v8  ;;  %v4477_v57 = vld [vmem:[%s7252_s22 + $0x3] ss:$0 sm:$0xff] }
 0xd5b   :  { %5084 = vmatmul.mubr.msk.bf16.vlgmr.msra.gmra.mrb[20].mxu0 %vm364_vm1, %v2171_v46  ;;  %5073 = vmatprep.subr.bf16.mxu1 %v5642_v8 }
 0xd5c   :  { %5096 = vmatpush3.bf16.msra.mxu0 %v5515_v3  ;;  %5099 = vmatprep.mubr.msk.bf16.mxu0 %vm5643_vm2, %v5642_v8  ;;  %v5529_v3 = vld [vmem:[%s7255_s25 + $0x40] sm:$0xff]  }
 0xd5d   :  { %5097 = vmatprep.subr.bf16.mxu0 %v5642_v8 }
 0xd5e   :  { %5074 = vmatpush3.bf16.msra.mxu1 %v5516_v55 }
 0xd5f   :  { %5087 = vmatprep.subr.bf16.mxu1 %v5642_v8 }
 0xd60   :  { %5098 = vmatpush3.bf16.msra.mxu0 %v5517_v18  ;;  %v4548_v18 = vld [vmem:[%s7254_s24 + $0x4] ss:$0 sm:$0xff] }
 0xd61   :  { %5076 = vmatmul.mubr.msk.bf16.vlgmr.msra.gmra.mrb[20].mxu1 %vm364_vm1, %v2170_v27  ;;  %5111 = vmatprep.subr.bf16.mxu0 %v5642_v8  ;;  %v4480_v27 = vld [vmem:[%s7252_s22 + $0x6] ss:$0 sm:$0xff] }
 0xd62   :  { %5088 = vmatpush3.bf16.msra.mxu1 %v5518_v7  ;;  %5091 = vmatprep.mubr.msk.bf16.mxu1 %vm5643_vm2, %v5642_v8  ;;  %v4533_v7 = vld [vmem:[%s7253_s23 + $0x3] ss:$0 sm:$0xff] }
 0xd63   :  { %5100 = vmatmul.mubr.msk.bf16.vlgmr.msra.gmra.mrb[24].mxu0 %vm364_vm1, %v2173_v31  ;;  %5089 = vmatprep.subr.bf16.mxu1 %v5642_v8 }
 0xd64   :  { %5115 = vmatprep.mubr.msk.bf16.mxu0 %vm5643_vm2, %v5642_v8  ;;  %5112 = vmatpush3.bf16.msra.mxu0 %v5522_v0 }
 0xd65   :  { %5113 = vmatprep.subr.bf16.mxu0 %v5642_v8 }
 0xd66   :  { %5090 = vmatpush3.bf16.msra.mxu1 %v5519_v32 }
 0xd67   :  { %5103 = vmatprep.subr.bf16.mxu1 %v5642_v8 }
 0xd68   :  { %5114 = vmatpush3.bf16.msra.mxu0 %v5523_v28 }
 0xd69   :  { %5092 = vmatmul.mubr.msk.bf16.vlgmr.msra.gmra.mrb[24].mxu1 %vm364_vm1, %v2172_v61  ;;  %5127 = vmatprep.subr.bf16.mxu0 %v5642_v8 }
 0xd6a   :  { %5104 = vmatpush3.bf16.msra.mxu1 %v5520_v22  ;;  %5107 = vmatprep.mubr.msk.bf16.mxu1 %vm5643_vm2, %v5642_v8 }
 0xd6b   :  { %5105 = vmatprep.subr.bf16.mxu1 %v5642_v8 }
 0xd6e   :  { %5106 = vmatpush3.bf16.msra.mxu1 %v5521_v13  ;;  %v5530_v13 = vld [vmem:[%s7255_s25 + $0x38] sm:$0xff]  }
 0xd6f   :  { %5119 = vmatprep.subr.bf16.mxu1 %v5642_v8 }
 0xd71   :  { %5108 = vmatmul.mubr.msk.bf16.vlgmr.msra.gmra.mrb[28].mxu1 %vm364_vm1, %v2174_v6 }
 0xd72   :  { %5123 = vmatprep.mubr.msk.bf16.mxu1 %vm5643_vm2, %v5642_v8  ;;  %5120 = vmatpush3.bf16.msra.mxu1 %v5524_v15 }
 0xd73   :  { %5121 = vmatprep.subr.bf16.mxu1 %v5642_v8 }
 0xd76   :  { %5122 = vmatpush3.bf16.msra.mxu1 %v5526_v26 }
 0xd77   :  { %5135 = vmatprep.subr.bf16.mxu1 %v5642_v8 }
 0xe0c   :  { %v2378_v11 = vpop.f32.mrb[0].mxu1 }
 0xe0d   :  { %v2379_v62 = vadd.f32 %v4474_v12, %v2378_v11  ;;  %v5005_v21 = vpop.f32.mrb[1].mxu1  ;;  %v4536_v12 = vld [vmem:[%s7253_s23 + $0x6] ss:$0 sm:$0xff] }
 0xe0e   :  { %v2381_v56 = vpop.f32.mrb[2].mxu1  ;;  %v2488_v17 = vpop.f32.mrb[4].mxu0  ;;  %v5532_v21 = vld [vmem:[%s7255_s25 + $0x50] sm:$0xff]  }
 0xe0f   :  { %v3197_v4 = vmul.f32 %v4530_v54, %v2379_v62  ;;  %v2489_v63 = vadd.f32 %v4476_v14, %v2488_v17  ;;  %v5006_v33 = vpop.f32.mrb[3].mxu1  ;;  %v5021_v34 = vpop.f32.mrb[5].mxu0  ;;  %v4479_v62 = vld [vmem:[%s7252_s22 + $0x5] ss:$0 sm:$0xff] }
 0xe10   :  { %v2491_v36 = vpop.f32.mrb[6].mxu0  ;;  %v4535_v34 = vld [vmem:[%s7253_s23 + $0x5] ss:$0 sm:$0xff] }
 0xe11   :  { %v3309_v39 = vadd.f32 %v4544_v29, %v3197_v4  ;;  %v5022_v40 = vpop.f32.mrb[7].mxu0  ;;  %v3199_v44 = vmul.f32 %v4532_v35, %v2489_v63  ;;  %v5533_v29 = vld [vmem:[%s7255_s25 + $0x60] sm:$0xff]   ;;  %v4482_v35 = vld [vmem:[%s7252_s22 + $0x8] ss:$0 sm:$0xff] }
 0xe12   :  { %v4550_v63 = vld [vmem:[%s7254_s24 + $0x6] ss:$0 sm:$0xff]  ;;  %v4549_v40 = vld [vmem:[%s7254_s24 + $0x5] ss:$0 sm:$0xff] }
 0xe13   :  { %v3323_v43 = vpack.c.bf16 %v3309_v39, %v3309_v39  ;;  %v3311_v16 = vadd.f32 %v4546_v47, %v3199_v44  ;;  %v5535_v44 = vld [vmem:[%s7255_s25 + $0x68] sm:$0xff]  }
 0xe14   :  { %v2433_v37 = vpop.f32.mrb[4].mxu1 }
 0xe15   :  { %v2434_v50 = vadd.f32 %v4475_v41, %v2433_v37  ;;  %v5013_v51 = vpop.f32.mrb[5].mxu1  ;;  %5116 = vmatmul.mubr.msk.bf16.vlgmr.msra.gmra.mrb[28].mxu0 %vm364_vm1, %v3323_v43  ;;  %v3325_v46 = vpack.c.bf16 %v3311_v16, %v3311_v16  ;;  %v5534_v43 = vld [vmem:[%s7255_s25 + $0x58] sm:$0xff]   ;;  %v5536_v16 = vld [vmem:[%s7255_s25 + $0x70] sm:$0xff]  }
 0xe16   :  { %v2436_v53 = vpop.f32.mrb[6].mxu1  ;;  %v2598_v30 = vpop.f32.mrb[8].mxu0  ;;  %5128 = vmatpush3.bf16.msra.mxu0 %v5525_v42  ;;  %5131 = vmatprep.mubr.msk.bf16.mxu0 %vm5643_vm2, %v5642_v8  ;;  %v4538_v51 = vld [vmem:[%s7253_s23 + $0x8] ss:$0 sm:$0xff] }
 0xe17   :  { %v3198_v45 = vmul.f32 %v4531_v48, %v2434_v50  ;;  %v2599_v19 = vadd.f32 %v4478_v49, %v2598_v30  ;;  %v5014_v58 = vpop.f32.mrb[7].mxu1  ;;  %v5037_v9 = vpop.f32.mrb[9].mxu0  ;;  %5129 = vmatprep.subr.bf16.mxu0 %v5642_v8 }
 0xe18   :  { %v2601_v24 = vpop.f32.mrb[10].mxu0 }
 0xe19   :  { %v3310_v38 = vadd.f32 %v4545_v52, %v3198_v45  ;;  %v5038_v10 = vpop.f32.mrb[11].mxu0  ;;  %v3201_v1 = vmul.f32 %v4534_v25, %v2599_v19  ;;  %v5537_v45 = vld [vmem:[%s7255_s25 + $0x80] sm:$0xff]   ;;  %v4552_v25 = vld [vmem:[%s7254_s24 + $0x8] ss:$0 sm:$0xff] }
 0xe1a   :  { %5130 = vmatpush3.bf16.msra.mxu0 %v5527_v5  ;;  %v4481_v5 = vld [vmem:[%s7252_s22 + $0x7] ss:$0 sm:$0xff]  ;;  %v4484_v10 = vld [vmem:[%s7252_s22 + $0xa] ss:$0 sm:$0xff] }
 0xe1b   :  { %v3324_v55 = vpack.c.bf16 %v3310_v38, %v3310_v38  ;;  %5143 = vmatprep.subr.bf16.mxu0 %v5642_v8  ;;  %v3313_v6 = vadd.f32 %v4548_v18, %v3201_v1  ;;  %v4537_v38 = vld [vmem:[%s7253_s23 + $0x7] ss:$0 sm:$0xff]  ;;  %v5538_v1 = vld [vmem:[%s7255_s25 + $0x78] sm:$0xff]   ;;  %v5539_v18 = vld [vmem:[%s7255_s25 + $0x88] sm:$0xff]  }
 0xe1c   :  { %v2543_v59 = vpop.f32.mrb[8].mxu1 }
 0xe1d   :  { %v2544_v31 = vadd.f32 %v4477_v57, %v2543_v59  ;;  %v5029_v32 = vpop.f32.mrb[9].mxu1  ;;  %5124 = vmatmul.mubr.msk.bf16.vlgmr.msra.gmra.mrb[32].mxu1 %vm364_vm1, %v3324_v55  ;;  %5132 = vmatmul.mubr.msk.bf16.vlgmr.msra.gmra.mrb[32].mxu0 %vm364_vm1, %v3325_v46  ;;  %v3327_v56 = vpack.c.bf16 %v3313_v6, %v3313_v6  ;;  %v5540_v6 = vld [vmem:[%s7255_s25 + $0x90] sm:$0xff]  }
 0xe1e   :  { %5136 = vmatpush3.bf16.msra.mxu1 %v5528_v60  ;;  %v2546_v22 = vpop.f32.mrb[10].mxu1  ;;  %v2708_v61 = vpop.f32.mrb[12].mxu0  ;;  %5144 = vmatpush3.bf16.msra.mxu0 %v5529_v3  ;;  %v4551_v3 = vld [vmem:[%s7254_s24 + $0x7] ss:$0 sm:$0xff] }
 0xe1f   :  { %v3200_v0 = vmul.f32 %v4533_v7, %v2544_v31  ;;  %v2709_v28 = vadd.f32 %v4480_v27, %v2708_v61  ;;  %v5030_v15 = vpop.f32.mrb[11].mxu1  ;;  %v5053_v26 = vpop.f32.mrb[13].mxu0  ;;  %5137 = vmatprep.subr.bf16.mxu1 %v5642_v8  ;;  %5145 = vmatprep.subr.bf16.mxu0 %v5642_v8 }
 0xe20   :  { %v2711_v11 = vpop.f32.mrb[14].mxu0  ;;  %5139 = vmatprep.mubr.msk.bf16.mxu1 %vm5643_vm2, %v5642_v8  ;;  %5147 = vmatprep.mubr.msk.bf16.mxu0 %vm5643_vm2, %v5642_v8 }
 0xe21   :  { %v3312_v54 = vadd.f32 %v4547_v2, %v3200_v0  ;;  %v5054_v14 = vpop.f32.mrb[15].mxu0  ;;  %v3203_v4 = vmul.f32 %v4536_v12, %v2709_v28  ;;  %v4540_v2 = vld [vmem:[%s7253_s23 + $0xa] ss:$0 sm:$0xff]  ;;  %v5541_v0 = vld [vmem:[%s7255_s25 + $0xa0] sm:$0xff]  }
 0xe22   :  { %5138 = vmatpush3.bf16.msra.mxu1 %v5530_v13  ;;  %5146 = vmatpush3.bf16.msra.mxu0 %v5531_v23  ;;  %v4483_v23 = vld [vmem:[%s7252_s22 + $0x9] ss:$0 sm:$0xff]  ;;  %v4554_v12 = vld [vmem:[%s7254_s24 + $0xa] ss:$0 sm:$0xff]  ;;  %v4486_v14 = vld [vmem:[%s7252_s22 + $0xc] ss:$0 sm:$0xff] }
 0xe23   :  { %v3326_v17 = vpack.c.bf16 %v3312_v54, %v3312_v54  ;;  %5151 = vmatprep.subr.bf16.mxu1 %v5642_v8  ;;  %5159 = vmatprep.subr.bf16.mxu0 %v5642_v8  ;;  %v3315_v47 = vadd.f32 %v4550_v63, %v3203_v4  ;;  %v4539_v54 = vld [vmem:[%s7253_s23 + $0x9] ss:$0 sm:$0xff]  ;;  %v5542_v4 = vld [vmem:[%s7255_s25 + $0x98] sm:$0xff]  }
 0xe24   :  { %v2653_v33 = vpop.f32.mrb[12].mxu1  ;;  %v5543_v63 = vld [vmem:[%s7255_s25 + $0xa8] sm:$0xff]  }
 0xe25   :  { %v2654_v36 = vadd.f32 %v4479_v62, %v2653_v33  ;;  %v5045_v39 = vpop.f32.mrb[13].mxu1  ;;  %5140 = vmatmul.mubr.msk.bf16.vlgmr.msra.gmra.mrb[36].mxu1 %vm364_vm1, %v3326_v17  ;;  %5148 = vmatmul.mubr.msk.bf16.vlgmr.msra.gmra.mrb[36].mxu0 %vm364_vm1, %v3327_v56  ;;  %v3329_v19 = vpack.c.bf16 %v3315_v47, %v3315_v47  ;;  %v5544_v47 = vld [vmem:[%s7255_s25 + $0xb0] sm:$0xff]  }
 0xe26   :  { %5152 = vmatpush3.bf16.msra.mxu1 %v5532_v21  ;;  %v2656_v41 = vpop.f32.mrb[14].mxu1  ;;  %v2818_v42 = vpop.f32.mrb[16].mxu0  ;;  %5160 = vmatpush3.bf16.msra.mxu0 %v5533_v29  ;;  %v4553_v29 = vld [vmem:[%s7254_s24 + $0x9] ss:$0 sm:$0xff] }
 0xe27   :  { %v3202_v37 = vmul.f32 %v4535_v34, %v2654_v36  ;;  %v2819_v48 = vadd.f32 %v4482_v35, %v2818_v42  ;;  %v5046_v49 = vpop.f32.mrb[15].mxu1  ;;  %v5069_v50 = vpop.f32.mrb[17].mxu0  ;;  %5153 = vmatprep.subr.bf16.mxu1 %v5642_v8  ;;  %5161 = vmatprep.subr.bf16.mxu0 %v5642_v8 }
 0xe28   :  { %v2821_v52 = vpop.f32.mrb[18].mxu0  ;;  %5155 = vmatprep.mubr.msk.bf16.mxu1 %vm5643_vm2, %v5642_v8  ;;  %5163 = vmatprep.mubr.msk.bf16.mxu0 %vm5643_vm2, %v5642_v8 }
 0xe29   :  { %v3314_v53 = vadd.f32 %v4549_v40, %v3202_v37  ;;  %v5070_v30 = vpop.f32.mrb[19].mxu0  ;;  %v3205_v9 = vmul.f32 %v4538_v51, %v2819_v48  ;;  %v4542_v40 = vld [vmem:[%s7253_s23 + $0xc] ss:$0 sm:$0xff]  ;;  %v5545_v37 = vld [vmem:[%s7255_s25 + $0xc0] sm:$0xff]  }
 0xe2a   :  { %5154 = vmatpush3.bf16.msra.mxu1 %v5534_v43  ;;  %5162 = vmatpush3.bf16.msra.mxu0 %v5535_v44  ;;  %v4485_v44 = vld [vmem:[%s7252_s22 + $0xb] ss:$0 sm:$0xff]  ;;  %v4556_v51 = vld [vmem:[%s7254_s24 + $0xc] ss:$0 sm:$0xff] }
 0xe2b   :  { %v3328_v58 = vpack.c.bf16 %v3314_v53, %v3314_v53  ;;  %5167 = vmatprep.subr.bf16.mxu1 %v5642_v8  ;;  %5175 = vmatprep.subr.bf16.mxu0 %v5642_v8  ;;  %v3317_v59 = vadd.f32 %v4552_v25, %v3205_v9  ;;  %v4541_v53 = vld [vmem:[%s7253_s23 + $0xb] ss:$0 sm:$0xff] }
 0xe2c   :  { %v2763_v24 = vpop.f32.mrb[16].mxu1 }
 0xe2d   :  { %v2764_v57 = vadd.f32 %v4481_v5, %v2763_v24  ;;  %v5061_v60 = vpop.f32.mrb[17].mxu1  ;;  %5156 = vmatmul.mubr.msk.bf16.vlgmr.msra.gmra.mrb[40].mxu1 %vm364_vm1, %v3328_v58  ;;  %5164 = vmatmul.mubr.msk.bf16.vlgmr.msra.gmra.mrb[40].mxu0 %vm364_vm1, %v3329_v19  ;;  %v3331_v28 = vpack.c.bf16 %v3317_v59, %v3317_v59  ;;  %v5546_v19 = vld [vmem:[%s7255_s25 + $0xb8] sm:$0xff]   ;;  %v5547_v58 = vld [vmem:[%s7255_s25 + $0xc8] sm:$0xff]  }
 0xe2e   :  { %5168 = vmatpush3.bf16.msra.mxu1 %v5536_v16  ;;  %v2766_v46 = vpop.f32.mrb[18].mxu1  ;;  %v2928_v55 = vpop.f32.mrb[20].mxu0  ;;  %5176 = vmatpush3.bf16.msra.mxu0 %v5537_v45  ;;  %v4555_v16 = vld [vmem:[%s7254_s24 + $0xb] ss:$0 sm:$0xff]  ;;  %v4557_v59 = vld [vmem:[%s7254_s24 + $0xd] ss:$0 sm:$0xff] }
 0xe2f   :  { %v3204_v7 = vmul.f32 %v4537_v38, %v2764_v57  ;;  %v2929_v27 = vadd.f32 %v4484_v10, %v2928_v55  ;;  %v5062_v31 = vpop.f32.mrb[19].mxu1  ;;  %v5085_v32 = vpop.f32.mrb[21].mxu0  ;;  %5169 = vmatprep.subr.bf16.mxu1 %v5642_v8  ;;  %5177 = vmatprep.subr.bf16.mxu0 %v5642_v8  ;;  %v4487_v10 = vld [vmem:[%s7252_s22 + $0xd] ss:$0 sm:$0xff]  ;;  %v5548_v57 = vld [vmem:[%s7255_s25 + $0xd0] sm:$0xff]  }
 0xe30   :  { %v2931_v22 = vpop.f32.mrb[22].mxu0  ;;  %5171 = vmatprep.mubr.msk.bf16.mxu1 %vm5643_vm2, %v5642_v8  ;;  %5179 = vmatprep.mubr.msk.bf16.mxu0 %vm5643_vm2, %v5642_v8  ;;  %v4543_v55 = vld [vmem:[%s7253_s23 + $0xd] ss:$0 sm:$0xff] }
 0xe31   :  { %v3316_v61 = vadd.f32 %v4551_v3, %v3204_v7  ;;  %v5086_v13 = vpop.f32.mrb[23].mxu0  ;;  %v3207_v26 = vmul.f32 %v4540_v2, %v2929_v27  ;;  %v5549_v27 = vld [vmem:[%s7255_s25 + $0xd8] sm:$0xff]  }
 0xe32   :  { %5170 = vmatpush3.bf16.msra.mxu1 %v5538_v1  ;;  %5178 = vmatpush3.bf16.msra.mxu0 %v5539_v18 }
 0xe33   :  { %v3330_v15 = vpack.c.bf16 %v3316_v61, %v3316_v61  ;;  %5183 = vmatprep.subr.bf16.mxu1 %v5642_v8  ;;  %5191 = vmatprep.subr.bf16.mxu0 %v5642_v8  ;;  %v3319_v33 = vadd.f32 %v4554_v12, %v3207_v26 }
 0xe34   :  { %v2873_v11 = vpop.f32.mrb[20].mxu1 }
 0xe35   :  { %v2874_v62 = vadd.f32 %v4483_v23, %v2873_v11  ;;  %v5077_v21 = vpop.f32.mrb[21].mxu1  ;;  %5172 = vmatmul.mubr.msk.bf16.vlgmr.msra.gmra.mrb[44].mxu1 %vm364_vm1, %v3330_v15  ;;  %5180 = vmatmul.mubr.msk.bf16.vlgmr.msra.gmra.mrb[44].mxu0 %vm364_vm1, %v3331_v28  ;;  %v3333_v48 = vpack.c.bf16 %v3319_v33, %v3319_v33  ;;  %v4559_v28 = vld [vmem:[%s7256_s26 + $0x1] ss:$0 sm:$0xff] }
 0xe36   :  { %5184 = vmatpush3.bf16.msra.mxu1 %v5540_v6  ;;  %v2876_v56 = vpop.f32.mrb[22].mxu1  ;;  %v3038_v17 = vpop.f32.mrb[24].mxu0  ;;  %5192 = vmatpush3.bf16.msra.mxu0 %v5541_v0  ;;  %v4558_v0 = vld [vmem:[%s7256_s26] ss:$0 sm:$0xff] }
 0xe37   :  { %v3206_v34 = vmul.f32 %v4539_v54, %v2874_v62  ;;  %v3039_v35 = vadd.f32 %v4486_v14, %v3038_v17  ;;  %v5078_v36 = vpop.f32.mrb[23].mxu1  ;;  %v5101_v39 = vpop.f32.mrb[25].mxu0  ;;  %5185 = vmatprep.subr.bf16.mxu1 %v5642_v8  ;;  %5193 = vmatprep.subr.bf16.mxu0 %v5642_v8  ;;  %v4560_v17 = vld [vmem:[%s7256_s26 + $0x2] ss:$0 sm:$0xff] }
 0xe38   :  { %v3041_v41 = vpop.f32.mrb[26].mxu0  ;;  %5187 = vmatprep.mubr.msk.bf16.mxu1 %vm5643_vm2, %v5642_v8  ;;  %5195 = vmatprep.mubr.msk.bf16.mxu0 %vm5643_vm2, %v5642_v8 }
 0xe39   :  { %v3318_v42 = vadd.f32 %v4553_v29, %v3206_v34  ;;  %v5102_v43 = vpop.f32.mrb[27].mxu0  ;;  %v3209_v50 = vmul.f32 %v4542_v40, %v3039_v35 }
 0xe3a   :  { %5186 = vmatpush3.bf16.msra.mxu1 %v5542_v4  ;;  %5194 = vmatpush3.bf16.msra.mxu0 %v5543_v63  ;;  %v4561_v4 = vld [vmem:[%s7256_s26 + $0x3] ss:$0 sm:$0xff] }
 0xe3b   :  { %v3332_v49 = vpack.c.bf16 %v3318_v42, %v3318_v42  ;;  %5199 = vmatprep.subr.bf16.mxu1 %v5642_v8  ;;  %5207 = vmatprep.subr.bf16.mxu0 %v5642_v8  ;;  %v3321_v9 = vadd.f32 %v4556_v51, %v3209_v50 }
 0xe3c   :  { %v2983_v52 = vpop.f32.mrb[24].mxu1 }
 0xe3d   :  { %v2984_v30 = vadd.f32 %v4485_v44, %v2983_v52  ;;  %v5093_v5 = vpop.f32.mrb[25].mxu1  ;;  %5188 = vmatmul.mubr.msk.bf16.vlgmr.msra.gmra.mrb[48].mxu1 %vm364_vm1, %v3332_v49  ;;  %5196 = vmatmul.mubr.msk.bf16.vlgmr.msra.gmra.mrb[48].mxu0 %vm364_vm1, %v3333_v48  ;;  %v3335_v60 = vpack.c.bf16 %v3321_v9, %v3321_v9  ;;  %v4562_v48 = vld [vmem:[%s7256_s26 + $0x4] ss:$0 sm:$0xff]  ;;  %v4563_v49 = vld [vmem:[%s7256_s26 + $0x5] ss:$0 sm:$0xff] }
 0xe3e   :  { %5200 = vmatpush3.bf16.msra.mxu1 %v5544_v47  ;;  %v2986_v45 = vpop.f32.mrb[26].mxu1  ;;  %5208 = vmatpush3.bf16.msra.mxu0 %v5545_v37 }
 0xe3f   :  { %v3208_v25 = vmul.f32 %v4541_v53, %v2984_v30  ;;  %v5094_v24 = vpop.f32.mrb[27].mxu1  ;;  %5201 = vmatprep.subr.bf16.mxu1 %v5642_v8  ;;  %5209 = vmatprep.subr.bf16.mxu0 %v5642_v8 }
 0xe40   :  { %5203 = vmatprep.mubr.msk.bf16.mxu1 %vm5643_vm2, %v5642_v8  ;;  %5211 = vmatprep.mubr.msk.bf16.mxu0 %vm5643_vm2, %v5642_v8  ;;  %v4564_v24 = vld [vmem:[%s7256_s26 + $0x6] ss:$0 sm:$0xff] }
 0xe41   :  { %v3320_v38 = vadd.f32 %v4555_v16, %v3208_v25 }
 0xe42   :  { %5202 = vmatpush3.bf16.msra.mxu1 %v5546_v19  ;;  %5210 = vmatpush3.bf16.msra.mxu0 %v5547_v58 }
 0xe43   :  { %v3334_v3 = vpack.c.bf16 %v3320_v38, %v3320_v38  ;;  %5215 = vmatprep.subr.bf16.mxu1 %v5642_v8  ;;  %v4565_v38 = vld [vmem:[%s7256_s26 + $0x7] ss:$0 sm:$0xff] }
 0xe44   :  { %v3093_v46 = vpop.f32.mrb[28].mxu1 }
 0xe45   :  { %v3094_v1 = vadd.f32 %v4487_v10, %v3093_v46  ;;  %v5109_v18 = vpop.f32.mrb[29].mxu1  ;;  %5204 = vmatmul.mubr.msk.bf16.vlgmr.msra.gmra.mrb[52].mxu1 %vm364_vm1, %v3334_v3  ;;  %5212 = vmatmul.mubr.msk.bf16.vlgmr.msra.gmra.mrb[52].mxu0 %vm364_vm1, %v3335_v60 }
 0xe46   :  { %5216 = vmatpush3.bf16.msra.mxu1 %v5548_v57  ;;  %v3096_v7 = vpop.f32.mrb[30].mxu1  ;;  %5219 = vmatprep.mubr.msk.bf16.mxu1 %vm5643_vm2, %v5642_v8 }
 0xe47   :  { %v3210_v31 = vmul.f32 %v4543_v55, %v3094_v1  ;;  %v5110_v32 = vpop.f32.mrb[31].mxu1  ;;  %5217 = vmatprep.subr.bf16.mxu1 %v5642_v8 }
 0xe49   :  { %v3322_v2 = vadd.f32 %v4557_v59, %v3210_v31 }
 0xe4a   :  { %5218 = vmatpush3.bf16.msra.mxu1 %v5549_v27 }
 0xe4b   :  { %v3336_v22 = vpack.c.bf16 %v3322_v2, %v3322_v2  ;;  %v4566_v2 = vld [vmem:[%s7256_s26 + $0x8] ss:$0 sm:$0xff] }
 0xe4d   :  { %5220 = vmatmul.mubr.msk.bf16.vlgmr.msra.gmra.mrb[56].mxu1 %vm364_vm1, %v3336_v22  ;;  %v4567_v22 = vld [vmem:[%s7256_s26 + $0x9] ss:$0 sm:$0xff] }
 0xee8   :  { %v3540_v61 = vpop.f32.mrb[28].mxu0 }
 0xee9   :  { %v5117_v13 = vpop.f32.mrb[29].mxu0  ;;  %v3541_v8 = vadd.f32 %v4558_v0, %v3540_v61 }
 0xeea   :  { %v3543_v23 = vpop.f32.mrb[30].mxu0 }
 0xeeb   :  { %v5118_v6 = vpop.f32.mrb[31].mxu0 }
 0xef0   :  { %v3595_v15 = vpop.f32.mrb[32].mxu1  ;;  %v3650_v26 = vpop.f32.mrb[32].mxu0 }
 0xef1   :  { %v3596_v12 = vadd.f32 %v4559_v28, %v3595_v15  ;;  %v5125_v11 = vpop.f32.mrb[33].mxu1  ;;  %v5133_v54 = vpop.f32.mrb[33].mxu0  ;;  %v3651_v34 = vadd.f32 %v4560_v17, %v3650_v26 }
 0xef2   :  { %v3598_v14 = vpop.f32.mrb[34].mxu1  ;;  %v3653_v62 = vpop.f32.mrb[34].mxu0 }
 0xef3   :  { %v4275_v21 = vcombine.low %v3541_v8, %v3596_v12  ;;  %v5126_v29 = vpop.f32.mrb[35].mxu1  ;;  %v5134_v56 = vpop.f32.mrb[35].mxu0  ;;  %v4568_v14 = vld [vmem:[%s7256_s26 + $0xa] ss:$0 sm:$0xff]  ;;  %v4569_v62 = vld [vmem:[%s7256_s26 + $0xb] ss:$0 sm:$0xff] }
 0xef5   :  { %v4283_v47 = vrot.slane %v4275_v21, %v6747_v20 }
 0xef8   :  { %v3705_v63 = vpop.f32.mrb[36].mxu1  ;;  %v3760_v33 = vpop.f32.mrb[36].mxu0 }
 0xef9   :  { %v3706_v35 = vadd.f32 %v4561_v4, %v3705_v63  ;;  %v5141_v36 = vpop.f32.mrb[37].mxu1  ;;  %v5149_v39 = vpop.f32.mrb[37].mxu0  ;;  %v3761_v53 = vadd.f32 %v4562_v48, %v3760_v33 }
 0xefa   :  { %v3708_v40 = vpop.f32.mrb[38].mxu1  ;;  %v3763_v41 = vpop.f32.mrb[38].mxu0 }
 0xefb   :  { %v4276_v42 = vcombine.low %v3651_v34, %v3706_v35  ;;  %v5142_v43 = vpop.f32.mrb[39].mxu1  ;;  %v5150_v44 = vpop.f32.mrb[39].mxu0 }
 0xefc   :  { %v4571_v43 = vld [vmem:[%s7256_s26 + $0xd] ss:$0 sm:$0xff] }
 0xefd   :  { %v4290_v37 = vrot.slane %v4276_v42, %v6747_v20  ;;  %v4570_v42 = vld [vmem:[%s7256_s26 + $0xc] ss:$0 sm:$0xff] }
 0xeff   :  { %v4291_v50 = vcombine.low %v4283_v47, %v4290_v37 }
 0xf00   :  { %v3815_v51 = vpop.f32.mrb[40].mxu1  ;;  %v3870_v52 = vpop.f32.mrb[40].mxu0 }
 0xf01   :  { %4338 = vst [vmem:[%s7257_s27] sm:$0xff] %v4291_v50  ;;  %v3816_v30 = vadd.f32 %v4563_v49, %v3815_v51  ;;  %v5157_v5 = vpop.f32.mrb[41].mxu1  ;;  %v5165_v16 = vpop.f32.mrb[41].mxu0  ;;  %v3871_v60 = vadd.f32 %v4564_v24, %v3870_v52 }
 0xf02   :  { %v3818_v45 = vpop.f32.mrb[42].mxu1  ;;  %v3873_v19 = vpop.f32.mrb[42].mxu0 }
 0xf03   :  { %v4292_v58 = vcombine.low %v3761_v53, %v3816_v30  ;;  %v5158_v9 = vpop.f32.mrb[43].mxu1  ;;  %v5166_v25 = vpop.f32.mrb[43].mxu0 }
 0xf05   :  { %v4300_v31 = vrot.slane %v4292_v58, %v6747_v20 }
 0xf08   :  { %v3925_v10 = vpop.f32.mrb[44].mxu1  ;;  %v3980_v57 = vpop.f32.mrb[44].mxu0 }
 0xf09   :  { %v3926_v3 = vadd.f32 %v4565_v38, %v3925_v10  ;;  %v5173_v46 = vpop.f32.mrb[45].mxu1  ;;  %v5181_v55 = vpop.f32.mrb[45].mxu0  ;;  %v3981_v6 = vadd.f32 %v4566_v2, %v3980_v57 }
 0xf0a   :  { %v3928_v1 = vpop.f32.mrb[46].mxu1  ;;  %v3983_v18 = vpop.f32.mrb[46].mxu0 }
 0xf0b   :  { %v4293_v59 = vcombine.low %v3871_v60, %v3926_v3  ;;  %v5174_v7 = vpop.f32.mrb[47].mxu1  ;;  %v5182_v27 = vpop.f32.mrb[47].mxu0 }
 0xf0d   :  { %v4307_v32 = vrot.slane %v4293_v59, %v6747_v20 }
 0xf0f   :  { %v4308_v61 = vcombine.low %v4300_v31, %v4307_v32 }
 0xf10   :  { %v4035_v13 = vpop.f32.mrb[48].mxu1  ;;  %v4090_v23 = vpop.f32.mrb[48].mxu0 }
 0xf11   :  { %4339 = vst [vmem:[%s7257_s27 + $0x8] sm:$0xff] %v4308_v61  ;;  %v4036_v0 = vadd.f32 %v4567_v22, %v4035_v13  ;;  %v5189_v28 = vpop.f32.mrb[49].mxu1  ;;  %v5197_v15 = vpop.f32.mrb[49].mxu0  ;;  %v4091_v56 = vadd.f32 %v4568_v14, %v4090_v23 }
 0xf12   :  { %v4038_v26 = vpop.f32.mrb[50].mxu1  ;;  %v4093_v8 = vpop.f32.mrb[50].mxu0 }
 0xf13   :  { %v4309_v12 = vcombine.low %v3981_v6, %v4036_v0  ;;  %v5190_v11 = vpop.f32.mrb[51].mxu1  ;;  %v5198_v54 = vpop.f32.mrb[51].mxu0 }
 0xf15   :  { %v4317_v40 = vrot.slane %v4309_v12, %v6747_v20 }
 0xf18   :  { %v4145_v21 = vpop.f32.mrb[52].mxu1  ;;  %v4200_v29 = vpop.f32.mrb[52].mxu0 }
 0xf19   :  { %v4146_v17 = vadd.f32 %v4569_v62, %v4145_v21  ;;  %v5205_v4 = vpop.f32.mrb[53].mxu1  ;;  %v5213_v63 = vpop.f32.mrb[53].mxu0  ;;  %v4201_v37 = vadd.f32 %v4570_v42, %v4200_v29 }
 0xf1a   :  { %v4148_v33 = vpop.f32.mrb[54].mxu1  ;;  %v4203_v34 = vpop.f32.mrb[54].mxu0 }
 0xf1b   :  { %v4310_v35 = vcombine.low %v4091_v56, %v4146_v17  ;;  %v5206_v36 = vpop.f32.mrb[55].mxu1  ;;  %v5214_v39 = vpop.f32.mrb[55].mxu0 }
 0xf1d   :  { %v4324_v41 = vrot.slane %v4310_v35, %v6747_v20 }
 0xf1f   :  { %v4325_v44 = vcombine.low %v4317_v40, %v4324_v41 }
 0xf20   :  { %v4255_v47 = vpop.f32.mrb[56].mxu1 }
 0xf21   :  { %4340 = vst [vmem:[%s7257_s27 + $0x10] sm:$0xff] %v4325_v44  ;;  %v4256_v48 = vadd.f32 %v4571_v43, %v4255_v47  ;;  %v5221_v49 = vpop.f32.mrb[57].mxu1 }
 0xf22   :  { %v4258_v50 = vpop.f32.mrb[58].mxu1 }
 0xf23   :  { %v4326_v51 = vcombine.low %v4201_v37, %v4256_v48  ;;  %v5222_v20 = vpop.f32.mrb[59].mxu1 }
 0xf25   :  { %4614 = vst.sshfl [vmem:[%s7257_s27 + $0x18] sm:$0x33 pattern:$0x76325410] %v4326_v51 }

</bundles_post_ra>
